<compile_context>
chip_gen: v6e
topology: v6e:2x2x1
jax: 0.10.0
libtpu: 0.0.40
codegen_flags: <defaults>
</compile_context>

<pallas_src>
import jax
import jax.numpy as jnp
from jax.experimental import pallas as pl
from jax.experimental.pallas import tpu as pltpu

D_IN, H1, H2, H3, D_OUT = 784, 1024, 512, 256, 10
D_OUT_PAD = 128    # lane-dense output width (unmasked full-vreg stores)


def _round_up(n, m):
    return ((n + m - 1) // m) * m


def mlp_kernel(x_ref, w1_ref, b1_ref, w2_ref, b2_ref,
               w3_ref, b3_ref, w4_ref, b4_ref, o_ref):
    """Fused relu(x@W1+b1)@W2 ... @W4+b4 on one (tb, .) batch tile.

    x arrives f32 and is cast to bf16 in-kernel (saves a separate wrapper
    pad/cast pass). All matmuls run bf16 x bf16 on the MXU with f32
    accumulation; biases and the output tile stay f32.
    """
    h = x_ref[...].astype(jnp.bfloat16)
    h = jnp.dot(h, w1_ref[...], preferred_element_type=jnp.float32) + b1_ref[...]
    h = jnp.maximum(h, 0.0).astype(jnp.bfloat16)
    h = jnp.dot(h, w2_ref[...], preferred_element_type=jnp.float32) + b2_ref[...]
    h = jnp.maximum(h, 0.0).astype(jnp.bfloat16)
    h = jnp.dot(h, w3_ref[...], preferred_element_type=jnp.float32) + b3_ref[...]
    h = jnp.maximum(h, 0.0).astype(jnp.bfloat16)
    h = jnp.dot(h, w4_ref[...], preferred_element_type=jnp.float32) + b4_ref[...]
    o_ref[...] = h.astype(o_ref.dtype)


def prepare_params(params):
    """One-time weight reformat (hoisted out of the per-call path).

    Casts weights to bf16 and zero-pads W4/b4 from 10 -> 128 output lanes so
    the kernel's output stores are full, unmasked vregs.
    """
    (w1, b1), (w2, b2), (w3, b3), (w4, b4) = params
    w4p = jnp.pad(jnp.asarray(w4, jnp.float32), ((0, 0), (0, D_OUT_PAD - D_OUT)))
    b4p = jnp.pad(jnp.asarray(b4, jnp.float32), ((0, 0), (0, D_OUT_PAD - D_OUT)))
    return ((jnp.asarray(w1, jnp.bfloat16), jnp.asarray(b1, jnp.float32)),
            (jnp.asarray(w2, jnp.bfloat16), jnp.asarray(b2, jnp.float32)),
            (jnp.asarray(w3, jnp.bfloat16), jnp.asarray(b3, jnp.float32)),
            (w4p.astype(jnp.bfloat16), b4p))


def mlp_forward(x, prepped, *, tile_b=512):
    """x: (B, 1, 28, 28) or (B, 784) f32. prepped: prepare_params(params).

    Returns (B, 10) f32 logits. Intended to be wrapped in jax.jit so the
    (rare) batch pad and the final [:B, :10] slice fuse around the kernel.
    """
    x = jnp.asarray(x, jnp.float32).reshape(-1, D_IN)
    B = x.shape[0]

    # Batch tile: one grid step for B <= tile_b (no pointless grid splitting on
    # single-TC v5e/v6e, full MXU row fill), 512-row tiles beyond that so the
    # "parallel" batch axis can shard across the 2 TensorCores on v7x.
    # Multiple of 16 for bf16 sublane packing.
    tb = min(tile_b, _round_up(B, 16))
    B_pad = _round_up(B, tb)
    if B_pad != B:
        x = jnp.pad(x, ((0, B_pad - B), (0, 0)))   # zero rows, sliced off below

    (w1, b1), (w2, b2), (w3, b3), (w4, b4) = prepped

    def full_spec(arr):
        nd = arr.ndim
        # Constant index map: weights/biases stay resident in VMEM for the
        # whole grid (one HBM DMA each, ~3.3 MiB of bf16 weights total).
        return pl.BlockSpec(arr.shape, lambda i, _nd=nd: (0,) * _nd)

    in_specs = [
        # (tb, 784): last dim equals the full array dim, so the (8,128) block
        # rule is satisfied without padding 784 -> 896.
        pl.BlockSpec((tb, D_IN), lambda i: (i, 0)),
        full_spec(w1), full_spec(b1),
        full_spec(w2), full_spec(b2),
        full_spec(w3), full_spec(b3),
        full_spec(w4), full_spec(b4),
    ]
    out_specs = pl.BlockSpec((tb, D_OUT_PAD), lambda i: (i, 0))

    flops = 2 * B_pad * (D_IN * H1 + H1 * H2 + H2 * H3 + H3 * D_OUT_PAD)
    weight_bytes = 2 * (D_IN * H1 + H1 * H2 + H2 * H3 + H3 * D_OUT_PAD)
    bias_bytes = 4 * (H1 + H2 + H3 + D_OUT_PAD)
    bytes_accessed = (B_pad * D_IN * 4 + weight_bytes + bias_bytes
                      + B_pad * D_OUT_PAD * 4)

    out = pl.pallas_call(
        mlp_kernel,
        out_shape=jax.ShapeDtypeStruct((B_pad, D_OUT_PAD), jnp.float32),
        grid_spec=pltpu.PrefetchScalarGridSpec(
            num_scalar_prefetch=0,
            grid=(B_pad // tb,),
            in_specs=in_specs,
            out_specs=out_specs,
        ),
        compiler_params=pltpu.CompilerParams(
            dimension_semantics=("parallel",),
            # 48 MiB is valid on every generation (v7x has 64 MiB physical
            # VMEM per TC); tb=512 needs ~17 MiB double-buffered.
            vmem_limit_bytes=48 << 20,
        ),
        cost_estimate=pl.CostEstimate(
            flops=flops, transcendentals=0, bytes_accessed=bytes_accessed),
    )(x, w1, b1, w2, b2, w3, b3, w4, b4)

    return out[:B, :D_OUT]


def init_params(key):
    """Deterministic init (nn.Linear-style bounds), weights stored as (in, out)."""
    dims = [(D_IN, H1), (H1, H2), (H2, H3), (H3, D_OUT)]
    params = []
    for i, (din, dout) in enumerate(dims):
        kw, kb = jax.random.split(jax.random.fold_in(key, i))
        bound = 1.0 / jnp.sqrt(din)
        w = jax.random.uniform(kw, (din, dout), jnp.float32, -bound, bound)
        b = jax.random.uniform(kb, (1, dout), jnp.float32, -bound, bound)
        params.append((w, b))
    return params


def reference_forward_f32(x, params):
    """Pure-f32 reference with the original PyTorch module's semantics."""
    x = jnp.asarray(x, jnp.float32).reshape(-1, D_IN)
    (w1, b1), (w2, b2), (w3, b3), (w4, b4) = params
    h = jnp.maximum(x @ w1 + b1, 0.0)
    h = jnp.maximum(h @ w2 + b2, 0.0)
    h = jnp.maximum(h @ w3 + b3, 0.0)
    return h @ w4 + b4


def reference_forward_bf16(x, params):
    """Reference mirroring the kernel's numerics (bf16 operands, f32 accum)."""
    h = jnp.asarray(x, jnp.float32).reshape(-1, D_IN).astype(jnp.bfloat16)
    (w1, b1), (w2, b2), (w3, b3), (w4, b4) = params

    def lin(a, w, b):
        return jnp.dot(a, w.astype(jnp.bfloat16),
                       preferred_element_type=jnp.float32) + b

    h = jnp.maximum(lin(h, w1, b1), 0.0).astype(jnp.bfloat16)
    h = jnp.maximum(lin(h, w2, b2), 0.0).astype(jnp.bfloat16)
    h = jnp.maximum(lin(h, w3, b3), 0.0).astype(jnp.bfloat16)
    return lin(h, w4, b4)


if __name__ == "__main__":
    key = jax.random.PRNGKey(0)
    kx, kp = jax.random.split(key)
    B = 8
    x = jax.random.normal(kx, (B, 1, 28, 28), jnp.float32)  # NCHW like PyTorch
    params = init_params(kp)

    # Weight reformat is done exactly once, outside the per-call path.
    prepped = jax.tree_util.tree_map(jax.block_until_ready,
                                     prepare_params(params))
    forward = jax.jit(mlp_forward)

    out = jax.block_until_ready(forward(x, prepped))
    assert out.shape == (B, D_OUT)

    # Tight check against a reference that mirrors the kernel's bf16/f32 math.
    ref_bf16 = reference_forward_bf16(x, params)
    assert jnp.allclose(out, ref_bf16, atol=5e-3, rtol=5e-3), (
        float(jnp.max(jnp.abs(out - ref_bf16))))

    # Loose check against the exact f32 semantics of the original module
    # (tolerance relaxed because MXU operands are bf16).
    # TODO(synk): if strict f32 fidelity is ever required, run layer 1 in f32.
    ref_f32 = reference_forward_f32(x, params)
    assert jnp.allclose(out, ref_f32, atol=1e-1, rtol=1e-1), (
        float(jnp.max(jnp.abs(out - ref_f32))))

    print("KERNEL_OK")
</pallas_src>

<mosaic_0001>
module attributes {stable_mosaic.version = 11 : i64} {
  func.func @mlp_kernel(%arg0: i32, %arg1: memref<16x784xf32, #tpu.memory_space<vmem>>, %arg2: memref<784x1024xbf16, #tpu.memory_space<vmem>>, %arg3: memref<1x1024xf32, #tpu.memory_space<vmem>>, %arg4: memref<1024x512xbf16, #tpu.memory_space<vmem>>, %arg5: memref<1x512xf32, #tpu.memory_space<vmem>>, %arg6: memref<512x256xbf16, #tpu.memory_space<vmem>>, %arg7: memref<1x256xf32, #tpu.memory_space<vmem>>, %arg8: memref<256x128xbf16, #tpu.memory_space<vmem>>, %arg9: memref<1x128xf32, #tpu.memory_space<vmem>>, %arg10: memref<16x128xf32, #tpu.memory_space<vmem>>) attributes {dimension_semantics = [#tpu.dimension_semantics<parallel>], iteration_bounds = array<i64: 1>, scalar_prefetch = 0 : i64, scratch_operands = 0 : i64, tpu.core_type = #tpu.core_type<tc>, window_params = [{transform_indices = @transform_0, window_bounds = array<i64: 16, 784>}, {pipeline_mode = #tpu.pipeline_mode<synchronous>, transform_indices = @transform_1, window_bounds = array<i64: 784, 1024>}, {pipeline_mode = #tpu.pipeline_mode<synchronous>, transform_indices = @transform_2, window_bounds = array<i64: 1, 1024>}, {pipeline_mode = #tpu.pipeline_mode<synchronous>, transform_indices = @transform_3, window_bounds = array<i64: 1024, 512>}, {pipeline_mode = #tpu.pipeline_mode<synchronous>, transform_indices = @transform_4, window_bounds = array<i64: 1, 512>}, {pipeline_mode = #tpu.pipeline_mode<synchronous>, transform_indices = @transform_5, window_bounds = array<i64: 512, 256>}, {pipeline_mode = #tpu.pipeline_mode<synchronous>, transform_indices = @transform_6, window_bounds = array<i64: 1, 256>}, {pipeline_mode = #tpu.pipeline_mode<synchronous>, transform_indices = @transform_7, window_bounds = array<i64: 256, 128>}, {pipeline_mode = #tpu.pipeline_mode<synchronous>, transform_indices = @transform_8, window_bounds = array<i64: 1, 128>}, {transform_indices = @transform_9, window_bounds = array<i64: 16, 128>}]} {
    %c0 = arith.constant 0 : index
    %c0_0 = arith.constant 0 : index
    %0 = vector.load %arg1[%c0, %c0_0] : memref<16x784xf32, #tpu.memory_space<vmem>>, vector<16x784xf32>
    %1 = arith.truncf %0 : vector<16x784xf32> to vector<16x784xbf16>
    %c0_1 = arith.constant 0 : index
    %c0_2 = arith.constant 0 : index
    %2 = vector.load %arg2[%c0_1, %c0_2] : memref<784x1024xbf16, #tpu.memory_space<vmem>>, vector<784x1024xbf16>
    %cst = arith.constant dense<0.000000e+00> : vector<16x1024xf32>
    %3 = tpu.matmul %1, %2, %cst {dimension_numbers = #tpu.dot_dimension_numbers<[1], [0], [0], [1], [0, 0, 1, 1], [], []>} : vector<16x784xbf16>, vector<784x1024xbf16>, vector<16x1024xf32> -> vector<16x1024xf32>
    %c0_3 = arith.constant 0 : index
    %c0_4 = arith.constant 0 : index
    %4 = vector.load %arg3[%c0_3, %c0_4] : memref<1x1024xf32, #tpu.memory_space<vmem>>, vector<1x1024xf32>
    %5 = vector.broadcast %4 : vector<1x1024xf32> to vector<16x1024xf32>
    %6 = arith.addf %3, %5 : vector<16x1024xf32>
    %cst_5 = arith.constant 0.000000e+00 : f32
    %7 = vector.broadcast %cst_5 : f32 to vector<16x1024xf32>
    %8 = arith.maximumf %6, %7 : vector<16x1024xf32>
    %9 = arith.truncf %8 : vector<16x1024xf32> to vector<16x1024xbf16>
    %c0_6 = arith.constant 0 : index
    %c0_7 = arith.constant 0 : index
    %10 = vector.load %arg4[%c0_6, %c0_7] : memref<1024x512xbf16, #tpu.memory_space<vmem>>, vector<1024x512xbf16>
    %cst_8 = arith.constant dense<0.000000e+00> : vector<16x512xf32>
    %11 = tpu.matmul %9, %10, %cst_8 {dimension_numbers = #tpu.dot_dimension_numbers<[1], [0], [0], [1], [0, 0, 1, 1], [], []>} : vector<16x1024xbf16>, vector<1024x512xbf16>, vector<16x512xf32> -> vector<16x512xf32>
    %c0_9 = arith.constant 0 : index
    %c0_10 = arith.constant 0 : index
    %12 = vector.load %arg5[%c0_9, %c0_10] : memref<1x512xf32, #tpu.memory_space<vmem>>, vector<1x512xf32>
    %13 = vector.broadcast %12 : vector<1x512xf32> to vector<16x512xf32>
    %14 = arith.addf %11, %13 : vector<16x512xf32>
    %cst_11 = arith.constant 0.000000e+00 : f32
    %15 = vector.broadcast %cst_11 : f32 to vector<16x512xf32>
    %16 = arith.maximumf %14, %15 : vector<16x512xf32>
    %17 = arith.truncf %16 : vector<16x512xf32> to vector<16x512xbf16>
    %c0_12 = arith.constant 0 : index
    %c0_13 = arith.constant 0 : index
    %18 = vector.load %arg6[%c0_12, %c0_13] : memref<512x256xbf16, #tpu.memory_space<vmem>>, vector<512x256xbf16>
    %cst_14 = arith.constant dense<0.000000e+00> : vector<16x256xf32>
    %19 = tpu.matmul %17, %18, %cst_14 {dimension_numbers = #tpu.dot_dimension_numbers<[1], [0], [0], [1], [0, 0, 1, 1], [], []>} : vector<16x512xbf16>, vector<512x256xbf16>, vector<16x256xf32> -> vector<16x256xf32>
    %c0_15 = arith.constant 0 : index
    %c0_16 = arith.constant 0 : index
    %20 = vector.load %arg7[%c0_15, %c0_16] : memref<1x256xf32, #tpu.memory_space<vmem>>, vector<1x256xf32>
    %21 = vector.broadcast %20 : vector<1x256xf32> to vector<16x256xf32>
    %22 = arith.addf %19, %21 : vector<16x256xf32>
    %cst_17 = arith.constant 0.000000e+00 : f32
    %23 = vector.broadcast %cst_17 : f32 to vector<16x256xf32>
    %24 = arith.maximumf %22, %23 : vector<16x256xf32>
    %25 = arith.truncf %24 : vector<16x256xf32> to vector<16x256xbf16>
    %c0_18 = arith.constant 0 : index
    %c0_19 = arith.constant 0 : index
    %26 = vector.load %arg8[%c0_18, %c0_19] : memref<256x128xbf16, #tpu.memory_space<vmem>>, vector<256x128xbf16>
    %cst_20 = arith.constant dense<0.000000e+00> : vector<16x128xf32>
    %27 = tpu.matmul %25, %26, %cst_20 {dimension_numbers = #tpu.dot_dimension_numbers<[1], [0], [0], [1], [0, 0, 1, 1], [], []>} : vector<16x256xbf16>, vector<256x128xbf16>, vector<16x128xf32> -> vector<16x128xf32>
    %c0_21 = arith.constant 0 : index
    %c0_22 = arith.constant 0 : index
    %28 = vector.load %arg9[%c0_21, %c0_22] : memref<1x128xf32, #tpu.memory_space<vmem>>, vector<1x128xf32>
    %29 = vector.broadcast %28 : vector<1x128xf32> to vector<16x128xf32>
    %30 = arith.addf %27, %29 : vector<16x128xf32>
    %c0_23 = arith.constant 0 : index
    %c0_24 = arith.constant 0 : index
    %31 = vector.load %arg10[%c0_23, %c0_24] : memref<16x128xf32, #tpu.memory_space<vmem>>, vector<16x128xf32>
    tpu.vector_store %arg10[%c0_23, %c0_24], %30 {strides = array<i32>} : memref<16x128xf32, #tpu.memory_space<vmem>>, vector<16x128xf32>,
    return
  }
  func.func @transform_0(%arg0: i32) -> (i32, i32) {
    %c0_i32 = arith.constant 0 : i32
    %c0_i32_0 = arith.constant 0 : i32
    return %arg0, %c0_i32 : i32, i32
  }
  func.func @transform_1(%arg0: i32) -> (i32, i32) {
    %c0_i32 = arith.constant 0 : i32
    %c0_i32_0 = arith.constant 0 : i32
    %c0_i32_1 = arith.constant 0 : i32
    return %c0_i32, %c0_i32_0 : i32, i32
  }
  func.func @transform_2(%arg0: i32) -> (i32, i32) {
    %c0_i32 = arith.constant 0 : i32
    %c0_i32_0 = arith.constant 0 : i32
    %c0_i32_1 = arith.constant 0 : i32
    return %c0_i32, %c0_i32_0 : i32, i32
  }
  func.func @transform_3(%arg0: i32) -> (i32, i32) {
    %c0_i32 = arith.constant 0 : i32
    %c0_i32_0 = arith.constant 0 : i32
    %c0_i32_1 = arith.constant 0 : i32
    return %c0_i32, %c0_i32_0 : i32, i32
  }
  func.func @transform_4(%arg0: i32) -> (i32, i32) {
    %c0_i32 = arith.constant 0 : i32
    %c0_i32_0 = arith.constant 0 : i32
    %c0_i32_1 = arith.constant 0 : i32
    return %c0_i32, %c0_i32_0 : i32, i32
  }
  func.func @transform_5(%arg0: i32) -> (i32, i32) {
    %c0_i32 = arith.constant 0 : i32
    %c0_i32_0 = arith.constant 0 : i32
    %c0_i32_1 = arith.constant 0 : i32
    return %c0_i32, %c0_i32_0 : i32, i32
  }
  func.func @transform_6(%arg0: i32) -> (i32, i32) {
    %c0_i32 = arith.constant 0 : i32
    %c0_i32_0 = arith.constant 0 : i32
    %c0_i32_1 = arith.constant 0 : i32
    return %c0_i32, %c0_i32_0 : i32, i32
  }
  func.func @transform_7(%arg0: i32) -> (i32, i32) {
    %c0_i32 = arith.constant 0 : i32
    %c0_i32_0 = arith.constant 0 : i32
    %c0_i32_1 = arith.constant 0 : i32
    return %c0_i32, %c0_i32_0 : i32, i32
  }
  func.func @transform_8(%arg0: i32) -> (i32, i32) {
    %c0_i32 = arith.constant 0 : i32
    %c0_i32_0 = arith.constant 0 : i32
    %c0_i32_1 = arith.constant 0 : i32
    return %c0_i32, %c0_i32_0 : i32, i32
  }
  func.func @transform_9(%arg0: i32) -> (i32, i32) {
    %c0_i32 = arith.constant 0 : i32
    %c0_i32_0 = arith.constant 0 : i32
    return %arg0, %c0_i32 : i32, i32
  }
}

</mosaic_0001>

<bundles_post_ra>
// kernel: mlp_forward.1
= control target key start
LH: loop header
LB: loop body
LE: loop exit
PB: predicated region body
PF: predicated region fallthrough
CT: control target
= control target key end

     0   :  { %14 = vsyncpa [#allocation3], 0  ;;  %s7590_s0 = inlined_call_operand.vmem [shape: f32[16,784], index: 0, kind: input, shape index: {}]   ;;  %s7591_s1 = inlined_call_operand.hbm [shape: bf16[784,1024], index: 1, kind: input, shape index: {}]   ;;  %s7592_s2 = inlined_call_operand.hbm [shape: f32[1,1024], index: 2, kind: input, shape index: {}]   ;;  %s7593_s3 = inlined_call_operand.hbm [shape: bf16[1024,512], index: 3, kind: input, shape index: {}]   ;;  %s7594_s4 = inlined_call_operand.hbm [shape: f32[1,512], index: 4, kind: input, shape index: {}]   ;;  %s7595_s5 = inlined_call_operand.hbm [shape: bf16[512,256], index: 5, kind: input, shape index: {}]   ;;  %s7596_s6 = inlined_call_operand.hbm [shape: f32[1,256], index: 6, kind: input, shape index: {}]   ;;  %s7597_s7 = inlined_call_operand.hbm [shape: bf16[256,128], index: 7, kind: input, shape index: {}]   ;;  %s7598_s8 = inlined_call_operand.hbm [shape: f32[1,128], index: 8, kind: input, shape index: {}]   ;;  %s7599_s9 = inlined_call_operand.vmem [shape: f32[16,128], index: 9, kind: output, shape index: {}]  }
   0x1   :  { %15 = vsyncpa [#allocation5], 0 }
   0x2   :  { %16 = vsyncpa [#allocation8], 0 }
   0x3   :  { %17 = vsyncpa [#allocation11], 0 }
   0x4   :  { %18 = vsyncpa [#allocation14], 0  ;;  %s7293_s30 = smov [#allocation4]   ;;  %s7294_s11 = smov [#allocation7]  }
   0x5   :  { %s39_s10 = sshll.u32 %s7293_s30, 4  ;;  %s61_s12 = sshll.u32 %s7294_s11, 4  ;;  %s40_s10 = int_to_ptr.vmem [resolvable:$true] %s39_s10  ;;  %s62_s12 = int_to_ptr.vmem [resolvable:$true] %s61_s12 }
   0x6   :  { %s7131_s13 = scalar_lea.vmem %s40_s10, 128  ;;  %p7136_p1 = scmp.lt.s32.totalorder %s40_s10, %s40_s10 }
   0x7   :  { %p7132_p0 = scmp.ne.s32.totalorder %s40_s10, %s7131_s13  ;;  %p7137_p2 = scmp.lt.s32.totalorder %s7131_s13, %s7131_s13 }
   0x9   :  { %p7138_p3 = por %p7137_p2, %p7136_p1 }
   0xb   :  { %p7139_p4 = pnand %p7138_p3, %p7132_p0 }
   0xd   :  { %7142 = shalt.err (!%p7139_p4)
}
   0xe   :  { %42 = dma.hbm_to_vmem [thread:$0]  %s7592_s2, 128, %s40_s10, [#allocation5]  }
   0xf   :  { %s7151_s16 = scalar_lea.vmem %s62_s12, 64  ;;  %p7156_p6 = scmp.lt.s32.totalorder %s62_s12, %s62_s12 }
  0x10   :  { %p7152_p5 = scmp.ne.s32.totalorder %s62_s12, %s7151_s16  ;;  %p7157_p7 = scmp.lt.s32.totalorder %s7151_s16, %s7151_s16 }
  0x12   :  { %p7158_p8 = por %p7157_p7, %p7156_p6 }
  0x14   :  { %p7159_p9 = pnand %p7158_p8, %p7152_p5 }
  0x16   :  { %7162 = shalt.err (!%p7159_p9)
}
  0x17   :  { %64 = dma.hbm_to_vmem [thread:$0]  %s7594_s4, 64, %s62_s12, [#allocation8]  }
  0x18   :  { %s7295_s19 = smov [#allocation10]   ;;  %s7296_s21 = smov [#allocation2]  }
  0x19   :  { %s83_s20 = sshll.u32 %s7295_s19, 4  ;;  %s26_s22 = sshll.u32 %s7296_s21, 4  ;;  %s84_s20 = int_to_ptr.vmem [resolvable:$true] %s83_s20  ;;  %s27_s22 = int_to_ptr.vmem [resolvable:$true] %s26_s22 }
  0x1a   :  { %s7171_s23 = scalar_lea.vmem %s84_s20, 32  ;;  %p7176_p11 = scmp.lt.s32.totalorder %s84_s20, %s84_s20 }
  0x1b   :  { %p7172_p10 = scmp.ne.s32.totalorder %s84_s20, %s7171_s23  ;;  %p7177_p12 = scmp.lt.s32.totalorder %s7171_s23, %s7171_s23 }
  0x1d   :  { %p7178_p13 = por %p7177_p12, %p7176_p11 }
  0x1f   :  { %p7179_p0 = pnand %p7178_p13, %p7172_p10 }
  0x21   :  { %7182 = shalt.err (!%p7179_p0)
}
  0x22   :  { %86 = dma.hbm_to_vmem [thread:$0]  %s7596_s6, 32, %s84_s20, [#allocation11]  }
  0x23   :  { %s7191_s25 = scalar_lea.vmem %s27_s22, 50176  ;;  %p7196_p2 = scmp.lt.s32.totalorder %s27_s22, %s27_s22 }
  0x24   :  { %p7192_p1 = scmp.ne.s32.totalorder %s27_s22, %s7191_s25  ;;  %p7197_p3 = scmp.lt.s32.totalorder %s7191_s25, %s7191_s25 }
  0x26   :  { %p7198_p4 = por %p7197_p3, %p7196_p2 }
  0x28   :  { %p7199_p5 = pnand %p7198_p4, %p7192_p1 }
  0x2a   :  { %7202 = shalt.err (!%p7199_p5)
}
  0x2b   :  { %s7297_s4 = smov 512   ;;  %s7298_s26 = smov 32  }
  0x2c   :  { %32 = dma.hbm_to_vmem [thread:$0]  %s7591_s1, 50176, %s27_s22, [#allocation3], %s7297_s4, %s7297_s4, %s7298_s26  }
  0x2d   :  { %s7299_s29 = smov [#allocation6]  }
  0x2e   :  { %s48_s30 = sshll.u32 %s7299_s29, 4  ;;  %s49_s30 = int_to_ptr.vmem [resolvable:$true] %s48_s30 }
  0x2f   :  { %s7211_s10 = scalar_lea.vmem %s49_s30, 32768  ;;  %p7216_p7 = scmp.lt.s32.totalorder %s49_s30, %s49_s30 }
  0x30   :  { %p7212_p6 = scmp.ne.s32.totalorder %s49_s30, %s7211_s10  ;;  %p7217_p8 = scmp.lt.s32.totalorder %s7211_s10, %s7211_s10 }
  0x32   :  { %p7218_p9 = por %p7217_p8, %p7216_p7 }
  0x34   :  { %p7219_p10 = pnand %p7218_p9, %p7212_p6 }
  0x36   :  { %7222 = shalt.err (!%p7219_p10)
}
  0x37   :  { %s7300_s6 = smov 256   ;;  %s7301_s11 = smov 16  }
  0x38   :  { %54 = dma.hbm_to_vmem [thread:$0]  %s7593_s3, 32768, %s49_s30, [#allocation5], %s7300_s6, %s7300_s6, %s7301_s11  }
  0x39   :  { %s7302_s14 = smov [#allocation9]  }
  0x3a   :  { %s70_s15 = sshll.u32 %s7302_s14, 4  ;;  %s71_s15 = int_to_ptr.vmem [resolvable:$true] %s70_s15 }
  0x3b   :  { %s7231_s1 = scalar_lea.vmem %s71_s15, 8192  ;;  %p7236_p12 = scmp.lt.s32.totalorder %s71_s15, %s71_s15 }
  0x3c   :  { %p7232_p11 = scmp.ne.s32.totalorder %s71_s15, %s7231_s1  ;;  %p7237_p13 = scmp.lt.s32.totalorder %s7231_s1, %s7231_s1 }
  0x3e   :  { %p7238_p0 = por %p7237_p13, %p7236_p12 }
  0x40   :  { %p7239_p1 = pnand %p7238_p0, %p7232_p11 }
  0x42   :  { %7242 = shalt.err (!%p7239_p1)
}
  0x43   :  { %s7303_s16 = smov 128   ;;  %s7304_s17 = smov 8  }
  0x44   :  { %76 = dma.hbm_to_vmem [thread:$0]  %s7595_s5, 8192, %s71_s15, [#allocation8], %s7303_s16, %s7303_s16, %s7304_s17  }
  0x45   :  { %s7305_s20 = smov [#allocation12]  }
  0x46   :  { %s92_s21 = sshll.u32 %s7305_s20, 4  ;;  %s93_s21 = int_to_ptr.vmem [resolvable:$true] %s92_s21 }
  0x47   :  { %s7251_s3 = scalar_lea.vmem %s93_s21, 2048  ;;  %p7256_p3 = scmp.lt.s32.totalorder %s93_s21, %s93_s21 }
  0x48   :  { %p7252_p2 = scmp.ne.s32.totalorder %s93_s21, %s7251_s3  ;;  %p7257_p4 = scmp.lt.s32.totalorder %s7251_s3, %s7251_s3 }
  0x4a   :  { %p7258_p5 = por %p7257_p4, %p7256_p3 }
  0x4c   :  { %p7259_p6 = pnand %p7258_p5, %p7252_p2 }
  0x4e   :  { %7262 = shalt.err (!%p7259_p6)
}
  0x4f   :  { %s7306_s22 = smov 64   ;;  %s7307_s23 = smov 4  }
  0x50   :  { %98 = dma.hbm_to_vmem [thread:$0]  %s7597_s7, 2048, %s93_s21, [#allocation11], %s7306_s22, %s7306_s22, %s7307_s23  }
  0x51   :  { %s7308_s25 = smov [#allocation13]  }
  0x52   :  { %s105_s4 = sshll.u32 %s7308_s25, 4  ;;  %s106_s4 = int_to_ptr.vmem [resolvable:$true] %s105_s4 }
  0x53   :  { %s7271_s5 = scalar_lea.vmem %s106_s4, 16  ;;  %s7275_s26 = scalar_lea.vmem %s106_s4, 32 }
  0x54   :  { %p7272_p7 = scmp.ne.s32.totalorder %s106_s4, %s7271_s5  ;;  %p7276_p8 = scmp.lt.s32.totalorder %s106_s4, %s106_s4 }
  0x55   :  { %p7277_p9 = scmp.lt.s32.totalorder %s7275_s26, %s7271_s5 }
  0x57   :  { %p7278_p10 = por %p7277_p9, %p7276_p8 }
  0x59   :  { %p7279_p11 = pnand %p7278_p10, %p7272_p7 }
  0x5b   :  { %7282 = shalt.err (!%p7279_p11)
}
  0x5c   :  { %108 = dma.hbm_to_vmem [thread:$0]  %s7598_s8, 16, %s106_s4, [#allocation14]  }
  0x5d   :  { %7283 = dma.done.wait [#allocation3], 50176  }
  0x5e   :  { %7284 = vsyncadd [#allocation3], 4294917120 }
  0x5f   :  { %7285 = dma.done.wait [#allocation5], 32896  }
  0x60   :  { %7286 = vsyncadd [#allocation5], 4294934400 }
  0x61   :  { %7287 = dma.done.wait [#allocation8], 8256  }
  0x62   :  { %7288 = vsyncadd [#allocation8], 4294959040 }
  0x63   :  { %7289 = dma.done.wait [#allocation11], 2080  }
  0x64   :  { %7290 = vsyncadd [#allocation11], 4294965216 }
  0x65   :  { %7291 = dma.done.wait [#allocation14], 16  }
  0x66   :  { %7292 = vsyncadd [#allocation14], 4294967280  ;;  %v211_v0 = vld [vmem:[#allocation2 + $0x1c0] sm:$0xff]  ;;  %v135_v54 = vld [vmem:[%s7590_s0 + $0x8] sm:$0xff]  ;;  %vm2549_vm0 = vcmask 130048  }
  0x67   :  { %v215_v1 = vld [vmem:[#allocation2 + $0x1e0] sm:$0xff]  ;;  %v137_v59 = vld [vmem:[%s7590_s0 + $0x18] sm:$0xff]  ;;  %v144_v60 = vld [vmem:[%s7590_s0 + $0x50] sm:$0xff] }
  0x68   :  { %v339_v2 = vld [vmem:[#allocation2 + $0x5c0] sm:$0xff]  ;;  %v5911_v3 = vcombine.high %v211_v0, %v215_v1  ;;  %v5910_v5 = vcombine.low %v211_v0, %v215_v1  ;;  %v7398_v63 = vpack.c.bf16 %v144_v60, %v137_v59 }
  0x69   :  { %v343_v4 = vld [vmem:[#allocation2 + $0x5e0] sm:$0xff] }
  0x6a   :  { %v203_v6 = vld [vmem:[#allocation2 + $0x180] sm:$0xff]  ;;  %v6039_v8 = vcombine.high %v339_v2, %v343_v4  ;;  %v6038_v9 = vcombine.low %v339_v2, %v343_v4  ;;  %2553 = vmatprep.subr.bf16.mxu0 %v5911_v3  ;;  %2628 = vmatprep.mubr.bf16.mxu1 %v7398_v63 }
  0x6b   :  { %v207_v7 = vld [vmem:[#allocation2 + $0x1a0] sm:$0xff]  ;;  %2554 = vmatpush1.bf16.msra.mxu0 %v5910_v5 }
  0x6c   :  { %v5903_v10 = vcombine.high %v203_v6, %v207_v7  ;;  %v331_v11 = vld [vmem:[#allocation2 + $0x580] sm:$0xff]  ;;  %2596 = vmatprep.subr.bf16.mxu1 %v6039_v8  ;;  %v5902_v18 = vcombine.low %v203_v6, %v207_v7 }
  0x6d   :  { %v335_v12 = vld [vmem:[#allocation2 + $0x5a0] sm:$0xff]  ;;  %2597 = vmatpush1.bf16.msra.mxu1 %v6038_v9 }
  0x6e   :  { %v195_v13 = vld [vmem:[#allocation2 + $0x140] sm:$0xff]  ;;  %v6031_v14 = vcombine.high %v331_v11, %v335_v12  ;;  %2555 = vmatprep.subr.bf16.mxu0 %v5903_v10  ;;  %v6030_v19 = vcombine.low %v331_v11, %v335_v12 }
  0x6f   :  { %v199_v15 = vld [vmem:[#allocation2 + $0x160] sm:$0xff]  ;;  %2556 = vmatpush1.bf16.msra.mxu0 %v5902_v18 }
  0x70   :  { %v323_v16 = vld [vmem:[#allocation2 + $0x540] sm:$0xff]  ;;  %v5895_v20 = vcombine.high %v195_v13, %v199_v15  ;;  %2598 = vmatprep.subr.bf16.mxu1 %v6031_v14  ;;  %v5894_v26 = vcombine.low %v195_v13, %v199_v15 }
  0x71   :  { %v327_v17 = vld [vmem:[#allocation2 + $0x560] sm:$0xff]  ;;  %2599 = vmatpush1.bf16.msra.mxu1 %v6030_v19 }
  0x72   :  { %v6023_v21 = vcombine.high %v323_v16, %v327_v17  ;;  %v187_v22 = vld [vmem:[#allocation2 + $0x100] sm:$0xff]  ;;  %2557 = vmatprep.subr.bf16.mxu0 %v5895_v20  ;;  %v6022_v27 = vcombine.low %v323_v16, %v327_v17 }
  0x73   :  { %v191_v23 = vld [vmem:[#allocation2 + $0x120] sm:$0xff]  ;;  %2558 = vmatpush1.bf16.msra.mxu0 %v5894_v26 }
  0x74   :  { %v315_v24 = vld [vmem:[#allocation2 + $0x500] sm:$0xff]  ;;  %v5887_v28 = vcombine.high %v187_v22, %v191_v23  ;;  %2600 = vmatprep.subr.bf16.mxu1 %v6023_v21  ;;  %v5886_v34 = vcombine.low %v187_v22, %v191_v23 }
  0x75   :  { %v319_v25 = vld [vmem:[#allocation2 + $0x520] sm:$0xff]  ;;  %2601 = vmatpush1.bf16.msra.mxu1 %v6022_v27 }
  0x76   :  { %v6015_v29 = vcombine.high %v315_v24, %v319_v25  ;;  %v179_v30 = vld [vmem:[#allocation2 + $0xc0] sm:$0xff]  ;;  %2559 = vmatprep.subr.bf16.mxu0 %v5887_v28  ;;  %v6014_v35 = vcombine.low %v315_v24, %v319_v25 }
  0x77   :  { %v183_v31 = vld [vmem:[#allocation2 + $0xe0] sm:$0xff]  ;;  %2560 = vmatpush1.bf16.msra.mxu0 %v5886_v34 }
  0x78   :  { %v307_v32 = vld [vmem:[#allocation2 + $0x4c0] sm:$0xff]  ;;  %v5879_v36 = vcombine.high %v179_v30, %v183_v31  ;;  %2602 = vmatprep.subr.bf16.mxu1 %v6015_v29  ;;  %v5878_v42 = vcombine.low %v179_v30, %v183_v31 }
  0x79   :  { %v311_v33 = vld [vmem:[#allocation2 + $0x4e0] sm:$0xff]  ;;  %2603 = vmatpush1.bf16.msra.mxu1 %v6014_v35 }
  0x7a   :  { %v6007_v37 = vcombine.high %v307_v32, %v311_v33  ;;  %v171_v38 = vld [vmem:[#allocation2 + $0x80] sm:$0xff]  ;;  %2561 = vmatprep.subr.bf16.mxu0 %v5879_v36  ;;  %v6006_v43 = vcombine.low %v307_v32, %v311_v33 }
  0x7b   :  { %v175_v39 = vld [vmem:[#allocation2 + $0xa0] sm:$0xff]  ;;  %2562 = vmatpush1.bf16.msra.mxu0 %v5878_v42 }
  0x7c   :  { %v299_v40 = vld [vmem:[#allocation2 + $0x480] sm:$0xff]  ;;  %v5871_v44 = vcombine.high %v171_v38, %v175_v39  ;;  %2604 = vmatprep.subr.bf16.mxu1 %v6007_v37  ;;  %v5870_v50 = vcombine.low %v171_v38, %v175_v39 }
  0x7d   :  { %v303_v41 = vld [vmem:[#allocation2 + $0x4a0] sm:$0xff]  ;;  %2605 = vmatpush1.bf16.msra.mxu1 %v6006_v43 }
  0x7e   :  { %v5999_v45 = vcombine.high %v299_v40, %v303_v41  ;;  %v163_v46 = vld [vmem:[#allocation2 + $0x40] sm:$0xff]  ;;  %2563 = vmatprep.subr.bf16.mxu0 %v5871_v44  ;;  %v5998_v51 = vcombine.low %v299_v40, %v303_v41 }
  0x7f   :  { %v167_v47 = vld [vmem:[#allocation2 + $0x60] sm:$0xff]  ;;  %2564 = vmatpush1.bf16.msra.mxu0 %v5870_v50 }
  0x80   :  { %v291_v48 = vld [vmem:[#allocation2 + $0x440] sm:$0xff]  ;;  %v5863_v52 = vcombine.high %v163_v46, %v167_v47  ;;  %2606 = vmatprep.subr.bf16.mxu1 %v5999_v45  ;;  %v5862_v0 = vcombine.low %v163_v46, %v167_v47 }
  0x81   :  { %v295_v49 = vld [vmem:[#allocation2 + $0x460] sm:$0xff]  ;;  %2607 = vmatpush1.bf16.msra.mxu1 %v5998_v51 }
  0x82   :  { %v155_v53 = vld [vmem:[#allocation2] sm:$0xff]  ;;  %v5991_v56 = vcombine.high %v291_v48, %v295_v49  ;;  %2565 = vmatprep.subr.bf16.mxu0 %v5863_v52  ;;  %v5990_v1 = vcombine.low %v291_v48, %v295_v49 }
  0x83   :  { %v142_v55 = vld [vmem:[%s7590_s0 + $0x40] sm:$0xff]  ;;  %2566 = vmatpush1.bf16.msra.mxu0 %v5862_v0 }
  0x84   :  { %v159_v57 = vld [vmem:[#allocation2 + $0x20] sm:$0xff]  ;;  %v7390_v58 = vpack.c.bf16 %v142_v55, %v135_v54  ;;  %2608 = vmatprep.subr.bf16.mxu1 %v5991_v56 }
  0x85   :  { %v283_v61 = vld [vmem:[#allocation2 + $0x400] sm:$0xff]  ;;  %v5855_v2 = vcombine.high %v155_v53, %v159_v57  ;;  %v5854_v8 = vcombine.low %v155_v53, %v159_v57  ;;  %2609 = vmatpush1.bf16.msra.mxu1 %v5990_v1 }
  0x86   :  { %v287_v62 = vld [vmem:[#allocation2 + $0x420] sm:$0xff]  ;;  %2585 = vmatprep.mubr.bf16.mxu0 %v7390_v58 }
  0x87   :  { %v5983_v3 = vcombine.high %v283_v61, %v287_v62  ;;  %v275_v4 = vld [vmem:[#allocation2 + $0x3c0] sm:$0xff]  ;;  %2567 = vmatprep.subr.bf16.mxu0 %v5855_v2  ;;  %v5982_v9 = vcombine.low %v283_v61, %v287_v62 }
  0x88   :  { %v279_v5 = vld [vmem:[#allocation2 + $0x3e0] sm:$0xff]  ;;  %2568 = vmatpush1.bf16.msra.mxu0 %v5854_v8 }
  0x89   :  { %v403_v6 = vld [vmem:[#allocation2 + $0x7c0] sm:$0xff]  ;;  %v5975_v10 = vcombine.high %v275_v4, %v279_v5  ;;  %2610 = vmatprep.subr.bf16.mxu1 %v5983_v3  ;;  %v5974_v16 = vcombine.low %v275_v4, %v279_v5 }
  0x8a   :  { %v407_v7 = vld [vmem:[#allocation2 + $0x7e0] sm:$0xff]  ;;  %2611 = vmatpush1.bf16.msra.mxu1 %v5982_v9 }
  0x8b   :  { %v6103_v11 = vcombine.high %v403_v6, %v407_v7  ;;  %v267_v12 = vld [vmem:[#allocation2 + $0x380] sm:$0xff]  ;;  %2569 = vmatprep.subr.bf16.mxu0 %v5975_v10  ;;  %v6102_v17 = vcombine.low %v403_v6, %v407_v7 }
  0x8c   :  { %v271_v13 = vld [vmem:[#allocation2 + $0x3a0] sm:$0xff]  ;;  %2570 = vmatpush2.bf16.msra.mxu0 %v5974_v16 }
  0x8d   :  { %v395_v14 = vld [vmem:[#allocation2 + $0x780] sm:$0xff]  ;;  %v5967_v18 = vcombine.high %v267_v12, %v271_v13  ;;  %2612 = vmatprep.subr.bf16.mxu1 %v6103_v11  ;;  %v5966_v24 = vcombine.low %v267_v12, %v271_v13  ;;  %v141_v12 = vld [vmem:[%s7590_s0 + $0x38] sm:$0xff] }
  0x8e   :  { %v399_v15 = vld [vmem:[#allocation2 + $0x7a0] sm:$0xff]  ;;  %2613 = vmatpush2.bf16.msra.mxu1 %v6102_v17 }
  0x8f   :  { %v6095_v19 = vcombine.high %v395_v14, %v399_v15  ;;  %v259_v20 = vld [vmem:[#allocation2 + $0x340] sm:$0xff]  ;;  %2571 = vmatprep.subr.bf16.mxu0 %v5967_v18  ;;  %v6094_v25 = vcombine.low %v395_v14, %v399_v15  ;;  %v136_v14 = vld [vmem:[%s7590_s0 + $0x10] sm:$0xff]  ;;  %v143_v15 = vld [vmem:[%s7590_s0 + $0x48] sm:$0xff] }
  0x90   :  { %v263_v21 = vld [vmem:[#allocation2 + $0x360] sm:$0xff]  ;;  %2572 = vmatpush2.bf16.msra.mxu0 %v5966_v24 }
  0x91   :  { %v387_v22 = vld [vmem:[#allocation2 + $0x740] sm:$0xff]  ;;  %v5959_v26 = vcombine.high %v259_v20, %v263_v21  ;;  %2614 = vmatprep.subr.bf16.mxu1 %v6095_v19  ;;  %v5958_v32 = vcombine.low %v259_v20, %v263_v21  ;;  %v212_v21 = vld [vmem:[#allocation2 + $0x1c8] sm:$0xff] }
  0x92   :  { %v391_v23 = vld [vmem:[#allocation2 + $0x760] sm:$0xff]  ;;  %2615 = vmatpush2.bf16.msra.mxu1 %v6094_v25  ;;  %v139_v25 = vld [vmem:[%s7590_s0 + $0x28] sm:$0xff] }
  0x93   :  { %v6087_v27 = vcombine.high %v387_v22, %v391_v23  ;;  %v251_v28 = vld [vmem:[#allocation2 + $0x300] sm:$0xff]  ;;  %2573 = vmatprep.subr.bf16.mxu0 %v5959_v26  ;;  %v6086_v33 = vcombine.low %v387_v22, %v391_v23  ;;  %v216_v22 = vld [vmem:[#allocation2 + $0x1e8] sm:$0xff]  ;;  %v7416_v23 = vpack.c.bf16 %v143_v15, %v136_v14 }
  0x94   :  { %v255_v29 = vld [vmem:[#allocation2 + $0x320] sm:$0xff]  ;;  %2574 = vmatpush2.bf16.msra.mxu0 %v5958_v32 }
  0x95   :  { %v379_v30 = vld [vmem:[#allocation2 + $0x700] sm:$0xff]  ;;  %v5951_v34 = vcombine.high %v251_v28, %v255_v29  ;;  %2616 = vmatprep.subr.bf16.mxu1 %v6087_v27  ;;  %v5950_v40 = vcombine.low %v251_v28, %v255_v29  ;;  %v5913_v29 = vcombine.high %v212_v21, %v216_v22 }
  0x96   :  { %v383_v31 = vld [vmem:[#allocation2 + $0x720] sm:$0xff]  ;;  %2617 = vmatpush2.bf16.msra.mxu1 %v6086_v33 }
  0x97   :  { %v6079_v35 = vcombine.high %v379_v30, %v383_v31  ;;  %v243_v36 = vld [vmem:[#allocation2 + $0x2c0] sm:$0xff]  ;;  %2575 = vmatprep.subr.bf16.mxu0 %v5951_v34  ;;  %v6078_v41 = vcombine.low %v379_v30, %v383_v31  ;;  %v140_v34 = vld [vmem:[%s7590_s0 + $0x30] sm:$0xff] }
  0x98   :  { %v247_v37 = vld [vmem:[#allocation2 + $0x2e0] sm:$0xff]  ;;  %2576 = vmatpush2.bf16.msra.mxu0 %v5950_v40 }
  0x99   :  { %v371_v38 = vld [vmem:[#allocation2 + $0x6c0] sm:$0xff]  ;;  %v5943_v42 = vcombine.high %v243_v36, %v247_v37  ;;  %2618 = vmatprep.subr.bf16.mxu1 %v6079_v35  ;;  %v5942_v48 = vcombine.low %v243_v36, %v247_v37  ;;  %v147_v36 = vld [vmem:[%s7590_s0 + $0x68] sm:$0xff] }
  0x9a   :  { %v375_v39 = vld [vmem:[#allocation2 + $0x6e0] sm:$0xff]  ;;  %2619 = vmatpush2.bf16.msra.mxu1 %v6078_v41  ;;  %v204_v37 = vld [vmem:[#allocation2 + $0x188] sm:$0xff] }
  0x9b   :  { %v6071_v43 = vcombine.high %v371_v38, %v375_v39  ;;  %v235_v44 = vld [vmem:[#allocation2 + $0x280] sm:$0xff]  ;;  %2577 = vmatprep.subr.bf16.mxu0 %v5943_v42  ;;  %v6070_v49 = vcombine.low %v371_v38, %v375_v39  ;;  %v208_v38 = vld [vmem:[#allocation2 + $0x1a8] sm:$0xff]  ;;  %v7309_v39 = vmov 0  }
  0x9c   :  { %v239_v45 = vld [vmem:[#allocation2 + $0x2a0] sm:$0xff]  ;;  %2578 = vmatpush2.bf16.msra.mxu0 %v5942_v48  ;;  %v5905_v48 = vcombine.high %v204_v37, %v208_v38 }
  0x9d   :  { %v363_v46 = vld [vmem:[#allocation2 + $0x680] sm:$0xff]  ;;  %v5935_v50 = vcombine.high %v235_v44, %v239_v45  ;;  %2620 = vmatprep.subr.bf16.mxu1 %v6071_v43  ;;  %v5934_v56 = vcombine.low %v235_v44, %v239_v45  ;;  %v7436_v43 = vpack.c.bf16 %v147_v36, %v140_v34  ;;  %v5912_v44 = vcombine.low %v212_v21, %v216_v22  ;;  %v168_v21 = vld [vmem:[#allocation2 + $0x68] sm:$0xff] }
  0x9e   :  { %v367_v47 = vld [vmem:[#allocation2 + $0x6a0] sm:$0xff]  ;;  %2621 = vmatpush2.bf16.msra.mxu1 %v6070_v49 }
  0x9f   :  { %v6063_v51 = vcombine.high %v363_v46, %v367_v47  ;;  %v227_v52 = vld [vmem:[#allocation2 + $0x240] sm:$0xff]  ;;  %2579 = vmatprep.subr.bf16.mxu0 %v5935_v50  ;;  %v6062_v57 = vcombine.low %v363_v46, %v367_v47  ;;  %v196_v46 = vld [vmem:[#allocation2 + $0x148] sm:$0xff] }
  0xa0   :  { %v231_v53 = vld [vmem:[#allocation2 + $0x260] sm:$0xff]  ;;  %2580 = vmatpush2.bf16.msra.mxu0 %v5934_v56  ;;  %v200_v47 = vld [vmem:[#allocation2 + $0x168] sm:$0xff] }
  0xa1   :  { %v355_v54 = vld [vmem:[#allocation2 + $0x640] sm:$0xff]  ;;  %v5927_v59 = vcombine.high %v227_v52, %v231_v53  ;;  %2622 = vmatprep.subr.bf16.mxu1 %v6063_v51  ;;  %v5926_v2 = vcombine.low %v227_v52, %v231_v53  ;;  %v5904_v52 = vcombine.low %v204_v37, %v208_v38  ;;  %v276_v38 = vld [vmem:[#allocation2 + $0x3c8] sm:$0xff] }
  0xa2   :  { %v359_v55 = vld [vmem:[#allocation2 + $0x660] sm:$0xff]  ;;  %2623 = vmatpush2.bf16.msra.mxu1 %v6062_v57 }
  0xa3   :  { %v6055_v60 = vcombine.high %v355_v54, %v359_v55  ;;  %v219_v61 = vld [vmem:[#allocation2 + $0x200] sm:$0xff]  ;;  %2581 = vmatprep.subr.bf16.mxu0 %v5927_v59  ;;  %v6054_v3 = vcombine.low %v355_v54, %v359_v55  ;;  %v188_v54 = vld [vmem:[#allocation2 + $0x108] sm:$0xff]  ;;  %v5897_v59 = vcombine.high %v196_v46, %v200_v47 }
  0xa4   :  { %v223_v62 = vld [vmem:[#allocation2 + $0x220] sm:$0xff]  ;;  %2582 = vmatpush2.bf16.msra.mxu0 %v5926_v2  ;;  %v192_v55 = vld [vmem:[#allocation2 + $0x128] sm:$0xff] }
  0xa5   :  { %v347_v0 = vld [vmem:[#allocation2 + $0x600] sm:$0xff]  ;;  %v5919_v4 = vcombine.high %v219_v61, %v223_v62  ;;  %2624 = vmatprep.subr.bf16.mxu1 %v6055_v60  ;;  %v5918_v10 = vcombine.low %v219_v61, %v223_v62  ;;  %v5889_v2 = vcombine.high %v188_v54, %v192_v55 }
  0xa6   :  { %v351_v1 = vld [vmem:[#allocation2 + $0x620] sm:$0xff]  ;;  %2625 = vmatpush2.bf16.msra.mxu1 %v6054_v3  ;;  %v180_v3 = vld [vmem:[#allocation2 + $0xc8] sm:$0xff] }
  0xa7   :  { %v6047_v5 = vcombine.high %v347_v0, %v351_v1  ;;  %v467_v6 = vld [vmem:[#allocation2 + $0x9c0] sm:$0xff]  ;;  %2583 = vmatprep.subr.bf16.mxu0 %v5919_v4  ;;  %v6046_v13 = vcombine.low %v347_v0, %v351_v1  ;;  %v5896_v0 = vcombine.low %v196_v46, %v200_v47  ;;  %v184_v4 = vld [vmem:[#allocation2 + $0xe8] sm:$0xff] }
  0xa8   :  { %v471_v7 = vld [vmem:[#allocation2 + $0x9e0] sm:$0xff]  ;;  %2584 = vmatpush2.bf16.msra.mxu0 %v5918_v10  ;;  %v5881_v10 = vcombine.high %v180_v3, %v184_v4  ;;  %v5880_v14 = vcombine.low %v180_v3, %v184_v4  ;;  %v256_v3 = vld [vmem:[#allocation2 + $0x328] sm:$0xff] }
  0xa9   :  { %v539_v8 = vld [vmem:[#allocation2 + $0xc00] sm:$0xff]  ;;  %v6167_v16 = vcombine.high %v467_v6, %v471_v7  ;;  %2626 = vmatprep.subr.bf16.mxu1 %v6047_v5  ;;  %v6166_v24 = vcombine.low %v467_v6, %v471_v7  ;;  %v5888_v6 = vcombine.low %v188_v54, %v192_v55 }
  0xaa   :  { %v543_v9 = vld [vmem:[#allocation2 + $0xc20] sm:$0xff]  ;;  %2627 = vmatpush2.bf16.msra.mxu1 %v6046_v13 }
  0xab   :  { %v134_v11 = vld [vmem:[%s7590_s0] sm:$0xff]  ;;  %v6239_v17 = vcombine.high %v539_v8, %v543_v9  ;;  %2639 = vmatprep.subr.bf16.mxu0 %v6167_v16  ;;  %v6238_v27 = vcombine.low %v539_v8, %v543_v9 }
  0xac   :  { %v459_v18 = vld [vmem:[#allocation2 + $0x980] sm:$0xff]  ;;  %v7414_v20 = vpack.c.bf16 %v141_v12, %v134_v11  ;;  %v172_v11 = vld [vmem:[#allocation2 + $0x88] sm:$0xff] }
  0xad   :  { %v463_v19 = vld [vmem:[#allocation2 + $0x9a0] sm:$0xff]  ;;  %2696 = vmatprep.subr.bf16.mxu1 %v6239_v17  ;;  %2629 = vmatmul.mubr.bf16.vlgmr.msra.gmra.mxu1 %v7416_v23  ;;  %v176_v12 = vld [vmem:[#allocation2 + $0xa8] sm:$0xff] }
  0xae   :  { %v146_v26 = vld [vmem:[%s7590_s0 + $0x60] sm:$0xff]  ;;  %v6159_v28 = vcombine.high %v459_v18, %v463_v19  ;;  %2586 = vmatmul.mubr.bf16.vlgmr.msra.gmra.mxu0 %v7414_v20  ;;  %v6158_v33 = vcombine.low %v459_v18, %v463_v19  ;;  %2697 = vmatpush1.bf16.msra.mxu1 %v6238_v27  ;;  %v5873_v18 = vcombine.high %v172_v11, %v176_v12  ;;  %v164_v19 = vld [vmem:[#allocation2 + $0x48] sm:$0xff] }
  0xaf   :  { %v451_v30 = vld [vmem:[#allocation2 + $0x940] sm:$0xff]  ;;  %v7425_v32 = vpack.c.bf16 %v146_v26, %v139_v25  ;;  %2640 = vmatpush1.bf16.msra.mxu0 %v6166_v24  ;;  %2714 = vmatprep.mubr.bf16.mxu1 %v7309_v39  ;;  %v5872_v24 = vcombine.low %v172_v11, %v176_v12  ;;  %v248_v11 = vld [vmem:[#allocation2 + $0x2e8] sm:$0xff] }
  0xb0   :  { %v455_v31 = vld [vmem:[#allocation2 + $0x960] sm:$0xff]  ;;  %2641 = vmatprep.subr.bf16.mxu0 %v6159_v28  ;;  %2725 = vmatprep.subr.bf16.mxu1 %v5913_v29  ;;  %v5865_v28 = vcombine.high %v164_v19, %v168_v21  ;;  %v156_v29 = vld [vmem:[#allocation2 + $0x8] sm:$0xff] }
  0xb1   :  { %v6151_v35 = vcombine.high %v451_v30, %v455_v31  ;;  %v443_v40 = vld [vmem:[#allocation2 + $0x900] sm:$0xff]  ;;  %2671 = vmatprep.mubr.bf16.mxu0 %v7425_v32  ;;  %v6150_v42 = vcombine.low %v451_v30, %v455_v31  ;;  %v160_v30 = vld [vmem:[#allocation2 + $0x28] sm:$0xff] }
  0xb2   :  { %v447_v41 = vld [vmem:[#allocation2 + $0x920] sm:$0xff]  ;;  %v5857_v37 = vcombine.high %v156_v29, %v160_v30 }
  0xb3   :  { %2642 = vmatpush1.bf16.msra.mxu0 %v6158_v33  ;;  %v6143_v45 = vcombine.high %v443_v40, %v447_v41  ;;  %v435_v49 = vld [vmem:[#allocation2 + $0x8c0] sm:$0xff]  ;;  %v6142_v51 = vcombine.low %v443_v40, %v447_v41  ;;  %v5864_v33 = vcombine.low %v164_v19, %v168_v21  ;;  %v280_v40 = vld [vmem:[#allocation2 + $0x3e8] sm:$0xff] }
  0xb4   :  { %2643 = vmatprep.subr.bf16.mxu0 %v6151_v35  ;;  %v439_v50 = vld [vmem:[#allocation2 + $0x8e0] sm:$0xff]  ;;  %v5977_v47 = vcombine.high %v276_v38, %v280_v40  ;;  %v240_v19 = vld [vmem:[#allocation2 + $0x2a8] sm:$0xff] }
  0xb5   :  { %6246 = vmatmul.mubr.msk.bf16.vlgmr.msra.gmra.mxu1 %vm2549_vm0, %v7436_v43  ;;  %v6135_v53 = vcombine.high %v435_v49, %v439_v50  ;;  %v427_v56 = vld [vmem:[#allocation2 + $0x880] sm:$0xff]  ;;  %v6134_v60 = vcombine.low %v435_v49, %v439_v50  ;;  %v272_v49 = vld [vmem:[#allocation2 + $0x3a8] sm:$0xff] }
  0xb6   :  { %2726 = vmatpush1.bf16.msra.mxu1 %v5912_v44  ;;  %v431_v57 = vld [vmem:[#allocation2 + $0x8a0] sm:$0xff]  ;;  %2757 = vmatprep.mubr.bf16.mxu1 %v7390_v58 }
  0xb7   :  { %2644 = vmatpush1.bf16.msra.mxu0 %v6150_v42  ;;  %2727 = vmatprep.subr.bf16.mxu1 %v5905_v48  ;;  %v419_v61 = vld [vmem:[#allocation2 + $0x840] sm:$0xff]  ;;  %v6127_v1 = vcombine.high %v427_v56, %v431_v57  ;;  %v6126_v5 = vcombine.low %v427_v56, %v431_v57  ;;  %v5856_v42 = vcombine.low %v156_v29, %v160_v30  ;;  %v268_v48 = vld [vmem:[#allocation2 + $0x388] sm:$0xff] }
  0xb8   :  { %2645 = vmatprep.subr.bf16.mxu0 %v6143_v45  ;;  %v423_v62 = vld [vmem:[#allocation2 + $0x860] sm:$0xff]  ;;  %v5969_v55 = vcombine.high %v268_v48, %v272_v49  ;;  %v260_v56 = vld [vmem:[#allocation2 + $0x348] sm:$0xff] }
  0xb9   :  { %v6119_v7 = vcombine.high %v419_v61, %v423_v62  ;;  %v411_v8 = vld [vmem:[#allocation2 + $0x800] sm:$0xff]  ;;  %v6118_v13 = vcombine.low %v419_v61, %v423_v62  ;;  %v264_v57 = vld [vmem:[#allocation2 + $0x368] sm:$0xff] }
  0xba   :  { %2728 = vmatpush1.bf16.msra.mxu1 %v5904_v52  ;;  %v415_v9 = vld [vmem:[#allocation2 + $0x820] sm:$0xff] }
  0xbb   :  { %2646 = vmatpush1.bf16.msra.mxu0 %v6142_v51  ;;  %2729 = vmatprep.subr.bf16.mxu1 %v5897_v59  ;;  %v6111_v15 = vcombine.high %v411_v8, %v415_v9  ;;  %v531_v16 = vld [vmem:[#allocation2 + $0xbc0] sm:$0xff]  ;;  %v6110_v22 = vcombine.low %v411_v8, %v415_v9  ;;  %v5976_v51 = vcombine.low %v276_v38, %v280_v40 }
  0xbc   :  { %2647 = vmatprep.subr.bf16.mxu0 %v6135_v53  ;;  %v535_v17 = vld [vmem:[#allocation2 + $0xbe0] sm:$0xff] }
  0xbd   :  { %v6231_v25 = vcombine.high %v531_v16, %v535_v17  ;;  %v523_v26 = vld [vmem:[#allocation2 + $0xb80] sm:$0xff]  ;;  %v6230_v31 = vcombine.low %v531_v16, %v535_v17 }
  0xbe   :  { %2730 = vmatpush1.bf16.msra.mxu1 %v5896_v0  ;;  %v527_v27 = vld [vmem:[#allocation2 + $0xba0] sm:$0xff] }
  0xbf   :  { %2648 = vmatpush1.bf16.msra.mxu0 %v6134_v60  ;;  %2731 = vmatprep.subr.bf16.mxu1 %v5889_v2  ;;  %v6223_v34 = vcombine.high %v523_v26, %v527_v27  ;;  %v515_v35 = vld [vmem:[#allocation2 + $0xb40] sm:$0xff]  ;;  %v6222_v41 = vcombine.low %v523_v26, %v527_v27  ;;  %v5968_v60 = vcombine.low %v268_v48, %v272_v49  ;;  %v252_v2 = vld [vmem:[#allocation2 + $0x308] sm:$0xff] }
  0xc0   :  { %2649 = vmatprep.subr.bf16.mxu0 %v6127_v1  ;;  %v519_v36 = vld [vmem:[#allocation2 + $0xb60] sm:$0xff]  ;;  %v5961_v1 = vcombine.high %v260_v56, %v264_v57  ;;  %v5953_v9 = vcombine.high %v252_v2, %v256_v3  ;;  %v232_v26 = vld [vmem:[#allocation2 + $0x268] sm:$0xff] }
  0xc1   :  { %v6215_v44 = vcombine.high %v515_v35, %v519_v36  ;;  %v507_v45 = vld [vmem:[#allocation2 + $0xb00] sm:$0xff]  ;;  %v6214_v50 = vcombine.low %v515_v35, %v519_v36  ;;  %v340_v27 = vld [vmem:[#allocation2 + $0x5c8] sm:$0xff] }
  0xc2   :  { %2732 = vmatpush1.bf16.msra.mxu1 %v5888_v6  ;;  %v511_v46 = vld [vmem:[#allocation2 + $0xb20] sm:$0xff]  ;;  %v332_v36 = vld [vmem:[#allocation2 + $0x588] sm:$0xff] }
  0xc3   :  { %2650 = vmatpush1.bf16.msra.mxu0 %v6126_v5  ;;  %2733 = vmatprep.subr.bf16.mxu1 %v5881_v10  ;;  %v6207_v52 = vcombine.high %v507_v45, %v511_v46  ;;  %v499_v53 = vld [vmem:[#allocation2 + $0xac0] sm:$0xff]  ;;  %v6206_v59 = vcombine.low %v507_v45, %v511_v46  ;;  %v5960_v5 = vcombine.low %v260_v56, %v264_v57  ;;  %v244_v10 = vld [vmem:[#allocation2 + $0x2c8] sm:$0xff] }
  0xc4   :  { %2651 = vmatprep.subr.bf16.mxu0 %v6119_v7  ;;  %v503_v54 = vld [vmem:[#allocation2 + $0xae0] sm:$0xff]  ;;  %v5945_v17 = vcombine.high %v244_v10, %v248_v11  ;;  %v328_v48 = vld [vmem:[#allocation2 + $0x568] sm:$0xff] }
  0xc5   :  { %v6199_v61 = vcombine.high %v499_v53, %v503_v54  ;;  %v491_v62 = vld [vmem:[#allocation2 + $0xa80] sm:$0xff]  ;;  %v6198_v4 = vcombine.low %v499_v53, %v503_v54  ;;  %v320_v56 = vld [vmem:[#allocation2 + $0x528] sm:$0xff] }
  0xc6   :  { %2734 = vmatpush1.bf16.msra.mxu1 %v5880_v14  ;;  %v495_v0 = vld [vmem:[#allocation2 + $0xaa0] sm:$0xff] }
  0xc7   :  { %2652 = vmatpush1.bf16.msra.mxu0 %v6118_v13  ;;  %2735 = vmatprep.subr.bf16.mxu1 %v5873_v18  ;;  %v6191_v6 = vcombine.high %v491_v62, %v495_v0  ;;  %v483_v7 = vld [vmem:[#allocation2 + $0xa40] sm:$0xff]  ;;  %v6190_v12 = vcombine.low %v491_v62, %v495_v0  ;;  %v5952_v13 = vcombine.low %v252_v2, %v256_v3  ;;  %v236_v18 = vld [vmem:[#allocation2 + $0x288] sm:$0xff] }
  0xc8   :  { %2653 = vmatprep.subr.bf16.mxu0 %v6111_v15  ;;  %v487_v8 = vld [vmem:[#allocation2 + $0xa60] sm:$0xff]  ;;  %v5937_v29 = vcombine.high %v236_v18, %v240_v19  ;;  %v312_v2 = vld [vmem:[#allocation2 + $0x4e8] sm:$0xff] }
  0xc9   :  { %v6183_v14 = vcombine.high %v483_v7, %v487_v8  ;;  %v475_v15 = vld [vmem:[#allocation2 + $0xa00] sm:$0xff]  ;;  %v6182_v21 = vcombine.low %v483_v7, %v487_v8 }
  0xca   :  { %2736 = vmatpush1.bf16.msra.mxu1 %v5872_v24  ;;  %v479_v16 = vld [vmem:[#allocation2 + $0xa20] sm:$0xff] }
  0xcb   :  { %2654 = vmatpush1.bf16.msra.mxu0 %v6110_v22  ;;  %2737 = vmatprep.subr.bf16.mxu1 %v5865_v28  ;;  %v5944_v22 = vcombine.low %v244_v10, %v248_v11  ;;  %v6175_v24 = vcombine.high %v475_v15, %v479_v16  ;;  %v344_v28 = vld [vmem:[#allocation2 + $0x5e8] sm:$0xff]  ;;  %v138_v30 = vld [vmem:[%s7590_s0 + $0x20] sm:$0xff] }
  0xcc   :  { %2655 = vmatprep.subr.bf16.mxu0 %v6231_v25  ;;  %v228_v25 = vld [vmem:[#allocation2 + $0x248] sm:$0xff]  ;;  %v6041_v35 = vcombine.high %v340_v27, %v344_v28 }
  0xcd   :  { %v5929_v38 = vcombine.high %v228_v25, %v232_v26  ;;  %v5928_v45 = vcombine.low %v228_v25, %v232_v26  ;;  %v304_v10 = vld [vmem:[#allocation2 + $0x4a8] sm:$0xff] }
  0xce   :  { %2738 = vmatpush1.bf16.msra.mxu1 %v5864_v33  ;;  %v6174_v33 = vcombine.low %v475_v15, %v479_v16  ;;  %v292_v15 = vld [vmem:[#allocation2 + $0x448] sm:$0xff] }
  0xcf   :  { %2656 = vmatpush2.bf16.msra.mxu0 %v6230_v31  ;;  %2739 = vmatprep.subr.bf16.mxu1 %v5857_v37  ;;  %v145_v31 = vld [vmem:[%s7590_s0 + $0x58] sm:$0xff]  ;;  %v336_v37 = vld [vmem:[#allocation2 + $0x5a8] sm:$0xff] }
  0xd0   :  { %2657 = vmatprep.subr.bf16.mxu0 %v6223_v34  ;;  %v5936_v34 = vcombine.low %v236_v18, %v240_v19  ;;  %v7447_v40 = vpack.c.bf16 %v145_v31, %v138_v30  ;;  %v6033_v46 = vcombine.high %v332_v36, %v336_v37  ;;  %v296_v16 = vld [vmem:[#allocation2 + $0x468] sm:$0xff] }
  0xd1   :  { %v5993_v26 = vcombine.high %v292_v15, %v296_v16  ;;  %v288_v30 = vld [vmem:[#allocation2 + $0x428] sm:$0xff] }
  0xd2   :  { %2740 = vmatpush1.bf16.msra.mxu1 %v5856_v42  ;;  %v224_v42 = vld [vmem:[#allocation2 + $0x228] sm:$0xff] }
  0xd3   :  { %2658 = vmatpush2.bf16.msra.mxu0 %v6222_v41  ;;  %2741 = vmatprep.subr.bf16.mxu1 %v5977_v47  ;;  %v220_v41 = vld [vmem:[#allocation2 + $0x208] sm:$0xff] }
  0xd4   :  { %2659 = vmatprep.subr.bf16.mxu0 %v6215_v44  ;;  %v6040_v44 = vcombine.low %v340_v27, %v344_v28  ;;  %v324_v47 = vld [vmem:[#allocation2 + $0x548] sm:$0xff]  ;;  %v5921_v49 = vcombine.high %v220_v41, %v224_v42  ;;  %v5920_v53 = vcombine.low %v220_v41, %v224_v42 }
  0xd5   :  { %v6025_v54 = vcombine.high %v324_v47, %v328_v48  ;;  %v428_v27 = vld [vmem:[#allocation2 + $0x888] sm:$0xff] }
  0xd6   :  { %2742 = vmatpush2.bf16.msra.mxu1 %v5976_v51  ;;  %v472_v51 = vld [vmem:[#allocation2 + $0x9e8] sm:$0xff] }
  0xd7   :  { %2660 = vmatpush2.bf16.msra.mxu0 %v6214_v50  ;;  %2743 = vmatprep.subr.bf16.mxu1 %v5969_v55  ;;  %v468_v50 = vld [vmem:[#allocation2 + $0x9c8] sm:$0xff] }
  0xd8   :  { %2661 = vmatprep.subr.bf16.mxu0 %v6207_v52  ;;  %v6032_v52 = vcombine.low %v332_v36, %v336_v37  ;;  %v316_v55 = vld [vmem:[#allocation2 + $0x508] sm:$0xff]  ;;  %v6169_v57 = vcombine.high %v468_v50, %v472_v51  ;;  %v6168_v62 = vcombine.low %v468_v50, %v472_v51 }
  0xd9   :  { %v6017_v0 = vcombine.high %v316_v55, %v320_v56  ;;  %v432_v28 = vld [vmem:[#allocation2 + $0x8a8] sm:$0xff] }
  0xda   :  { %2744 = vmatpush2.bf16.msra.mxu1 %v5968_v60  ;;  %v464_v60 = vld [vmem:[#allocation2 + $0x9a8] sm:$0xff]  ;;  %v6129_v42 = vcombine.high %v428_v27, %v432_v28 }
  0xdb   :  { %2662 = vmatpush2.bf16.msra.mxu0 %v6206_v59  ;;  %2745 = vmatprep.subr.bf16.mxu1 %v5961_v1  ;;  %v460_v59 = vld [vmem:[#allocation2 + $0x988] sm:$0xff] }
  0xdc   :  { %2663 = vmatprep.subr.bf16.mxu0 %v6199_v61  ;;  %v6024_v61 = vcombine.low %v324_v47, %v328_v48  ;;  %v308_v1 = vld [vmem:[#allocation2 + $0x4c8] sm:$0xff]  ;;  %v6161_v3 = vcombine.high %v460_v59, %v464_v60  ;;  %v6160_v7 = vcombine.low %v460_v59, %v464_v60 }
  0xdd   :  { %v6009_v8 = vcombine.high %v308_v1, %v312_v2  ;;  %v424_v41 = vld [vmem:[#allocation2 + $0x868] sm:$0xff] }
  0xde   :  { %2746 = vmatpush2.bf16.msra.mxu1 %v5960_v5  ;;  %v456_v5 = vld [vmem:[#allocation2 + $0x968] sm:$0xff] }
  0xdf   :  { %2664 = vmatpush2.bf16.msra.mxu0 %v6198_v4  ;;  %2747 = vmatprep.subr.bf16.mxu1 %v5953_v9  ;;  %v452_v4 = vld [vmem:[#allocation2 + $0x948] sm:$0xff] }
  0xe0   :  { %2665 = vmatprep.subr.bf16.mxu0 %v6191_v6  ;;  %v6016_v6 = vcombine.low %v316_v55, %v320_v56  ;;  %v300_v9 = vld [vmem:[#allocation2 + $0x488] sm:$0xff]  ;;  %v6153_v11 = vcombine.high %v452_v4, %v456_v5 }
  0xe1   :  { %v6001_v18 = vcombine.high %v300_v9, %v304_v10  ;;  %v412_v47 = vld [vmem:[#allocation2 + $0x808] sm:$0xff] }
  0xe2   :  { %2748 = vmatpush2.bf16.msra.mxu1 %v5952_v13  ;;  %v448_v13 = vld [vmem:[#allocation2 + $0x928] sm:$0xff] }
  0xe3   :  { %2666 = vmatpush2.bf16.msra.mxu0 %v6190_v12  ;;  %2749 = vmatprep.subr.bf16.mxu1 %v5945_v17  ;;  %v444_v12 = vld [vmem:[#allocation2 + $0x908] sm:$0xff]  ;;  %v6152_v17 = vcombine.low %v452_v4, %v456_v5 }
  0xe4   :  { %2667 = vmatprep.subr.bf16.mxu0 %v6183_v14  ;;  %v6008_v14 = vcombine.low %v308_v1, %v312_v2  ;;  %v6145_v19 = vcombine.high %v444_v12, %v448_v13  ;;  %v6144_v25 = vcombine.low %v444_v12, %v448_v13  ;;  %v416_v48 = vld [vmem:[#allocation2 + $0x828] sm:$0xff] }
  0xe5   :  { %v400_v50 = vld [vmem:[#allocation2 + $0x7a8] sm:$0xff]  ;;  %v6113_v60 = vcombine.high %v412_v47, %v416_v48 }
  0xe6   :  { %2750 = vmatpush2.bf16.msra.mxu1 %v5944_v22  ;;  %v440_v22 = vld [vmem:[#allocation2 + $0x8e8] sm:$0xff] }
  0xe7   :  { %2668 = vmatpush2.bf16.msra.mxu0 %v6182_v21  ;;  %2751 = vmatprep.subr.bf16.mxu1 %v5937_v29  ;;  %v436_v21 = vld [vmem:[#allocation2 + $0x8c8] sm:$0xff] }
  0xe8   :  { %2669 = vmatprep.subr.bf16.mxu0 %v6175_v24  ;;  %v6000_v24 = vcombine.low %v300_v9, %v304_v10  ;;  %v284_v29 = vld [vmem:[#allocation2 + $0x408] sm:$0xff]  ;;  %v6137_v31 = vcombine.high %v436_v21, %v440_v22  ;;  %v6136_v36 = vcombine.low %v436_v21, %v440_v22 }
  0xe9   :  { %v5985_v37 = vcombine.high %v284_v29, %v288_v30  ;;  %v532_v55 = vld [vmem:[#allocation2 + $0xbc8] sm:$0xff] }
  0xea   :  { %2752 = vmatpush2.bf16.msra.mxu1 %v5936_v34  ;;  %v404_v34 = vld [vmem:[#allocation2 + $0x7c8] sm:$0xff] }
  0xeb   :  { %2670 = vmatpush2.bf16.msra.mxu0 %v6174_v33  ;;  %2753 = vmatprep.subr.bf16.mxu1 %v5929_v38  ;;  %v5992_v33 = vcombine.low %v292_v15, %v296_v16  ;;  %v420_v38 = vld [vmem:[#allocation2 + $0x848] sm:$0xff] }
  0xec   :  { %2768 = vmatprep.subr.bf16.mxu0 %v6041_v35  ;;  %v408_v35 = vld [vmem:[#allocation2 + $0x7e8] sm:$0xff]  ;;  %v6121_v51 = vcombine.high %v420_v38, %v424_v41 }
  0xed   :  { %v536_v56 = vld [vmem:[#allocation2 + $0xbe8] sm:$0xff] }
  0xee   :  { %2672 = vmatmul.mubr.bf16.vlgmr.msra.gmra.mxu0 %v7447_v40  ;;  %2754 = vmatpush2.bf16.msra.mxu1 %v5928_v45  ;;  %v6128_v45 = vcombine.low %v428_v27, %v432_v28  ;;  %v392_v59 = vld [vmem:[#allocation2 + $0x768] sm:$0xff]  ;;  %v6233_v5 = vcombine.high %v532_v55, %v536_v56 }
  0xef   :  { %2769 = vmatpush1.bf16.msra.mxu0 %v6040_v44  ;;  %2800 = vmatprep.mubr.bf16.mxu0 %v7398_v63  ;;  %v5984_v44 = vcombine.low %v284_v29, %v288_v30  ;;  %v524_v1 = vld [vmem:[#allocation2 + $0xb88] sm:$0xff] }
  0xf0   :  { %2770 = vmatprep.subr.bf16.mxu0 %v6033_v46  ;;  %2755 = vmatprep.subr.bf16.mxu1 %v5921_v49  ;;  %v6105_v46 = vcombine.high %v404_v34, %v408_v35  ;;  %v396_v49 = vld [vmem:[#allocation2 + $0x788] sm:$0xff] }
  0xf1   :  { %v528_v2 = vld [vmem:[#allocation2 + $0xba8] sm:$0xff] }
  0xf2   :  { %2756 = vmatpush2.bf16.msra.mxu1 %v5920_v53  ;;  %v6120_v53 = vcombine.low %v420_v38, %v424_v41  ;;  %v384_v4 = vld [vmem:[#allocation2 + $0x728] sm:$0xff]  ;;  %v6225_v13 = vcombine.high %v524_v1, %v528_v2  ;;  %v6224_v15 = vcombine.low %v524_v1, %v528_v2 }
  0xf3   :  { %2771 = vmatpush1.bf16.msra.mxu0 %v6032_v52  ;;  %2811 = vmatprep.subr.bf16.mxu1 %v6169_v57  ;;  %v6104_v52 = vcombine.low %v404_v34, %v408_v35  ;;  %v388_v57 = vld [vmem:[#allocation2 + $0x748] sm:$0xff] }
  0xf4   :  { %2772 = vmatprep.subr.bf16.mxu0 %v6025_v54  ;;  %v6097_v54 = vcombine.high %v396_v49, %v400_v50  ;;  %v516_v9 = vld [vmem:[#allocation2 + $0xb48] sm:$0xff] }
  0xf5   :  { %2758 = vmatmul.mubr.bf16.vlgmr.msra.gmra.mxu1 %v7414_v20  ;;  %v520_v10 = vld [vmem:[#allocation2 + $0xb68] sm:$0xff] }
  0xf6   :  { %2812 = vmatpush1.bf16.msra.mxu1 %v6168_v62  ;;  %2843 = vmatprep.mubr.bf16.mxu1 %v7425_v32  ;;  %v6112_v62 = vcombine.low %v412_v47, %v416_v48  ;;  %v376_v12 = vld [vmem:[#allocation2 + $0x6e8] sm:$0xff]  ;;  %v6217_v22 = vcombine.high %v516_v9, %v520_v10 }
  0xf7   :  { %2773 = vmatpush1.bf16.msra.mxu0 %v6024_v61  ;;  %2813 = vmatprep.subr.bf16.mxu1 %v6161_v3  ;;  %v6096_v61 = vcombine.low %v396_v49, %v400_v50  ;;  %v380_v3 = vld [vmem:[#allocation2 + $0x708] sm:$0xff]  ;;  %v213_v49 = vld [vmem:[#allocation2 + $0x1d0] sm:$0xff] }
  0xf8   :  { %2774 = vmatprep.subr.bf16.mxu0 %v6017_v0  ;;  %v6089_v0 = vcombine.high %v388_v57, %v392_v59  ;;  %v368_v21 = vld [vmem:[#allocation2 + $0x6a8] sm:$0xff]  ;;  %v217_v50 = vld [vmem:[#allocation2 + $0x1f0] sm:$0xff] }
  0xf9   :  { %v500_v27 = vld [vmem:[#allocation2 + $0xac8] sm:$0xff] }
  0xfa   :  { %2814 = vmatpush1.bf16.msra.mxu1 %v6160_v7  ;;  %v6232_v7 = vcombine.low %v532_v55, %v536_v56  ;;  %v504_v28 = vld [vmem:[#allocation2 + $0xae8] sm:$0xff] }
  0xfb   :  { %2775 = vmatpush1.bf16.msra.mxu0 %v6016_v6  ;;  %2815 = vmatprep.subr.bf16.mxu1 %v6153_v11  ;;  %v6088_v6 = vcombine.low %v388_v57, %v392_v59  ;;  %v372_v11 = vld [vmem:[#allocation2 + $0x6c8] sm:$0xff]  ;;  %v205_v57 = vld [vmem:[#allocation2 + $0x190] sm:$0xff] }
  0xfc   :  { %2776 = vmatprep.subr.bf16.mxu0 %v6009_v8  ;;  %v6081_v8 = vcombine.high %v380_v3, %v384_v4  ;;  %v6073_v16 = vcombine.high %v372_v11, %v376_v12  ;;  %v356_v29 = vld [vmem:[#allocation2 + $0x648] sm:$0xff]  ;;  %v209_v59 = vld [vmem:[#allocation2 + $0x1b0] sm:$0xff] }
  0xfd   :  { %v360_v30 = vld [vmem:[#allocation2 + $0x668] sm:$0xff]  ;;  %v5907_v2 = vcombine.high %v205_v57, %v209_v59 }
  0xfe   :  { %2816 = vmatpush1.bf16.msra.mxu1 %v6152_v17  ;;  %v508_v17 = vld [vmem:[#allocation2 + $0xb08] sm:$0xff]  ;;  %v6057_v35 = vcombine.high %v356_v29, %v360_v30 }
  0xff   :  { %2777 = vmatpush1.bf16.msra.mxu0 %v6008_v14  ;;  %2817 = vmatprep.subr.bf16.mxu1 %v6145_v19  ;;  %v6080_v14 = vcombine.low %v380_v3, %v384_v4  ;;  %v364_v19 = vld [vmem:[#allocation2 + $0x688] sm:$0xff] }
 0x100   :  { %2778 = vmatprep.subr.bf16.mxu0 %v6001_v18  ;;  %v512_v18 = vld [vmem:[#allocation2 + $0xb28] sm:$0xff] }
 0x101   :  { %v6208_v34 = vcombine.low %v508_v17, %v512_v18  ;;  %v348_v38 = vld [vmem:[#allocation2 + $0x608] sm:$0xff] }
 0x102   :  { %2818 = vmatpush1.bf16.msra.mxu1 %v6144_v25  ;;  %v6216_v25 = vcombine.low %v516_v9, %v520_v10  ;;  %v352_v41 = vld [vmem:[#allocation2 + $0x628] sm:$0xff] }
 0x103   :  { %2779 = vmatpush1.bf16.msra.mxu0 %v6000_v24  ;;  %2819 = vmatprep.subr.bf16.mxu1 %v6137_v31  ;;  %v6072_v24 = vcombine.low %v372_v11, %v376_v12  ;;  %v6209_v31 = vcombine.high %v508_v17, %v512_v18  ;;  %v484_v47 = vld [vmem:[#allocation2 + $0xa48] sm:$0xff]  ;;  %v341_v11 = vld [vmem:[#allocation2 + $0x5d0] sm:$0xff] }
 0x104   :  { %2780 = vmatprep.subr.bf16.mxu0 %v5993_v26  ;;  %v6065_v26 = vcombine.high %v364_v19, %v368_v21  ;;  %v488_v48 = vld [vmem:[#allocation2 + $0xa68] sm:$0xff]  ;;  %v345_v12 = vld [vmem:[#allocation2 + $0x5f0] sm:$0xff] }
 0x105   :  { %v476_v55 = vld [vmem:[#allocation2 + $0xa08] sm:$0xff]  ;;  %v6184_v1 = vcombine.low %v484_v47, %v488_v48  ;;  %v181_v17 = vld [vmem:[#allocation2 + $0xd0] sm:$0xff] }
 0x106   :  { %2820 = vmatpush1.bf16.msra.mxu1 %v6136_v36  ;;  %v492_v36 = vld [vmem:[#allocation2 + $0xa88] sm:$0xff]  ;;  %v185_v18 = vld [vmem:[#allocation2 + $0xf0] sm:$0xff] }
 0x107   :  { %2781 = vmatpush1.bf16.msra.mxu0 %v5992_v33  ;;  %2821 = vmatprep.subr.bf16.mxu1 %v6129_v42  ;;  %v6064_v33 = vcombine.low %v364_v19, %v368_v21  ;;  %v6201_v42 = vcombine.high %v500_v27, %v504_v28  ;;  %v480_v56 = vld [vmem:[#allocation2 + $0xa28] sm:$0xff]  ;;  %v6043_v19 = vcombine.high %v341_v11, %v345_v12 }
 0x108   :  { %2782 = vmatprep.subr.bf16.mxu0 %v5985_v37  ;;  %v496_v37 = vld [vmem:[#allocation2 + $0xaa8] sm:$0xff]  ;;  %v6176_v9 = vcombine.low %v476_v55, %v480_v56 }
 0x109   :  { %v540_v3 = vld [vmem:[#allocation2 + $0xc08] sm:$0xff] }
 0x10a   :  { %2822 = vmatpush1.bf16.msra.mxu1 %v6128_v45  ;;  %v6200_v45 = vcombine.low %v500_v27, %v504_v28  ;;  %v544_v4 = vld [vmem:[#allocation2 + $0xc28] sm:$0xff]  ;;  %v177_v27 = vld [vmem:[#allocation2 + $0xb0] sm:$0xff]  ;;  %v5882_v28 = vcombine.low %v181_v17, %v185_v18 }
 0x10b   :  { %2783 = vmatpush1.bf16.msra.mxu0 %v5984_v44  ;;  %2823 = vmatprep.subr.bf16.mxu1 %v6121_v51  ;;  %v6056_v44 = vcombine.low %v356_v29, %v360_v30  ;;  %v6193_v51 = vcombine.high %v492_v36, %v496_v37  ;;  %v6042_v29 = vcombine.low %v341_v11, %v345_v12 }
 0x10c   :  { %2784 = vmatprep.subr.bf16.mxu0 %v6105_v46  ;;  %v6049_v46 = vcombine.high %v348_v38, %v352_v41 }
 0x10e   :  { %2824 = vmatpush1.bf16.msra.mxu1 %v6120_v53  ;;  %v6192_v53 = vcombine.low %v492_v36, %v496_v37 }
 0x10f   :  { %2785 = vmatpush2.bf16.msra.mxu0 %v6104_v52  ;;  %2825 = vmatprep.subr.bf16.mxu1 %v6113_v60  ;;  %v6048_v52 = vcombine.low %v348_v38, %v352_v41  ;;  %v6185_v60 = vcombine.high %v484_v47, %v488_v48 }
 0x110   :  { %2786 = vmatprep.subr.bf16.mxu0 %v6097_v54  ;;  %v5915_v54 = vcombine.high %v213_v49, %v217_v50 }
 0x112   :  { %2826 = vmatpush1.bf16.msra.mxu1 %v6112_v62  ;;  %v197_v62 = vld [vmem:[#allocation2 + $0x150] sm:$0xff] }
 0x113   :  { %2787 = vmatpush2.bf16.msra.mxu0 %v6096_v61  ;;  %2827 = vmatprep.subr.bf16.mxu1 %v6233_v5  ;;  %v5914_v61 = vcombine.low %v213_v49, %v217_v50  ;;  %v6177_v5 = vcombine.high %v476_v55, %v480_v56 }
 0x114   :  { %2788 = vmatprep.subr.bf16.mxu0 %v6089_v0  ;;  %v201_v0 = vld [vmem:[#allocation2 + $0x170] sm:$0xff] }
 0x115   :  { %v5899_v10 = vcombine.high %v197_v62, %v201_v0 }
 0x116   :  { %2828 = vmatpush2.bf16.msra.mxu1 %v6232_v7  ;;  %v189_v7 = vld [vmem:[#allocation2 + $0x110] sm:$0xff] }
 0x117   :  { %2789 = vmatpush2.bf16.msra.mxu0 %v6088_v6  ;;  %2829 = vmatprep.subr.bf16.mxu1 %v6225_v13  ;;  %v5906_v6 = vcombine.low %v205_v57, %v209_v59  ;;  %v6241_v13 = vcombine.high %v540_v3, %v544_v4 }
 0x118   :  { %2790 = vmatprep.subr.bf16.mxu0 %v6081_v8  ;;  %v193_v8 = vld [vmem:[#allocation2 + $0x130] sm:$0xff] }
 0x119   :  { %v5890_v21 = vcombine.low %v189_v7, %v193_v8 }
 0x11a   :  { %2830 = vmatpush2.bf16.msra.mxu1 %v6224_v15  ;;  %v6240_v15 = vcombine.low %v540_v3, %v544_v4 }
 0x11b   :  { %2791 = vmatpush2.bf16.msra.mxu0 %v6080_v14  ;;  %2831 = vmatprep.subr.bf16.mxu1 %v6217_v22  ;;  %v5898_v14 = vcombine.low %v197_v62, %v201_v0  ;;  %v5883_v22 = vcombine.high %v181_v17, %v185_v18  ;;  %v269_v62 = vld [vmem:[#allocation2 + $0x390] sm:$0xff] }
 0x11c   :  { %2792 = vmatprep.subr.bf16.mxu0 %v6073_v16  ;;  %v5891_v16 = vcombine.high %v189_v7, %v193_v8  ;;  %v273_v0 = vld [vmem:[#allocation2 + $0x3b0] sm:$0xff] }
 0x11d   :  { %v5971_v4 = vcombine.high %v269_v62, %v273_v0  ;;  %v261_v7 = vld [vmem:[#allocation2 + $0x350] sm:$0xff] }
 0x11e   :  { %2832 = vmatpush2.bf16.msra.mxu1 %v6216_v25  ;;  %v337_v25 = vld [vmem:[#allocation2 + $0x5b0] sm:$0xff] }
 0x11f   :  { %2793 = vmatpush2.bf16.msra.mxu0 %v6072_v24  ;;  %2833 = vmatprep.subr.bf16.mxu1 %v6209_v31  ;;  %v333_v24 = vld [vmem:[#allocation2 + $0x590] sm:$0xff] }
 0x120   :  { %2794 = vmatprep.subr.bf16.mxu0 %v6065_v26  ;;  %v173_v26 = vld [vmem:[#allocation2 + $0x90] sm:$0xff]  ;;  %v6035_v36 = vcombine.high %v333_v24, %v337_v25  ;;  %v6034_v38 = vcombine.low %v333_v24, %v337_v25 }
 0x121   :  { %v5875_v30 = vcombine.high %v173_v26, %v177_v27  ;;  %v325_v31 = vld [vmem:[#allocation2 + $0x550] sm:$0xff]  ;;  %v5874_v37 = vcombine.low %v173_v26, %v177_v27 }
 0x122   :  { %2834 = vmatpush2.bf16.msra.mxu1 %v6208_v34  ;;  %v165_v34 = vld [vmem:[#allocation2 + $0x50] sm:$0xff] }
 0x123   :  { %2795 = vmatpush2.bf16.msra.mxu0 %v6064_v33  ;;  %2835 = vmatprep.subr.bf16.mxu1 %v6201_v42  ;;  %v329_v33 = vld [vmem:[#allocation2 + $0x570] sm:$0xff] }
 0x124   :  { %2796 = vmatprep.subr.bf16.mxu0 %v6057_v35  ;;  %v169_v35 = vld [vmem:[#allocation2 + $0x70] sm:$0xff]  ;;  %v6027_v47 = vcombine.high %v325_v31, %v329_v33  ;;  %v6026_v49 = vcombine.low %v325_v31, %v329_v33 }
 0x125   :  { %v5867_v41 = vcombine.high %v165_v34, %v169_v35  ;;  %v317_v42 = vld [vmem:[#allocation2 + $0x510] sm:$0xff]  ;;  %v5866_v48 = vcombine.low %v165_v34, %v169_v35 }
 0x126   :  { %2836 = vmatpush2.bf16.msra.mxu1 %v6200_v45  ;;  %v157_v45 = vld [vmem:[#allocation2 + $0x10] sm:$0xff] }
 0x127   :  { %2797 = vmatpush2.bf16.msra.mxu0 %v6056_v44  ;;  %2837 = vmatprep.subr.bf16.mxu1 %v6193_v51  ;;  %v321_v44 = vld [vmem:[#allocation2 + $0x530] sm:$0xff] }
 0x128   :  { %2798 = vmatprep.subr.bf16.mxu0 %v6049_v46  ;;  %v161_v46 = vld [vmem:[#allocation2 + $0x30] sm:$0xff]  ;;  %v6019_v55 = vcombine.high %v317_v42, %v321_v44  ;;  %v6018_v57 = vcombine.low %v317_v42, %v321_v44 }
 0x129   :  { %v5859_v50 = vcombine.high %v157_v45, %v161_v46  ;;  %v309_v51 = vld [vmem:[#allocation2 + $0x4d0] sm:$0xff]  ;;  %v5858_v56 = vcombine.low %v157_v45, %v161_v46 }
 0x12a   :  { %2838 = vmatpush2.bf16.msra.mxu1 %v6192_v53  ;;  %v277_v53 = vld [vmem:[#allocation2 + $0x3d0] sm:$0xff] }
 0x12b   :  { %2799 = vmatpush2.bf16.msra.mxu0 %v6048_v52  ;;  %2839 = vmatprep.subr.bf16.mxu1 %v6185_v60  ;;  %v313_v52 = vld [vmem:[#allocation2 + $0x4f0] sm:$0xff] }
 0x12c   :  { %2897 = vmatprep.subr.bf16.mxu0 %v5915_v54  ;;  %v281_v54 = vld [vmem:[#allocation2 + $0x3f0] sm:$0xff]  ;;  %v6010_v3 = vcombine.low %v309_v51, %v313_v52 }
 0x12d   :  { %v5979_v59 = vcombine.high %v277_v53, %v281_v54  ;;  %v301_v60 = vld [vmem:[#allocation2 + $0x490] sm:$0xff] }
 0x12e   :  { %2801 = vmatmul.mubr.bf16.vlgmr.msra.gmra.mxu0 %v7416_v23  ;;  %2840 = vmatpush2.bf16.msra.mxu1 %v6184_v1  ;;  %v6011_v1 = vcombine.high %v309_v51, %v313_v52  ;;  %v265_v8 = vld [vmem:[#allocation2 + $0x370] sm:$0xff] }
 0x12f   :  { %2898 = vmatpush1.bf16.msra.mxu0 %v5914_v61  ;;  %2929 = vmatprep.mubr.bf16.mxu0 %v7390_v58  ;;  %v305_v61 = vld [vmem:[#allocation2 + $0x4b0] sm:$0xff]  ;;  %v5963_v12 = vcombine.high %v261_v7, %v265_v8  ;;  %v5962_v18 = vcombine.low %v261_v7, %v265_v8  ;;  %v7465_v7 = vld [vmem:[#allocation4] sm:$0xff] }
 0x130   :  { %2899 = vmatprep.subr.bf16.mxu0 %v5907_v2  ;;  %2841 = vmatprep.subr.bf16.mxu1 %v6177_v5  ;;  %v5978_v2 = vcombine.low %v277_v53, %v281_v54  ;;  %v293_v5 = vld [vmem:[#allocation2 + $0x450] sm:$0xff]  ;;  %v6002_v11 = vcombine.low %v301_v60, %v305_v61 }
 0x131   :  { %v409_v24 = vld [vmem:[#allocation2 + $0x7f0] sm:$0xff] }
 0x132   :  { %2842 = vmatpush2.bf16.msra.mxu1 %v6176_v9  ;;  %v6003_v9 = vcombine.high %v301_v60, %v305_v61  ;;  %v245_v25 = vld [vmem:[#allocation2 + $0x2d0] sm:$0xff] }
 0x133   :  { %2900 = vmatpush1.bf16.msra.mxu0 %v5906_v6  ;;  %2868 = vmatprep.subr.bf16.mxu1 %v6241_v13  ;;  %v297_v6 = vld [vmem:[#allocation2 + $0x470] sm:$0xff] }
 0x134   :  { %2901 = vmatprep.subr.bf16.mxu0 %v5899_v10  ;;  %v5970_v10 = vcombine.low %v269_v62, %v273_v0  ;;  %v285_v13 = vld [vmem:[#allocation2 + $0x410] sm:$0xff]  ;;  %v5995_v17 = vcombine.high %v293_v5, %v297_v6 }
 0x135   :  { %2844 = vmatmul.mubr.bf16.vlgmr.msra.gmra.mxu1 %v7447_v40  ;;  %v249_v26 = vld [vmem:[#allocation2 + $0x2f0] sm:$0xff] }
 0x136   :  { %2869 = vmatpush1.bf16.msra.mxu1 %v6240_v15  ;;  %2886 = vmatprep.mubr.bf16.mxu1 %v7309_v39  ;;  %v253_v15 = vld [vmem:[#allocation2 + $0x310] sm:$0xff] }
 0x137   :  { %2902 = vmatpush1.bf16.msra.mxu0 %v5898_v14  ;;  %2940 = vmatprep.subr.bf16.mxu1 %v6043_v19  ;;  %v289_v14 = vld [vmem:[#allocation2 + $0x430] sm:$0xff]  ;;  %v5994_v19 = vcombine.low %v293_v5, %v297_v6 }
 0x138   :  { %2903 = vmatprep.subr.bf16.mxu0 %v5891_v16  ;;  %v257_v16 = vld [vmem:[#allocation2 + $0x330] sm:$0xff]  ;;  %v5987_v27 = vcombine.high %v285_v13, %v289_v14 }
 0x139   :  { %v397_v31 = vld [vmem:[#allocation2 + $0x790] sm:$0xff] }
 0x13a   :  { %v401_v33 = vld [vmem:[#allocation2 + $0x7b0] sm:$0xff] }
 0x13b   :  { %2904 = vmatpush1.bf16.msra.mxu0 %v5890_v21  ;;  %v5955_v21 = vcombine.high %v253_v15, %v257_v16  ;;  %v237_v34 = vld [vmem:[#allocation2 + $0x290] sm:$0xff]  ;;  %v6099_v46 = vcombine.high %v397_v31, %v401_v33 }
 0x13c   :  { %2905 = vmatprep.subr.bf16.mxu0 %v5883_v22  ;;  %v405_v22 = vld [vmem:[#allocation2 + $0x7d0] sm:$0xff] }
 0x13d   :  { %6247 = vmatmul.mubr.msk.bf16.vlgmr.msra.gmra.mxu1 %vm2549_vm0, %v7436_v43  ;;  %v241_v35 = vld [vmem:[#allocation2 + $0x2b0] sm:$0xff] }
 0x13e   :  { %2941 = vmatpush1.bf16.msra.mxu1 %v6042_v29  ;;  %2972 = vmatprep.mubr.bf16.mxu1 %v7398_v63  ;;  %v5986_v29 = vcombine.low %v285_v13, %v289_v14  ;;  %v389_v42 = vld [vmem:[#allocation2 + $0x750] sm:$0xff] }
 0x13f   :  { %2906 = vmatpush1.bf16.msra.mxu0 %v5882_v28  ;;  %2942 = vmatprep.subr.bf16.mxu1 %v6035_v36  ;;  %v5954_v28 = vcombine.low %v253_v15, %v257_v16  ;;  %v6107_v36 = vcombine.high %v405_v22, %v409_v24  ;;  %v229_v44 = vld [vmem:[#allocation2 + $0x250] sm:$0xff] }
 0x140   :  { %2907 = vmatprep.subr.bf16.mxu0 %v5875_v30  ;;  %v5947_v30 = vcombine.high %v245_v25, %v249_v26  ;;  %v233_v45 = vld [vmem:[#allocation2 + $0x270] sm:$0xff] }
 0x141   :  { %v5931_v51 = vcombine.high %v229_v44, %v233_v45  ;;  %v221_v53 = vld [vmem:[#allocation2 + $0x210] sm:$0xff] }
 0x142   :  { %2943 = vmatpush1.bf16.msra.mxu1 %v6034_v38  ;;  %v6106_v38 = vcombine.low %v405_v22, %v409_v24  ;;  %v225_v54 = vld [vmem:[#allocation2 + $0x230] sm:$0xff] }
 0x143   :  { %2908 = vmatpush1.bf16.msra.mxu0 %v5874_v37  ;;  %2944 = vmatprep.subr.bf16.mxu1 %v6027_v47  ;;  %v5946_v37 = vcombine.low %v245_v25, %v249_v26  ;;  %v393_v47 = vld [vmem:[#allocation2 + $0x770] sm:$0xff]  ;;  %v5923_v61 = vcombine.high %v221_v53, %v225_v54 }
 0x144   :  { %2909 = vmatprep.subr.bf16.mxu0 %v5867_v41  ;;  %v5939_v41 = vcombine.high %v237_v34, %v241_v35  ;;  %v6091_v52 = vcombine.high %v389_v42, %v393_v47  ;;  %v6090_v60 = vcombine.low %v389_v42, %v393_v47  ;;  %v469_v0 = vld [vmem:[#allocation2 + $0x9d0] sm:$0xff] }
 0x145   :  { %v369_v13 = vld [vmem:[#allocation2 + $0x6b0] sm:$0xff] }
 0x146   :  { %2945 = vmatpush1.bf16.msra.mxu1 %v6026_v49  ;;  %v549_v49 = vlaneseq  ;;  %v357_v24 = vld [vmem:[#allocation2 + $0x650] sm:$0xff] }
 0x147   :  { %2910 = vmatpush1.bf16.msra.mxu0 %v5866_v48  ;;  %2946 = vmatprep.subr.bf16.mxu1 %v6019_v55  ;;  %v5938_v48 = vcombine.low %v237_v34, %v241_v35  ;;  %v381_v55 = vld [vmem:[#allocation2 + $0x710] sm:$0xff] }
 0x148   :  { %2911 = vmatprep.subr.bf16.mxu0 %v5859_v50  ;;  %v6098_v50 = vcombine.low %v397_v31, %v401_v33  ;;  %v361_v25 = vld [vmem:[#allocation2 + $0x670] sm:$0xff] }
 0x149   :  { %v6059_v35 = vcombine.high %v357_v24, %v361_v25  ;;  %v353_v42 = vld [vmem:[#allocation2 + $0x630] sm:$0xff]  ;;  %v6058_v47 = vcombine.low %v357_v24, %v361_v25  ;;  %v198_v24 = vld [vmem:[#allocation2 + $0x158] sm:$0xff] }
 0x14a   :  { %2947 = vmatpush1.bf16.msra.mxu1 %v6018_v57  ;;  %v5930_v57 = vcombine.low %v229_v44, %v233_v45  ;;  %v202_v25 = vld [vmem:[#allocation2 + $0x178] sm:$0xff] }
 0x14b   :  { %2912 = vmatpush1.bf16.msra.mxu0 %v5858_v56  ;;  %2948 = vmatprep.subr.bf16.mxu1 %v6011_v1  ;;  %v385_v56 = vld [vmem:[#allocation2 + $0x730] sm:$0xff] }
 0x14c   :  { %2913 = vmatprep.subr.bf16.mxu0 %v5979_v59  ;;  %v7460_v59 = vshrl.u32 %v549_v49, 7  ;;  %v6083_v62 = vcombine.high %v381_v55, %v385_v56  ;;  %v473_v1 = vld [vmem:[#allocation2 + $0x9f0] sm:$0xff]  ;;  %v6082_v6 = vcombine.low %v381_v55, %v385_v56 }
 0x14d   :  { %v6171_v8 = vcombine.high %v469_v0, %v473_v1  ;;  %v6170_v15 = vcombine.low %v469_v0, %v473_v1  ;;  %v214_v0 = vld [vmem:[#allocation2 + $0x1d8] sm:$0xff] }
 0x14e   :  { %2949 = vmatpush1.bf16.msra.mxu1 %v6010_v3  ;;  %v377_v3 = vld [vmem:[#allocation2 + $0x6f0] sm:$0xff]  ;;  %v7463_v5 = vsub.s32 0, %v7460_v59  ;;  %v218_v1 = vld [vmem:[#allocation2 + $0x1f8] sm:$0xff] }
 0x14f   :  { %2914 = vmatpush2.bf16.msra.mxu0 %v5978_v2  ;;  %2950 = vmatprep.subr.bf16.mxu1 %v6003_v9  ;;  %v373_v2 = vld [vmem:[#allocation2 + $0x6d0] sm:$0xff] }
 0x150   :  { %2915 = vmatprep.subr.bf16.mxu0 %v5971_v4  ;;  %v5922_v4 = vcombine.low %v221_v53, %v225_v54  ;;  %v6075_v9 = vcombine.high %v373_v2, %v377_v3  ;;  %v552_v14 = vrot.slane %v7465_v7, %v7463_v5  ;;  %v6074_v16 = vcombine.low %v373_v2, %v377_v3  ;;  %v541_v53 = vld [vmem:[#allocation2 + $0xc10] sm:$0xff] }
 0x151   :  { %v545_v54 = vld [vmem:[#allocation2 + $0xc30] sm:$0xff] }
 0x152   :  { %2951 = vmatpush1.bf16.msra.mxu1 %v6002_v11  ;;  %v465_v11 = vld [vmem:[#allocation2 + $0x9b0] sm:$0xff]  ;;  %v6242_v3 = vcombine.low %v541_v53, %v545_v54 }
 0x153   :  { %2916 = vmatpush2.bf16.msra.mxu0 %v5970_v10  ;;  %2952 = vmatprep.subr.bf16.mxu1 %v5995_v17  ;;  %v461_v10 = vld [vmem:[#allocation2 + $0x990] sm:$0xff] }
 0x154   :  { %2917 = vmatprep.subr.bf16.mxu0 %v5963_v12  ;;  %v365_v12 = vld [vmem:[#allocation2 + $0x690] sm:$0xff]  ;;  %v6163_v17 = vcombine.high %v461_v10, %v465_v11 }
 0x156   :  { %2953 = vmatpush1.bf16.msra.mxu1 %v5994_v19  ;;  %v453_v19 = vld [vmem:[#allocation2 + $0x950] sm:$0xff] }
 0x157   :  { %2918 = vmatpush2.bf16.msra.mxu0 %v5962_v18  ;;  %2954 = vmatprep.subr.bf16.mxu1 %v5987_v27  ;;  %v6067_v18 = vcombine.high %v365_v12, %v369_v13 }
 0x158   :  { %2919 = vmatprep.subr.bf16.mxu0 %v5955_v21  ;;  %v457_v21 = vld [vmem:[#allocation2 + $0x970] sm:$0xff] }
 0x159   :  { %v6155_v31 = vcombine.high %v453_v19, %v457_v21  ;;  %v6154_v45 = vcombine.low %v453_v19, %v457_v21  ;;  %v533_v21 = vld [vmem:[#allocation2 + $0xbd0] sm:$0xff] }
 0x15a   :  { %2955 = vmatpush1.bf16.msra.mxu1 %v5986_v29 }
 0x15b   :  { %2920 = vmatpush2.bf16.msra.mxu0 %v5954_v28  ;;  %2956 = vmatprep.subr.bf16.mxu1 %v6107_v36  ;;  %v6162_v28 = vcombine.low %v461_v10, %v465_v11  ;;  %v445_v36 = vld [vmem:[#allocation2 + $0x910] sm:$0xff] }
 0x15c   :  { %2921 = vmatprep.subr.bf16.mxu0 %v5947_v30  ;;  %v6066_v30 = vcombine.low %v365_v12, %v369_v13  ;;  %v413_v12 = vld [vmem:[#allocation2 + $0x810] sm:$0xff] }
 0x15d   :  { %v417_v13 = vld [vmem:[#allocation2 + $0x830] sm:$0xff] }
 0x15e   :  { %2957 = vmatpush2.bf16.msra.mxu1 %v6106_v38 }
 0x15f   :  { %2922 = vmatpush2.bf16.msra.mxu0 %v5946_v37  ;;  %2958 = vmatprep.subr.bf16.mxu1 %v6099_v46  ;;  %v449_v37 = vld [vmem:[#allocation2 + $0x930] sm:$0xff] }
 0x160   :  { %2923 = vmatprep.subr.bf16.mxu0 %v5939_v41  ;;  %v349_v41 = vld [vmem:[#allocation2 + $0x610] sm:$0xff]  ;;  %v6146_v55 = vcombine.low %v445_v36, %v449_v37 }
 0x161   :  { %v6050_v56 = vcombine.low %v349_v41, %v353_v42 }
 0x162   :  { %2959 = vmatpush2.bf16.msra.mxu1 %v6098_v50  ;;  %v6051_v50 = vcombine.high %v349_v41, %v353_v42  ;;  %v5900_v41 = vcombine.low %v198_v24, %v202_v25 }
 0x163   :  { %2924 = vmatpush2.bf16.msra.mxu0 %v5938_v48  ;;  %2960 = vmatprep.subr.bf16.mxu1 %v6091_v52  ;;  %v6147_v48 = vcombine.high %v445_v36, %v449_v37  ;;  %v441_v52 = vld [vmem:[#allocation2 + $0x8f0] sm:$0xff]  ;;  %v190_v36 = vld [vmem:[#allocation2 + $0x118] sm:$0xff] }
 0x164   :  { %2925 = vmatprep.subr.bf16.mxu0 %v5931_v51  ;;  %v437_v51 = vld [vmem:[#allocation2 + $0x8d0] sm:$0xff]  ;;  %v194_v37 = vld [vmem:[#allocation2 + $0x138] sm:$0xff] }
 0x165   :  { %v6138_v2 = vcombine.low %v437_v51, %v441_v52 }
 0x166   :  { %2961 = vmatpush2.bf16.msra.mxu1 %v6090_v60  ;;  %v6243_v60 = vcombine.high %v541_v53, %v545_v54  ;;  %v509_v53 = vld [vmem:[#allocation2 + $0xb10] sm:$0xff] }
 0x167   :  { %2926 = vmatpush2.bf16.msra.mxu0 %v5930_v57  ;;  %2962 = vmatprep.subr.bf16.mxu1 %v6083_v62  ;;  %v6139_v57 = vcombine.high %v437_v51, %v441_v52  ;;  %v433_v62 = vld [vmem:[#allocation2 + $0x8b0] sm:$0xff]  ;;  %v5892_v51 = vcombine.low %v190_v36, %v194_v37 }
 0x168   :  { %2927 = vmatprep.subr.bf16.mxu0 %v5923_v61  ;;  %v429_v61 = vld [vmem:[#allocation2 + $0x890] sm:$0xff] }
 0x169   :  { %v6130_v10 = vcombine.low %v429_v61, %v433_v62  ;;  %v513_v54 = vld [vmem:[#allocation2 + $0xb30] sm:$0xff] }
 0x16a   :  { %2963 = vmatpush2.bf16.msra.mxu1 %v6082_v6  ;;  %v5917_v6 = vcombine.high %v214_v0, %v218_v1 }
 0x16b   :  { %2928 = vmatpush2.bf16.msra.mxu0 %v5922_v4  ;;  %2964 = vmatprep.subr.bf16.mxu1 %v6075_v9  ;;  %v6131_v4 = vcombine.high %v429_v61, %v433_v62  ;;  %v425_v9 = vld [vmem:[#allocation2 + $0x870] sm:$0xff]  ;;  %v6211_v61 = vcombine.high %v509_v53, %v513_v54 }
 0x16c   :  { %2983 = vmatprep.subr.bf16.mxu0 %v6171_v8  ;;  %v421_v8 = vld [vmem:[#allocation2 + $0x850] sm:$0xff] }
 0x16d   :  { %v2630_v27 = vpop.f32.mrf.mxu1  ;;  %v6123_v11 = vcombine.high %v421_v8, %v425_v9 }
 0x16e   :  { %v2587_v22 = vpop.f32.mrf.mxu0  ;;  %2930 = vmatmul.mubr.bf16.vlgmr.msra.gmra.mxu0 %v7414_v20  ;;  %2965 = vmatpush2.bf16.msra.mxu1 %v6074_v16  ;;  %v6122_v16 = vcombine.low %v421_v8, %v425_v9 }
 0x16f   :  { %v2588_v26 = vadd.f32 %v2587_v22, %v552_v14  ;;  %2984 = vmatpush1.bf16.msra.mxu0 %v6170_v15  ;;  %3015 = vmatprep.mubr.bf16.mxu0 %v7425_v32  ;;  %v7475_v34 = vpop.f32.mrf.mxu1  ;;  %v210_v15 = vld [vmem:[#allocation2 + $0x1b8] sm:$0xff]  ;;  %v537_v22 = vld [vmem:[#allocation2 + $0xbf0] sm:$0xff] }
 0x170   :  { %v7471_v29 = vpop.f32.mrf.mxu0  ;;  %2985 = vmatprep.subr.bf16.mxu0 %v6163_v17  ;;  %2966 = vmatprep.subr.bf16.mxu1 %v6067_v18  ;;  %v5916_v17 = vcombine.low %v214_v0, %v218_v1  ;;  %v6115_v18 = vcombine.high %v413_v12, %v417_v13  ;;  %v501_v0 = vld [vmem:[#allocation2 + $0xad0] sm:$0xff] }
 0x171   :  { %v7473_v33 = vadd.f32 %v2630_v27, %v2588_v26  ;;  %v2634_v46 = vpop.f32.mrf.mxu1  ;;  %v6114_v26 = vcombine.low %v413_v12, %v417_v13  ;;  %v505_v1 = vld [vmem:[#allocation2 + $0xaf0] sm:$0xff]  ;;  %v158_v12 = vld [vmem:[#allocation2 + $0x18] sm:$0xff] }
 0x172   :  { %v2591_v38 = vpop.f32.mrf.mxu0  ;;  %2967 = vmatpush2.bf16.msra.mxu1 %v6066_v30  ;;  %v5901_v30 = vcombine.high %v198_v24, %v202_v25  ;;  %v6203_v8 = vcombine.high %v501_v0, %v505_v1  ;;  %v162_v13 = vld [vmem:[#allocation2 + $0x38] sm:$0xff] }
 0x173   :  { %v2592_v44 = vadd.f32 %v2591_v38, %v552_v14  ;;  %2986 = vmatpush1.bf16.msra.mxu0 %v6162_v28  ;;  %2968 = vmatprep.subr.bf16.mxu1 %v6059_v35  ;;  %v206_v14 = vld [vmem:[#allocation2 + $0x198] sm:$0xff]  ;;  %v6235_v28 = vcombine.high %v533_v21, %v537_v22  ;;  %v529_v35 = vld [vmem:[#allocation2 + $0xbb0] sm:$0xff]  ;;  %v6234_v38 = vcombine.low %v533_v21, %v537_v22 }
 0x174   :  { %2987 = vmatprep.subr.bf16.mxu0 %v6155_v31  ;;  %v5909_v19 = vcombine.high %v206_v14, %v210_v15  ;;  %v5908_v27 = vcombine.low %v206_v14, %v210_v15  ;;  %v525_v31 = vld [vmem:[#allocation2 + $0xb90] sm:$0xff]  ;;  %v6202_v14 = vcombine.low %v501_v0, %v505_v1  ;;  %v278_v21 = vld [vmem:[#allocation2 + $0x3d8] sm:$0xff]  ;;  %v5860_v25 = vcombine.low %v158_v12, %v162_v13 }
 0x175   :  { %v7477_v49 = vadd.f32 %v2634_v46, %v2592_v44  ;;  %v6227_v42 = vcombine.high %v525_v31, %v529_v35  ;;  %v5893_v44 = vcombine.high %v190_v36, %v194_v37  ;;  %v521_v46 = vld [vmem:[#allocation2 + $0xb70] sm:$0xff]  ;;  %v282_v22 = vld [vmem:[#allocation2 + $0x3f8] sm:$0xff] }
 0x176   :  { %2969 = vmatpush2.bf16.msra.mxu1 %v6058_v47  ;;  %v182_v47 = vld [vmem:[#allocation2 + $0xd8] sm:$0xff]  ;;  %v5980_v37 = vcombine.low %v278_v21, %v282_v22 }
 0x177   :  { %2988 = vmatpush1.bf16.msra.mxu0 %v6154_v45  ;;  %2970 = vmatprep.subr.bf16.mxu1 %v6051_v50  ;;  %v517_v45 = vld [vmem:[#allocation2 + $0xb50] sm:$0xff]  ;;  %v6226_v50 = vcombine.low %v525_v31, %v529_v35  ;;  %v270_v31 = vld [vmem:[#allocation2 + $0x398] sm:$0xff] }
 0x178   :  { %2989 = vmatprep.subr.bf16.mxu0 %v6147_v48  ;;  %v186_v48 = vld [vmem:[#allocation2 + $0xf8] sm:$0xff] }
 0x179   :  { %v5885_v52 = vcombine.high %v182_v47, %v186_v48  ;;  %v274_v35 = vld [vmem:[#allocation2 + $0x3b8] sm:$0xff] }
 0x17a   :  { %2971 = vmatpush2.bf16.msra.mxu1 %v6050_v56  ;;  %v178_v56 = vld [vmem:[#allocation2 + $0xb8] sm:$0xff] }
 0x17b   :  { %2990 = vmatpush1.bf16.msra.mxu0 %v6146_v55  ;;  %3040 = vmatprep.subr.bf16.mxu1 %v6243_v60  ;;  %v174_v55 = vld [vmem:[#allocation2 + $0x98] sm:$0xff]  ;;  %v5884_v60 = vcombine.low %v182_v47, %v186_v48  ;;  %v7484_v48 = vpop.f32.mrf.mxu1 }
 0x17c   :  { %2991 = vmatprep.subr.bf16.mxu0 %v6139_v57  ;;  %v6218_v57 = vcombine.low %v517_v45, %v521_v46  ;;  %v5877_v62 = vcombine.high %v174_v55, %v178_v56  ;;  %v326_v1 = vld [vmem:[#allocation2 + $0x558] sm:$0xff] }
 0x17d   :  { %2973 = vmatmul.mubr.bf16.vlgmr.msra.gmra.mxu1 %v7416_v23 }
 0x17e   :  { %3041 = vmatpush1.bf16.msra.mxu1 %v6242_v3  ;;  %3058 = vmatprep.mubr.bf16.mxu1 %v7309_v39  ;;  %v170_v3 = vld [vmem:[#allocation2 + $0x78] sm:$0xff] }
 0x17f   :  { %2992 = vmatpush1.bf16.msra.mxu0 %v6138_v2  ;;  %3069 = vmatprep.subr.bf16.mxu1 %v5917_v6  ;;  %v166_v2 = vld [vmem:[#allocation2 + $0x58] sm:$0xff]  ;;  %v5876_v6 = vcombine.low %v174_v55, %v178_v56 }
 0x180   :  { %2993 = vmatprep.subr.bf16.mxu0 %v6131_v4  ;;  %v6210_v4 = vcombine.low %v509_v53, %v513_v54  ;;  %v5869_v9 = vcombine.high %v166_v2, %v170_v3  ;;  %v5868_v15 = vcombine.low %v166_v2, %v170_v3  ;;  %v338_v53 = vld [vmem:[#allocation2 + $0x5b8] sm:$0xff] }
 0x181   :  { %v254_v54 = vld [vmem:[#allocation2 + $0x318] sm:$0xff] }
 0x182   :  { %v258_v55 = vld [vmem:[#allocation2 + $0x338] sm:$0xff] }
 0x183   :  { %2994 = vmatpush1.bf16.msra.mxu0 %v6130_v10  ;;  %v493_v10 = vld [vmem:[#allocation2 + $0xa90] sm:$0xff]  ;;  %v5957_v0 = vcombine.high %v254_v54, %v258_v55  ;;  %v330_v2 = vld [vmem:[#allocation2 + $0x578] sm:$0xff] }
 0x184   :  { %2995 = vmatprep.subr.bf16.mxu0 %v6123_v11  ;;  %v497_v11 = vld [vmem:[#allocation2 + $0xab0] sm:$0xff] }
 0x185   :  { %6248 = vmatmul.mubr.msk.bf16.vlgmr.msra.gmra.mxu1 %vm2549_vm0, %v7436_v43  ;;  %v6194_v24 = vcombine.low %v493_v10, %v497_v11 }
 0x186   :  { %3070 = vmatpush1.bf16.msra.mxu1 %v5916_v17  ;;  %3101 = vmatprep.mubr.bf16.mxu1 %v7390_v58  ;;  %v6219_v58 = vcombine.high %v517_v45, %v521_v46  ;;  %v5861_v17 = vcombine.high %v158_v12, %v162_v13  ;;  %v262_v45 = vld [vmem:[#allocation2 + $0x358] sm:$0xff]  ;;  %v6029_v13 = vcombine.high %v326_v1, %v330_v2 }
 0x187   :  { %2996 = vmatpush1.bf16.msra.mxu0 %v6122_v16  ;;  %3071 = vmatprep.subr.bf16.mxu1 %v5909_v19  ;;  %v6195_v16 = vcombine.high %v493_v10, %v497_v11  ;;  %v489_v19 = vld [vmem:[#allocation2 + $0xa70] sm:$0xff]  ;;  %v266_v46 = vld [vmem:[#allocation2 + $0x378] sm:$0xff]  ;;  %v5956_v11 = vcombine.low %v254_v54, %v258_v55 }
 0x188   :  { %2997 = vmatprep.subr.bf16.mxu0 %v6115_v18  ;;  %v485_v18 = vld [vmem:[#allocation2 + $0xa50] sm:$0xff]  ;;  %v294_v54 = vld [vmem:[#allocation2 + $0x458] sm:$0xff] }
 0x189   :  { %v6186_v36 = vcombine.low %v485_v18, %v489_v19  ;;  %v298_v55 = vld [vmem:[#allocation2 + $0x478] sm:$0xff] }
 0x18a   :  { %3072 = vmatpush1.bf16.msra.mxu1 %v5908_v27  ;;  %v5981_v27 = vcombine.high %v278_v21, %v282_v22 }
 0x18b   :  { %2998 = vmatpush1.bf16.msra.mxu0 %v6114_v26  ;;  %3073 = vmatprep.subr.bf16.mxu1 %v5901_v30  ;;  %v6187_v26 = vcombine.high %v485_v18, %v489_v19  ;;  %v481_v30 = vld [vmem:[#allocation2 + $0xa30] sm:$0xff]  ;;  %v238_v19 = vld [vmem:[#allocation2 + $0x298] sm:$0xff] }
 0x18c   :  { %2999 = vmatprep.subr.bf16.mxu0 %v6235_v28  ;;  %v477_v28 = vld [vmem:[#allocation2 + $0xa10] sm:$0xff] }
 0x18d   :  { %v6178_v47 = vcombine.low %v477_v28, %v481_v30 }
 0x18e   :  { %3074 = vmatpush1.bf16.msra.mxu1 %v5900_v41  ;;  %v5973_v41 = vcombine.high %v270_v31, %v274_v35 }
 0x18f   :  { %3000 = vmatpush2.bf16.msra.mxu0 %v6234_v38  ;;  %3075 = vmatprep.subr.bf16.mxu1 %v5893_v44  ;;  %v6179_v38 = vcombine.high %v477_v28, %v481_v30  ;;  %v346_v44 = vld [vmem:[#allocation2 + $0x5f8] sm:$0xff] }
 0x190   :  { %3001 = vmatprep.subr.bf16.mxu0 %v6227_v42  ;;  %v342_v42 = vld [vmem:[#allocation2 + $0x5d8] sm:$0xff] }
 0x191   :  { %v6044_v56 = vcombine.low %v342_v42, %v346_v44  ;;  %v310_v28 = vld [vmem:[#allocation2 + $0x4d8] sm:$0xff] }
 0x192   :  { %3076 = vmatpush1.bf16.msra.mxu1 %v5892_v51  ;;  %v6045_v51 = vcombine.high %v342_v42, %v346_v44  ;;  %v314_v30 = vld [vmem:[#allocation2 + $0x4f8] sm:$0xff] }
 0x193   :  { %3002 = vmatpush2.bf16.msra.mxu0 %v6226_v50  ;;  %3077 = vmatprep.subr.bf16.mxu1 %v5885_v52  ;;  %v5972_v50 = vcombine.low %v270_v31, %v274_v35  ;;  %v334_v52 = vld [vmem:[#allocation2 + $0x598] sm:$0xff] }
 0x194   :  { %3003 = vmatprep.subr.bf16.mxu0 %v6219_v58  ;;  %v5965_v58 = vcombine.high %v262_v45, %v266_v46  ;;  %v230_v31 = vld [vmem:[#allocation2 + $0x258] sm:$0xff] }
 0x195   :  { %v234_v35 = vld [vmem:[#allocation2 + $0x278] sm:$0xff] }
 0x196   :  { %3078 = vmatpush1.bf16.msra.mxu1 %v5884_v60  ;;  %v2716_v60 = vpop.f32.mrf.mxu1  ;;  %v5933_v44 = vcombine.high %v230_v31, %v234_v35 }
 0x197   :  { %3004 = vmatpush2.bf16.msra.mxu0 %v6218_v57  ;;  %3079 = vmatprep.subr.bf16.mxu1 %v5877_v62  ;;  %v7486_v57 = vpop.f32.mrf.mxu0  ;;  %v6037_v62 = vcombine.high %v334_v52, %v338_v53 }
 0x198   :  { %3005 = vmatprep.subr.bf16.mxu0 %v6211_v61  ;;  %v5964_v61 = vcombine.low %v262_v45, %v266_v46  ;;  %v7491_v10 = vpop.f32.mrf.mxu1  ;;  %v302_v45 = vld [vmem:[#allocation2 + $0x498] sm:$0xff] }
 0x199   :  { %v306_v46 = vld [vmem:[#allocation2 + $0x4b8] sm:$0xff] }
 0x19a   :  { %3080 = vmatpush1.bf16.msra.mxu1 %v5876_v6  ;;  %v250_v6 = vld [vmem:[#allocation2 + $0x2f8] sm:$0xff]  ;;  %v2720_v22 = vpop.f32.mrf.mxu1 }
 0x19b   :  { %3006 = vmatpush2.bf16.msra.mxu0 %v6210_v4  ;;  %3081 = vmatprep.subr.bf16.mxu1 %v5869_v9  ;;  %v246_v4 = vld [vmem:[#allocation2 + $0x2d8] sm:$0xff]  ;;  %v6036_v9 = vcombine.low %v334_v52, %v338_v53  ;;  %v6005_v52 = vcombine.high %v302_v45, %v306_v46 }
 0x19c   :  { %3007 = vmatprep.subr.bf16.mxu0 %v6203_v8 }
 0x19e   :  { %3082 = vmatpush1.bf16.msra.mxu1 %v5868_v15  ;;  %v5949_v15 = vcombine.high %v246_v4, %v250_v6 }
 0x19f   :  { %3008 = vmatpush2.bf16.msra.mxu0 %v6202_v14  ;;  %3083 = vmatprep.subr.bf16.mxu1 %v5861_v17  ;;  %v322_v17 = vld [vmem:[#allocation2 + $0x538] sm:$0xff] }
 0x1a0   :  { %3009 = vmatprep.subr.bf16.mxu0 %v6195_v16  ;;  %v318_v16 = vld [vmem:[#allocation2 + $0x518] sm:$0xff] }
 0x1a2   :  { %3084 = vmatpush1.bf16.msra.mxu1 %v5860_v25  ;;  %v6021_v25 = vcombine.high %v318_v16, %v322_v17 }
 0x1a3   :  { %3010 = vmatpush2.bf16.msra.mxu0 %v6194_v24  ;;  %3085 = vmatprep.subr.bf16.mxu1 %v5981_v27  ;;  %v5948_v24 = vcombine.low %v246_v4, %v250_v6  ;;  %v462_v4 = vld [vmem:[#allocation2 + $0x998] sm:$0xff] }
 0x1a4   :  { %3011 = vmatprep.subr.bf16.mxu0 %v6187_v26  ;;  %v466_v6 = vld [vmem:[#allocation2 + $0x9b8] sm:$0xff] }
 0x1a6   :  { %3086 = vmatpush2.bf16.msra.mxu1 %v5980_v37 }
 0x1a7   :  { %3012 = vmatpush2.bf16.msra.mxu0 %v6186_v36  ;;  %3087 = vmatprep.subr.bf16.mxu1 %v5973_v41  ;;  %v6013_v41 = vcombine.high %v310_v28, %v314_v30 }
 0x1a8   :  { %3013 = vmatprep.subr.bf16.mxu0 %v6179_v38  ;;  %v6020_v38 = vcombine.low %v318_v16, %v322_v17  ;;  %v454_v16 = vld [vmem:[#allocation2 + $0x958] sm:$0xff] }
 0x1a9   :  { %v458_v17 = vld [vmem:[#allocation2 + $0x978] sm:$0xff] }
 0x1aa   :  { %3088 = vmatpush2.bf16.msra.mxu1 %v5972_v50  ;;  %v226_v50 = vld [vmem:[#allocation2 + $0x238] sm:$0xff] }
 0x1ab   :  { %3014 = vmatpush2.bf16.msra.mxu0 %v6178_v47  ;;  %3089 = vmatprep.subr.bf16.mxu1 %v5965_v58  ;;  %v222_v47 = vld [vmem:[#allocation2 + $0x218] sm:$0xff]  ;;  %v5932_v58 = vcombine.low %v230_v31, %v234_v35 }
 0x1ac   :  { %3112 = vmatprep.subr.bf16.mxu0 %v6045_v51  ;;  %v6012_v51 = vcombine.low %v310_v28, %v314_v30  ;;  %v5925_v53 = vcombine.high %v222_v47, %v226_v50  ;;  %v390_v30 = vld [vmem:[#allocation2 + $0x758] sm:$0xff] }
 0x1ad   :  { %v394_v31 = vld [vmem:[#allocation2 + $0x778] sm:$0xff] }
 0x1ae   :  { %v2673_v3 = vpop.f32.mrf.mxu0  ;;  %3016 = vmatmul.mubr.bf16.vlgmr.msra.gmra.mxu0 %v7447_v40  ;;  %3090 = vmatpush2.bf16.msra.mxu1 %v5964_v61  ;;  %v6004_v61 = vcombine.low %v302_v45, %v306_v46  ;;  %v438_v35 = vld [vmem:[#allocation2 + $0x8d8] sm:$0xff] }
 0x1af   :  { %v2674_v8 = vadd.f32 %v2673_v3, %v7473_v33  ;;  %3113 = vmatpush1.bf16.msra.mxu0 %v6044_v56  ;;  %3144 = vmatprep.mubr.bf16.mxu0 %v7398_v63  ;;  %v242_v33 = vld [vmem:[#allocation2 + $0x2b8] sm:$0xff]  ;;  %v6028_v63 = vcombine.low %v326_v1, %v330_v2 }
 0x1b0   :  { %v7493_v12 = vpop.f32.mrf.mxu0  ;;  %3114 = vmatprep.subr.bf16.mxu0 %v6037_v62  ;;  %3091 = vmatprep.subr.bf16.mxu1 %v5957_v0  ;;  %v5941_v27 = vcombine.high %v238_v19, %v242_v33  ;;  %v470_v56 = vld [vmem:[#allocation2 + $0x9d8] sm:$0xff]  ;;  %v5924_v62 = vcombine.low %v222_v47, %v226_v50  ;;  %v5997_v0 = vcombine.high %v294_v54, %v298_v55 }
 0x1b1   :  { %v2717_v14 = vadd.f32 %v2716_v60, %v2674_v8  ;;  %v474_v60 = vld [vmem:[#allocation2 + $0x9f8] sm:$0xff]  ;;  %v5996_v8 = vcombine.low %v294_v54, %v298_v55  ;;  %v6092_v47 = vcombine.low %v390_v30, %v394_v31 }
 0x1b2   :  { %v2677_v18 = vpop.f32.mrf.mxu0  ;;  %3092 = vmatpush2.bf16.msra.mxu1 %v5956_v11  ;;  %v6173_v1 = vcombine.high %v470_v56, %v474_v60  ;;  %v286_v2 = vld [vmem:[#allocation2 + $0x418] sm:$0xff] }
 0x1b3   :  { %v2678_v21 = vadd.f32 %v2677_v18, %v7477_v49  ;;  %3115 = vmatpush1.bf16.msra.mxu0 %v6036_v9  ;;  %3093 = vmatprep.subr.bf16.mxu1 %v5949_v15  ;;  %v3241_v36 = vmax.f32 %v2717_v14, 0.0  ;;  %v5940_v49 = vcombine.low %v238_v19, %v242_v33  ;;  %v290_v3 = vld [vmem:[#allocation2 + $0x438] sm:$0xff]  ;;  %v6172_v9 = vcombine.low %v470_v56, %v474_v60 }
 0x1b4   :  { %3116 = vmatprep.subr.bf16.mxu0 %v6029_v13  ;;  %v5989_v11 = vcombine.high %v286_v2, %v290_v3  ;;  %v6165_v13 = vcombine.high %v462_v4, %v466_v6  ;;  %v406_v14 = vld [vmem:[#allocation2 + $0x7d8] sm:$0xff]  ;;  %v5988_v18 = vcombine.low %v286_v2, %v290_v3  ;;  %v6164_v19 = vcombine.low %v462_v4, %v466_v6 }
 0x1b5   :  { %v2721_v26 = vadd.f32 %v2720_v22, %v2678_v21  ;;  %v410_v15 = vld [vmem:[#allocation2 + $0x7f8] sm:$0xff]  ;;  %v6157_v21 = vcombine.high %v454_v16, %v458_v17 }
 0x1b6   :  { %3094 = vmatpush2.bf16.msra.mxu1 %v5948_v24  ;;  %v6109_v33 = vcombine.high %v406_v14, %v410_v15  ;;  %v402_v22 = vld [vmem:[#allocation2 + $0x7b8] sm:$0xff] }
 0x1b7   :  { %v3249_v37 = vmax.f32 %v2721_v26, 0.0  ;;  %3117 = vmatpush1.bf16.msra.mxu0 %v6028_v63  ;;  %3095 = vmatprep.subr.bf16.mxu1 %v5941_v27  ;;  %v398_v63 = vld [vmem:[#allocation2 + $0x798] sm:$0xff]  ;;  %v6108_v26 = vcombine.low %v406_v14, %v410_v15  ;;  %v6156_v27 = vcombine.low %v454_v16, %v458_v17 }
 0x1b8   :  { %3118 = vmatprep.subr.bf16.mxu0 %v6021_v25  ;;  %v446_v24 = vld [vmem:[#allocation2 + $0x918] sm:$0xff] }
 0x1b9   :  { %v7496_v42 = vpack.c.bf16 %v3249_v37, %v3241_v36  ;;  %v450_v25 = vld [vmem:[#allocation2 + $0x938] sm:$0xff]  ;;  %v6100_v37 = vcombine.low %v398_v63, %v402_v22 }
 0x1ba   :  { %3096 = vmatpush2.bf16.msra.mxu1 %v5940_v49  ;;  %v6149_v28 = vcombine.high %v446_v24, %v450_v25  ;;  %v442_v36 = vld [vmem:[#allocation2 + $0x8f8] sm:$0xff] }
 0x1bb   :  { %3119 = vmatpush1.bf16.msra.mxu0 %v6020_v38  ;;  %3097 = vmatprep.subr.bf16.mxu1 %v5933_v44  ;;  %v6148_v38 = vcombine.low %v446_v24, %v450_v25  ;;  %v6141_v49 = vcombine.high %v438_v35, %v442_v36  ;;  %v386_v44 = vld [vmem:[#allocation2 + $0x738] sm:$0xff]  ;;  %v6140_v50 = vcombine.low %v438_v35, %v442_v36 }
 0x1bc   :  { %3120 = vmatprep.subr.bf16.mxu0 %v6013_v41  ;;  %v382_v41 = vld [vmem:[#allocation2 + $0x718] sm:$0xff] }
 0x1bd   :  { %v430_v45 = vld [vmem:[#allocation2 + $0x898] sm:$0xff]  ;;  %v6084_v60 = vcombine.low %v382_v41, %v386_v44 }
 0x1be   :  { %3098 = vmatpush2.bf16.msra.mxu1 %v5932_v58  ;;  %v434_v46 = vld [vmem:[#allocation2 + $0x8b8] sm:$0xff]  ;;  %v7501_v58 = vsub.s32 1, %v7460_v59 }
 0x1bf   :  { %3121 = vmatpush1.bf16.msra.mxu0 %v6012_v51  ;;  %3099 = vmatprep.subr.bf16.mxu1 %v5925_v53  ;;  %v6085_v51 = vcombine.high %v382_v41, %v386_v44  ;;  %v374_v53 = vld [vmem:[#allocation2 + $0x6d8] sm:$0xff] }
 0x1c0   :  { %3122 = vmatprep.subr.bf16.mxu0 %v6005_v52  ;;  %v6133_v52 = vcombine.high %v430_v45, %v434_v46  ;;  %v378_v54 = vld [vmem:[#allocation2 + $0x6f8] sm:$0xff] }
 0x1c1   :  { %v422_v55 = vld [vmem:[#allocation2 + $0x858] sm:$0xff] }
 0x1c2   :  { %3100 = vmatpush2.bf16.msra.mxu1 %v5924_v62  ;;  %v426_v56 = vld [vmem:[#allocation2 + $0x878] sm:$0xff]  ;;  %v6077_v62 = vcombine.high %v374_v53, %v378_v54 }
 0x1c3   :  { %3123 = vmatpush1.bf16.msra.mxu0 %v6004_v61  ;;  %3155 = vmatprep.subr.bf16.mxu1 %v6173_v1  ;;  %v6132_v61 = vcombine.low %v430_v45, %v434_v46  ;;  %v6125_v1 = vcombine.high %v422_v55, %v426_v56  ;;  %v366_v2 = vld [vmem:[#allocation2 + $0x698] sm:$0xff] }
 0x1c4   :  { %3124 = vmatprep.subr.bf16.mxu0 %v5997_v0  ;;  %v556_v0 = vrot.slane %v7465_v7, %v7501_v58  ;;  %v370_v3 = vld [vmem:[#allocation2 + $0x6b8] sm:$0xff] }
 0x1c5   :  { %3102 = vmatmul.mubr.bf16.vlgmr.msra.gmra.mxu1 %v7414_v20  ;;  %v6101_v20 = vcombine.high %v398_v63, %v402_v22  ;;  %v414_v4 = vld [vmem:[#allocation2 + $0x818] sm:$0xff]  ;;  %v6068_v63 = vcombine.low %v366_v2, %v370_v3 }
 0x1c6   :  { %3156 = vmatpush1.bf16.msra.mxu1 %v6172_v9  ;;  %3187 = vmatprep.mubr.bf16.mxu1 %v7425_v32  ;;  %v6093_v32 = vcombine.high %v390_v30, %v394_v31  ;;  %v418_v6 = vld [vmem:[#allocation2 + $0x838] sm:$0xff]  ;;  %v6076_v9 = vcombine.low %v374_v53, %v378_v54  ;;  %v2590_v14 = vadd.f32 %v7471_v29, %v556_v0 }
 0x1c7   :  { %3125 = vmatpush1.bf16.msra.mxu0 %v5996_v8  ;;  %3157 = vmatprep.subr.bf16.mxu1 %v6165_v13  ;;  %v2594_v8 = vadd.f32 %v7486_v57, %v556_v0  ;;  %v6069_v13 = vcombine.high %v366_v2, %v370_v3  ;;  %v6117_v15 = vcombine.high %v414_v4, %v418_v6  ;;  %v358_v16 = vld [vmem:[#allocation2 + $0x658] sm:$0xff] }
 0x1c8   :  { %3126 = vmatprep.subr.bf16.mxu0 %v5989_v11  ;;  %v6124_v11 = vcombine.low %v422_v55, %v426_v56  ;;  %v362_v17 = vld [vmem:[#allocation2 + $0x678] sm:$0xff]  ;;  %v6116_v57 = vcombine.low %v414_v4, %v418_v6  ;;  %v2633_v24 = vadd.f32 %v7475_v34, %v2590_v14 }
 0x1c9   :  { %v6061_v22 = vcombine.high %v358_v16, %v362_v17  ;;  %v6060_v31 = vcombine.low %v358_v16, %v362_v17  ;;  %v522_v41 = vld [vmem:[#allocation2 + $0xb78] sm:$0xff] }
 0x1ca   :  { %3158 = vmatpush1.bf16.msra.mxu1 %v6164_v19  ;;  %v534_v19 = vld [vmem:[#allocation2 + $0xbd8] sm:$0xff]  ;;  %v2676_v30 = vadd.f32 %v7493_v12, %v2633_v24 }
 0x1cb   :  { %3127 = vmatpush1.bf16.msra.mxu0 %v5988_v18  ;;  %3159 = vmatprep.subr.bf16.mxu1 %v6157_v21  ;;  %v2679_v18 = vpop.f32.mrf.mxu0  ;;  %v2637_v21 = vadd.f32 %v7484_v48, %v2594_v8  ;;  %v2722_v48 = vpop.f32.mrf.mxu1  ;;  %v6628_v46 = vld [vmem:[#allocation6 + $0xe4] ss:$16 sps:$4 sm:$0xff]   ;;  %v6629_v8 = vld [vmem:[#allocation6 + $0xc0] ss:$16 sps:$4 sm:$0xff]  }
 0x1cc   :  { %3128 = vmatprep.subr.bf16.mxu0 %v6109_v33  ;;  %v538_v33 = vld [vmem:[#allocation2 + $0xbf8] sm:$0xff]  ;;  %v2719_v44 = vadd.f32 %v7491_v10, %v2676_v30 }
 0x1cd   :  { %v2680_v25 = vadd.f32 %v2679_v18, %v2637_v21  ;;  %v6237_v29 = vcombine.high %v534_v19, %v538_v33  ;;  %v6236_v35 = vcombine.low %v534_v19, %v538_v33  ;;  %v510_v53 = vld [vmem:[#allocation2 + $0xb18] sm:$0xff] }
 0x1ce   :  { %3160 = vmatpush1.bf16.msra.mxu1 %v6156_v27  ;;  %v354_v27 = vld [vmem:[#allocation2 + $0x638] sm:$0xff]  ;;  %v3242_v55 = vmax.f32 %v2719_v44, 0.0 }
 0x1cf   :  { %3129 = vmatpush2.bf16.msra.mxu0 %v6108_v26  ;;  %3161 = vmatprep.subr.bf16.mxu1 %v6149_v28  ;;  %v350_v26 = vld [vmem:[#allocation2 + $0x618] sm:$0xff] }
 0x1d0   :  { %3130 = vmatprep.subr.bf16.mxu0 %v6101_v20  ;;  %v526_v20 = vld [vmem:[#allocation2 + $0xb98] sm:$0xff]  ;;  %v6053_v36 = vcombine.high %v350_v26, %v354_v27  ;;  %v6052_v45 = vcombine.low %v350_v26, %v354_v27 }
 0x1d1   :  { %v530_v28 = vld [vmem:[#allocation2 + $0xbb8] sm:$0xff] }
 0x1d2   :  { %3162 = vmatpush1.bf16.msra.mxu1 %v6148_v38  ;;  %v559_v38 = vsub.s32 2, %v7460_v59  ;;  %v6229_v34 = vcombine.high %v526_v20, %v530_v28  ;;  %v6228_v12 = vcombine.low %v526_v20, %v530_v28  ;;  %v514_v54 = vld [vmem:[#allocation2 + $0xb38] sm:$0xff] }
 0x1d3   :  { %3131 = vmatpush2.bf16.msra.mxu0 %v6100_v37  ;;  %3163 = vmatprep.subr.bf16.mxu1 %v6141_v49  ;;  %v2723_v37 = vadd.f32 %v2722_v48, %v2680_v25  ;;  %v518_v49 = vld [vmem:[#allocation2 + $0xb58] sm:$0xff] }
 0x1d4   :  { %3132 = vmatprep.subr.bf16.mxu0 %v6093_v32  ;;  %v2759_v32 = vpop.f32.mrf.mxu1  ;;  %v6626_v10 = vld [vmem:[#allocation6 + $0xe0] ss:$16 sps:$4 sm:$0xff]   ;;  %v6220_v56 = vcombine.low %v518_v49, %v522_v41  ;;  %v6637_v21 = vld [vmem:[#allocation6 + $0x84] ss:$16 sps:$4 sm:$0xff]  }
 0x1d5   :  { %v502_v3 = vld [vmem:[#allocation2 + $0xad8] sm:$0xff] }
 0x1d6   :  { %3164 = vmatpush1.bf16.msra.mxu1 %v6140_v50  ;;  %v560_v50 = vrot.slane %v7465_v7, %v559_v38  ;;  %v506_v4 = vld [vmem:[#allocation2 + $0xaf8] sm:$0xff] }
 0x1d7   :  { %3133 = vmatpush2.bf16.msra.mxu0 %v6092_v47  ;;  %3165 = vmatprep.subr.bf16.mxu1 %v6133_v52  ;;  %v3250_v47 = vmax.f32 %v2723_v37, 0.0  ;;  %v7515_v52 = vpop.f32.mrf.mxu1  ;;  %v494_v17 = vld [vmem:[#allocation2 + $0xa98] sm:$0xff]  ;;  %v6204_v33 = vcombine.low %v502_v3, %v506_v4 }
 0x1d8   :  { %3134 = vmatprep.subr.bf16.mxu0 %v6085_v51  ;;  %v6221_v51 = vcombine.high %v518_v49, %v522_v41  ;;  %v498_v18 = vld [vmem:[#allocation2 + $0xab8] sm:$0xff] }
 0x1d9   :  { %v7517_v0 = vpack.c.bf16 %v3250_v47, %v3242_v55  ;;  %v6632_v19 = vld [vmem:[#allocation6 + $0xa0] ss:$16 sps:$4 sm:$0xff]   ;;  %v6196_v27 = vcombine.low %v494_v17, %v498_v18  ;;  %v6640_v20 = vld [vmem:[#allocation6 + $0x64] ss:$16 sps:$4 sm:$0xff]  }
 0x1da   :  { %3166 = vmatpush1.bf16.msra.mxu1 %v6132_v61  ;;  %v2760_v61 = vadd.f32 %v2759_v32, %v560_v50  ;;  %v490_v24 = vld [vmem:[#allocation2 + $0xa78] sm:$0xff] }
 0x1db   :  { %3135 = vmatpush2.bf16.msra.mxu0 %v6084_v60  ;;  %3167 = vmatprep.subr.bf16.mxu1 %v6125_v1  ;;  %v6631_v60 = vld [vmem:[#allocation6 + $0xc4] ss:$16 sps:$4 sm:$0xff]   ;;  %v2763_v1 = vpop.f32.mrf.mxu1  ;;  %v6638_v37 = vld [vmem:[#allocation6 + $0x60] ss:$16 sps:$4 sm:$0xff]  }
 0x1dc   :  { %3136 = vmatprep.subr.bf16.mxu0 %v6077_v62  ;;  %v6213_v62 = vcombine.high %v510_v53, %v514_v54  ;;  %v2764_v14 = vadd.f32 %v2763_v1, %v560_v50  ;;  %v478_v48 = vld [vmem:[#allocation2 + $0xa18] sm:$0xff] }
 0x1dd   :  { %v6643_v49 = vld [vmem:[#allocation6 + $0x44] ss:$16 sps:$4 sm:$0xff]  }
 0x1de   :  { %3168 = vmatpush1.bf16.msra.mxu1 %v6124_v11 }
 0x1df   :  { %3137 = vmatpush2.bf16.msra.mxu0 %v6076_v9  ;;  %3169 = vmatprep.subr.bf16.mxu1 %v6117_v15  ;;  %v6212_v9 = vcombine.low %v510_v53, %v514_v54  ;;  %v6205_v15 = vcombine.high %v502_v3, %v506_v4 }
 0x1e0   :  { %3138 = vmatprep.subr.bf16.mxu0 %v6069_v13  ;;  %v6634_v13 = vld [vmem:[#allocation6 + $0xa4] ss:$16 sps:$4 sm:$0xff]  }
 0x1e2   :  { %3170 = vmatpush1.bf16.msra.mxu1 %v6116_v57  ;;  %v6197_v57 = vcombine.high %v494_v17, %v498_v18 }
 0x1e3   :  { %3139 = vmatpush2.bf16.msra.mxu0 %v6068_v63  ;;  %3171 = vmatprep.subr.bf16.mxu1 %v6237_v29  ;;  %v2765_v63 = vpop.f32.mrf.mxu1  ;;  %v6635_v29 = vld [vmem:[#allocation6 + $0x80] ss:$16 sps:$4 sm:$0xff]  }
 0x1e4   :  { %3140 = vmatprep.subr.bf16.mxu0 %v6061_v22  ;;  %v486_v22 = vld [vmem:[#allocation2 + $0xa58] sm:$0xff] }
 0x1e5   :  { %v6189_v30 = vcombine.high %v486_v22, %v490_v24  ;;  %v6188_v32 = vcombine.low %v486_v22, %v490_v24  ;;  %v6661_v22 = vld [vmem:[#allocation6 + $0x1c4] ss:$16 sps:$4 sm:$0xff]   ;;  %v6659_v24 = vld [vmem:[#allocation6 + $0x1c0] ss:$16 sps:$4 sm:$0xff]  }
 0x1e6   :  { %3172 = vmatpush2.bf16.msra.mxu1 %v6236_v35  ;;  %v482_v35 = vld [vmem:[#allocation2 + $0xa38] sm:$0xff] }
 0x1e7   :  { %3141 = vmatpush2.bf16.msra.mxu0 %v6060_v31  ;;  %3173 = vmatprep.subr.bf16.mxu1 %v6229_v34  ;;  %v563_v31 = vsub.s32 3, %v7460_v59  ;;  %v6181_v44 = vcombine.high %v478_v48, %v482_v35  ;;  %v6180_v55 = vcombine.low %v478_v48, %v482_v35  ;;  %v6679_v48 = vld [vmem:[#allocation6 + $0x164] ss:$16 sps:$4 sm:$0xff]  }
 0x1e8   :  { %3142 = vmatprep.subr.bf16.mxu0 %v6053_v36  ;;  %v6676_v35 = vld [vmem:[#allocation6 + $0x264] ss:$16 sps:$4 sm:$0xff]  }
 0x1ea   :  { %3174 = vmatpush2.bf16.msra.mxu1 %v6228_v12  ;;  %v542_v12 = vld [vmem:[#allocation2 + $0xc18] sm:$0xff] }
 0x1eb   :  { %3143 = vmatpush2.bf16.msra.mxu0 %v6052_v45  ;;  %3175 = vmatprep.subr.bf16.mxu1 %v6221_v51  ;;  %v564_v45 = vrot.slane %v7465_v7, %v563_v31  ;;  %v6641_v51 = vld [vmem:[#allocation6 + $0x40] ss:$16 sps:$4 sm:$0xff]  }
 0x1ec   :  { %4823 = vmatprep.subr.bf16.mxu0 %v6628_v46  ;;  %v546_v46 = vld [vmem:[#allocation2 + $0xc38] sm:$0xff] }
 0x1ed   :  { %v2766_v53 = vadd.f32 %v2765_v63, %v564_v45  ;;  %v6244_v7 = vcombine.low %v542_v12, %v546_v46  ;;  %v6650_v63 = vld [vmem:[#allocation6 + $0x2e0] ss:$16 sps:$4 sm:$0xff]  }
 0x1ee   :  { %v2802_v2 = vpop.f32.mrf.mxu0  ;;  %3145 = vmatmul.mubr.bf16.vlgmr.msra.gmra.mxu0 %v7416_v23  ;;  %3176 = vmatpush2.bf16.msra.mxu1 %v6220_v56 }
 0x1ef   :  { %v2803_v6 = vadd.f32 %v2802_v2, %v2760_v61  ;;  %4824 = vmatpush1.bf16.msra.mxu0 %v6626_v10  ;;  %4855 = vmatprep.mubr.bf16.mxu0 %v7517_v0  ;;  %v6646_v10 = vld [vmem:[#allocation6 + $0x24] ss:$16 sps:$4 sm:$0xff]   ;;  %v2762_v61 = vadd.f32 %v7515_v52, %v564_v45  ;;  %v6644_v2 = vld [vmem:[#allocation6 + $0x20] ss:$16 sps:$4 sm:$0xff]  }
 0x1f0   :  { %v7521_v11 = vpop.f32.mrf.mxu0  ;;  %4825 = vmatprep.subr.bf16.mxu0 %v6631_v60  ;;  %3177 = vmatprep.subr.bf16.mxu1 %v6213_v62  ;;  %v6245_v60 = vcombine.high %v542_v12, %v546_v46  ;;  %v6647_v52 = vld [vmem:[#allocation6] ss:$16 sps:$4 sm:$0xff]   ;;  %v6688_v45 = vld [vmem:[#allocation6 + $0x224] ss:$16 sps:$4 sm:$0xff]  }
 0x1f1   :  { %v2805_v3 = vadd.f32 %v7521_v11, %v2762_v61  ;;  %v6655_v11 = vld [vmem:[#allocation6 + $0x1e4] ss:$16 sps:$4 sm:$0xff]   ;;  %v6689_v12 = vld [vmem:[#allocation6 + $0x120] ss:$16 sps:$4 sm:$0xff]  }
 0x1f2   :  { %v2806_v16 = vpop.f32.mrf.mxu0  ;;  %3178 = vmatpush2.bf16.msra.mxu1 %v6212_v9  ;;  %v6649_v9 = vld [vmem:[#allocation6 + $0x4] ss:$16 sps:$4 sm:$0xff]   ;;  %v6686_v46 = vld [vmem:[#allocation6 + $0x220] ss:$16 sps:$4 sm:$0xff]  }
 0x1f3   :  { %v2807_v23 = vadd.f32 %v2806_v16, %v2764_v14  ;;  %4826 = vmatpush1.bf16.msra.mxu0 %v6629_v8  ;;  %3179 = vmatprep.subr.bf16.mxu1 %v6205_v15  ;;  %v6703_v61 = vld [vmem:[#allocation6 + $0x3c4] ss:$16 sps:$4 sm:$0xff]  }
 0x1f4   :  { %4827 = vmatprep.subr.bf16.mxu0 %v6634_v13  ;;  %v2808_v47 = vpop.f32.mrf.mxu0  ;;  %v6652_v13 = vld [vmem:[#allocation6 + $0x2e4] ss:$16 sps:$4 sm:$0xff]  }
 0x1f5   :  { %v2845_v25 = vpop.f32.mrf.mxu1  ;;  %v2809_v62 = vadd.f32 %v2808_v47, %v2766_v53  ;;  %v6697_v47 = vld [vmem:[#allocation6 + $0x104] ss:$16 sps:$4 sm:$0xff]   ;;  %v6692_v53 = vld [vmem:[#allocation6 + $0x200] ss:$16 sps:$4 sm:$0xff]  }
 0x1f6   :  { %3180 = vmatpush2.bf16.msra.mxu1 %v6204_v33  ;;  %v2846_v26 = vadd.f32 %v2845_v25, %v2803_v6  ;;  %v6653_v33 = vld [vmem:[#allocation6 + $0x1e0] ss:$16 sps:$4 sm:$0xff]   ;;  %v6667_v25 = vld [vmem:[#allocation6 + $0x1a4] ss:$16 sps:$4 sm:$0xff]  }
 0x1f7   :  { %4828 = vmatpush1.bf16.msra.mxu0 %v6632_v19  ;;  %v2847_v28 = vpop.f32.mrf.mxu1  ;;  %3181 = vmatprep.subr.bf16.mxu1 %v6197_v57  ;;  %v6658_v57 = vld [vmem:[#allocation6 + $0x2c4] ss:$16 sps:$4 sm:$0xff]  }
 0x1f8   :  { %4829 = vmatprep.subr.bf16.mxu0 %v6637_v21  ;;  %v2848_v14 = vadd.f32 %v2847_v28, %v2805_v3  ;;  %v6670_v28 = vld [vmem:[#allocation6 + $0x284] ss:$16 sps:$4 sm:$0xff]   ;;  %v6725_v3 = vld [vmem:[#allocation6 + $0x4a0] ss:$16 sps:$4 sm:$0xff]  }
 0x1f9   :  { %v2849_v36 = vpop.f32.mrf.mxu1 }
 0x1fa   :  { %3182 = vmatpush2.bf16.msra.mxu1 %v6196_v27  ;;  %v2850_v34 = vadd.f32 %v2849_v36, %v2807_v23  ;;  %v6662_v27 = vld [vmem:[#allocation6 + $0x2a0] ss:$16 sps:$4 sm:$0xff]  }
 0x1fb   :  { %4830 = vmatpush1.bf16.msra.mxu0 %v6635_v29  ;;  %v2851_v41 = vpop.f32.mrf.mxu1  ;;  %3183 = vmatprep.subr.bf16.mxu1 %v6189_v30  ;;  %v6664_v29 = vld [vmem:[#allocation6 + $0x2a4] ss:$16 sps:$4 sm:$0xff]   ;;  %v6668_v30 = vld [vmem:[#allocation6 + $0x280] ss:$16 sps:$4 sm:$0xff]  }
 0x1fc   :  { %4831 = vmatprep.subr.bf16.mxu0 %v6640_v20  ;;  %v2852_v4 = vadd.f32 %v2851_v41, %v2809_v62  ;;  %v6673_v20 = vld [vmem:[#allocation6 + $0x184] ss:$16 sps:$4 sm:$0xff]   ;;  %v6677_v36 = vld [vmem:[#allocation6 + $0x160] ss:$16 sps:$4 sm:$0xff]  }
 0x1fd   :  { %v2888_v50 = vpop.f32.mrf.mxu1  ;;  %v6680_v41 = vld [vmem:[#allocation6 + $0x240] ss:$16 sps:$4 sm:$0xff]  }
 0x1fe   :  { %3184 = vmatpush2.bf16.msra.mxu1 %v6188_v32  ;;  %v2889_v54 = vadd.f32 %v2888_v50, %v2846_v26  ;;  %v6665_v26 = vld [vmem:[#allocation6 + $0x1a0] ss:$16 sps:$4 sm:$0xff]   ;;  %v6682_v32 = vld [vmem:[#allocation6 + $0x244] ss:$16 sps:$4 sm:$0xff]  }
 0x1ff   :  { %4832 = vmatpush1.bf16.msra.mxu0 %v6638_v37  ;;  %v2890_v56 = vpop.f32.mrf.mxu1  ;;  %3185 = vmatprep.subr.bf16.mxu1 %v6181_v44  ;;  %v6674_v37 = vld [vmem:[#allocation6 + $0x260] ss:$16 sps:$4 sm:$0xff]   ;;  %v6691_v44 = vld [vmem:[#allocation6 + $0x124] ss:$16 sps:$4 sm:$0xff]  }
 0x200   :  { %4833 = vmatprep.subr.bf16.mxu0 %v6643_v49  ;;  %v3243_v15 = vmax.f32 %v2889_v54, 0.0  ;;  %v2891_v18 = vadd.f32 %v2890_v56, %v2848_v14  ;;  %v6683_v49 = vld [vmem:[#allocation6 + $0x140] ss:$16 sps:$4 sm:$0xff]   ;;  %v6694_v50 = vld [vmem:[#allocation6 + $0x204] ss:$16 sps:$4 sm:$0xff]  }
 0x201   :  { %v2892_v1 = vpop.f32.mrf.mxu1  ;;  %v6715_v54 = vld [vmem:[#allocation6 + $0x4e4] ss:$16 sps:$4 sm:$0xff]   ;;  %v6698_v56 = vld [vmem:[#allocation6 + $0x3e0] ss:$16 sps:$4 sm:$0xff]  }
 0x202   :  { %3186 = vmatpush2.bf16.msra.mxu1 %v6180_v55  ;;  %v2893_v6 = vadd.f32 %v2892_v1, %v2850_v34  ;;  %v3244_v21 = vmax.f32 %v2891_v18, 0.0  ;;  %v6685_v34 = vld [vmem:[#allocation6 + $0x144] ss:$16 sps:$4 sm:$0xff]   ;;  %v6719_v62 = vld [vmem:[#allocation6 + $0x4c0] ss:$16 sps:$4 sm:$0xff]  }
 0x203   :  { %4834 = vmatpush1.bf16.msra.mxu0 %v6641_v51  ;;  %v2894_v8 = vpop.f32.mrf.mxu1  ;;  %3212 = vmatprep.subr.bf16.mxu1 %v6245_v60  ;;  %v6695_v51 = vld [vmem:[#allocation6 + $0x100] ss:$16 sps:$4 sm:$0xff]   ;;  %v6700_v55 = vld [vmem:[#allocation6 + $0x3e4] ss:$16 sps:$4 sm:$0xff]  }
 0x204   :  { %4835 = vmatprep.subr.bf16.mxu0 %v6646_v10  ;;  %v3251_v16 = vmax.f32 %v2893_v6, 0.0  ;;  %v2895_v17 = vadd.f32 %v2894_v8, %v2852_v4  ;;  %v6713_v10 = vld [vmem:[#allocation6 + $0x4e0] ss:$16 sps:$4 sm:$0xff]   ;;  %v6721_v60 = vld [vmem:[#allocation6 + $0x4c4] ss:$16 sps:$4 sm:$0xff]  }
 0x205   :  { %3188 = vmatmul.mubr.bf16.vlgmr.msra.gmra.mxu1 %v7447_v40  ;;  %v6701_v1 = vld [vmem:[#allocation6 + $0x3c0] ss:$16 sps:$4 sm:$0xff]   ;;  %v6733_v6 = vld [vmem:[#allocation6 + $0x484] ss:$16 sps:$4 sm:$0xff]  }
 0x206   :  { %v7530_v23 = vpack.c.bf16 %v3251_v16, %v3243_v15  ;;  %3213 = vmatpush1.bf16.msra.mxu1 %v6244_v7  ;;  %3230 = vmatprep.mubr.bf16.mxu1 %v7309_v39  ;;  %v3252_v19 = vmax.f32 %v2895_v17, 0.0  ;;  %v6656_v39 = vld [vmem:[#allocation6 + $0x2c0] ss:$16 sps:$4 sm:$0xff]   ;;  %v6727_v7 = vld [vmem:[#allocation6 + $0x4a4] ss:$16 sps:$4 sm:$0xff]  }
 0x207   :  { %4836 = vmatpush1.bf16.msra.mxu0 %v6644_v2  ;;  %4866 = vmatprep.subr.bf16.mxu1 %v6652_v13  ;;  %v6706_v2 = vld [vmem:[#allocation6 + $0x3a4] ss:$16 sps:$4 sm:$0xff]   ;;  %v6704_v4 = vld [vmem:[#allocation6 + $0x3a0] ss:$16 sps:$4 sm:$0xff]  }
 0x208   :  { %4837 = vmatprep.subr.bf16.mxu0 %v6649_v9  ;;  %v7533_v40 = vpack.c.bf16 %v3252_v19, %v3244_v21  ;;  %v6709_v8 = vld [vmem:[#allocation6 + $0x384] ss:$16 sps:$4 sm:$0xff]   ;;  %v6731_v9 = vld [vmem:[#allocation6 + $0x480] ss:$16 sps:$4 sm:$0xff]  }
 0x209   :  { %v6707_v13 = vld [vmem:[#allocation6 + $0x380] ss:$16 sps:$4 sm:$0xff]   ;;  %v6736_v14 = vld [vmem:[#allocation6 + $0x464] ss:$16 sps:$4 sm:$0xff]  }
 0x20a   :  { %v6712_v15 = vld [vmem:[#allocation6 + $0x364] ss:$16 sps:$4 sm:$0xff]   ;;  %v6734_v16 = vld [vmem:[#allocation6 + $0x460] ss:$16 sps:$4 sm:$0xff]  }
 0x20b   :  { %4838 = vmatpush1.bf16.msra.mxu0 %v6647_v52  ;;  %v6710_v17 = vld [vmem:[#allocation6 + $0x360] ss:$16 sps:$4 sm:$0xff]   ;;  %v6739_v52 = vld [vmem:[#allocation6 + $0x444] ss:$16 sps:$4 sm:$0xff]  }
 0x20c   :  { %4839 = vmatprep.subr.bf16.mxu0 %v6655_v11  ;;  %v6718_v18 = vld [vmem:[#allocation6 + $0x344] ss:$16 sps:$4 sm:$0xff]   ;;  %v6737_v11 = vld [vmem:[#allocation6 + $0x440] ss:$16 sps:$4 sm:$0xff]  }
 0x20d   :  { %6249 = vmatmul.mubr.msk.bf16.vlgmr.msra.gmra.mxu1 %vm2549_vm0, %v7436_v43  ;;  %v6671_v43 = vld [vmem:[#allocation6 + $0x180] ss:$16 sps:$4 sm:$0xff]   ;;  %v6724_v21 = vld [vmem:[#allocation6 + $0x324] ss:$16 sps:$4 sm:$0xff]  }
 0x20e   :  { %4867 = vmatpush1.bf16.msra.mxu1 %v6650_v63  ;;  %4898 = vmatprep.mubr.bf16.mxu1 %v7533_v40  ;;  %v6716_v19 = vld [vmem:[#allocation6 + $0x340] ss:$16 sps:$4 sm:$0xff]  }
 0x20f   :  { %4840 = vmatpush2.bf16.msra.mxu0 %v6653_v33  ;;  %4868 = vmatprep.subr.bf16.mxu1 %v6658_v57  ;;  %v6742_v33 = vld [vmem:[#allocation6 + $0x424] ss:$16 sps:$4 sm:$0xff]   ;;  %v6740_v63 = vld [vmem:[#allocation6 + $0x420] ss:$16 sps:$4 sm:$0xff]  }
 0x210   :  { %4841 = vmatprep.subr.bf16.mxu0 %v6661_v22  ;;  %v6722_v57 = vld [vmem:[#allocation6 + $0x320] ss:$16 sps:$4 sm:$0xff]   ;;  %v6745_v22 = vld [vmem:[#allocation6 + $0x404] ss:$16 sps:$4 sm:$0xff]  }
 0x212   :  { %4869 = vmatpush1.bf16.msra.mxu1 %v6656_v39  ;;  %v6743_v39 = vld [vmem:[#allocation6 + $0x400] ss:$16 sps:$4 sm:$0xff]  }
 0x213   :  { %4842 = vmatpush2.bf16.msra.mxu0 %v6659_v24  ;;  %4870 = vmatprep.subr.bf16.mxu1 %v6664_v29  ;;  %v6730_v24 = vld [vmem:[#allocation6 + $0x304] ss:$16 sps:$4 sm:$0xff]  }
 0x214   :  { %4843 = vmatprep.subr.bf16.mxu0 %v6667_v25  ;;  %v6728_v25 = vld [vmem:[#allocation6 + $0x300] ss:$16 sps:$4 sm:$0xff]   ;;  %v6748_v29 = vld [vmem:[#allocation6 + $0x5e4] ss:$16 sps:$4 sm:$0xff]  }
 0x216   :  { %4871 = vmatpush1.bf16.msra.mxu1 %v6662_v27  ;;  %v6746_v27 = vld [vmem:[#allocation6 + $0x5e0] ss:$16 sps:$4 sm:$0xff]  }
 0x217   :  { %4844 = vmatpush2.bf16.msra.mxu0 %v6665_v26  ;;  %4872 = vmatprep.subr.bf16.mxu1 %v6670_v28  ;;  %v6793_v26 = vld [vmem:[#allocation6 + $0x6e4] ss:$16 sps:$4 sm:$0xff]   ;;  %v6791_v28 = vld [vmem:[#allocation6 + $0x6e0] ss:$16 sps:$4 sm:$0xff]  }
 0x218   :  { %4845 = vmatprep.subr.bf16.mxu0 %v6673_v20  ;;  %v6751_v20 = vld [vmem:[#allocation6 + $0x5c4] ss:$16 sps:$4 sm:$0xff]  }
 0x21a   :  { %4873 = vmatpush1.bf16.msra.mxu1 %v6668_v30  ;;  %v6749_v30 = vld [vmem:[#allocation6 + $0x5c0] ss:$16 sps:$4 sm:$0xff]  }
 0x21b   :  { %4846 = vmatpush2.bf16.msra.mxu0 %v6671_v43  ;;  %4874 = vmatprep.subr.bf16.mxu1 %v6676_v35  ;;  %v6799_v43 = vld [vmem:[#allocation6 + $0x6c4] ss:$16 sps:$4 sm:$0xff]   ;;  %v6797_v35 = vld [vmem:[#allocation6 + $0x6c0] ss:$16 sps:$4 sm:$0xff]  }
 0x21c   :  { %4847 = vmatprep.subr.bf16.mxu0 %v6679_v48  ;;  %v6754_v48 = vld [vmem:[#allocation6 + $0x5a4] ss:$16 sps:$4 sm:$0xff]  }
 0x21e   :  { %4875 = vmatpush1.bf16.msra.mxu1 %v6674_v37  ;;  %v6752_v37 = vld [vmem:[#allocation6 + $0x5a0] ss:$16 sps:$4 sm:$0xff]  }
 0x21f   :  { %4848 = vmatpush2.bf16.msra.mxu0 %v6677_v36  ;;  %4876 = vmatprep.subr.bf16.mxu1 %v6682_v32  ;;  %v6805_v36 = vld [vmem:[#allocation6 + $0x6a4] ss:$16 sps:$4 sm:$0xff]   ;;  %v6803_v32 = vld [vmem:[#allocation6 + $0x6a0] ss:$16 sps:$4 sm:$0xff]  }
 0x220   :  { %4849 = vmatprep.subr.bf16.mxu0 %v6685_v34  ;;  %v6757_v34 = vld [vmem:[#allocation6 + $0x584] ss:$16 sps:$4 sm:$0xff]  }
 0x222   :  { %4877 = vmatpush1.bf16.msra.mxu1 %v6680_v41  ;;  %v6755_v41 = vld [vmem:[#allocation6 + $0x580] ss:$16 sps:$4 sm:$0xff]  }
 0x223   :  { %4850 = vmatpush2.bf16.msra.mxu0 %v6683_v49  ;;  %4878 = vmatprep.subr.bf16.mxu1 %v6688_v45  ;;  %v6811_v49 = vld [vmem:[#allocation6 + $0x684] ss:$16 sps:$4 sm:$0xff]   ;;  %v6809_v45 = vld [vmem:[#allocation6 + $0x680] ss:$16 sps:$4 sm:$0xff]  }
 0x224   :  { %4851 = vmatprep.subr.bf16.mxu0 %v6691_v44  ;;  %v6760_v44 = vld [vmem:[#allocation6 + $0x564] ss:$16 sps:$4 sm:$0xff]  }
 0x226   :  { %4879 = vmatpush1.bf16.msra.mxu1 %v6686_v46 }
 0x227   :  { %4852 = vmatpush2.bf16.msra.mxu0 %v6689_v12  ;;  %4880 = vmatprep.subr.bf16.mxu1 %v6694_v50  ;;  %v6817_v12 = vld [vmem:[#allocation6 + $0x664] ss:$16 sps:$4 sm:$0xff]  }
 0x228   :  { %4853 = vmatprep.subr.bf16.mxu0 %v6697_v47  ;;  %v6758_v47 = vld [vmem:[#allocation6 + $0x560] ss:$16 sps:$4 sm:$0xff]   ;;  %v6763_v50 = vld [vmem:[#allocation6 + $0x544] ss:$16 sps:$4 sm:$0xff]  }
 0x22a   :  { %4881 = vmatpush1.bf16.msra.mxu1 %v6692_v53  ;;  %v6823_v53 = vld [vmem:[#allocation6 + $0x644] ss:$16 sps:$4 sm:$0xff]  }
 0x22b   :  { %4854 = vmatpush2.bf16.msra.mxu0 %v6695_v51  ;;  %4882 = vmatprep.subr.bf16.mxu1 %v6700_v55  ;;  %v6815_v51 = vld [vmem:[#allocation6 + $0x660] ss:$16 sps:$4 sm:$0xff]  }
 0x22c   :  { %4909 = vmatprep.subr.bf16.mxu0 %v6715_v54  ;;  %v6761_v55 = vld [vmem:[#allocation6 + $0x540] ss:$16 sps:$4 sm:$0xff]  }
 0x22e   :  { %4856 = vmatmul.mubr.bf16.vlgmr.msra.gmra.mxu0 %v7496_v42  ;;  %4883 = vmatpush2.bf16.msra.mxu1 %v6698_v56  ;;  %v6766_v56 = vld [vmem:[#allocation6 + $0x524] ss:$16 sps:$4 sm:$0xff]  }
 0x22f   :  { %4910 = vmatpush1.bf16.msra.mxu0 %v6713_v10  ;;  %4884 = vmatprep.subr.bf16.mxu1 %v6703_v61  ;;  %v2931_v10 = vpop.f32.mrf.mxu0  ;;  %v6829_v61 = vld [vmem:[#allocation6 + $0x624] ss:$16 sps:$4 sm:$0xff]  }
 0x230   :  { %4911 = vmatprep.subr.bf16.mxu0 %v6721_v60  ;;  %v6821_v60 = vld [vmem:[#allocation6 + $0x640] ss:$16 sps:$4 sm:$0xff]  }
 0x232   :  { %4885 = vmatpush2.bf16.msra.mxu1 %v6701_v1  ;;  %v571_v1 = vsub.s32 5, %v7460_v59 }
 0x233   :  { %4912 = vmatpush1.bf16.msra.mxu0 %v6719_v62  ;;  %4886 = vmatprep.subr.bf16.mxu1 %v6706_v2  ;;  %v567_v2 = vsub.s32 4, %v7460_v59 }
 0x234   :  { %4913 = vmatprep.subr.bf16.mxu0 %v6727_v7  ;;  %v6764_v7 = vld [vmem:[#allocation6 + $0x520] ss:$16 sps:$4 sm:$0xff]  }
 0x236   :  { %4887 = vmatpush2.bf16.msra.mxu1 %v6704_v4  ;;  %v6769_v4 = vld [vmem:[#allocation6 + $0x504] ss:$16 sps:$4 sm:$0xff]  }
 0x237   :  { %4914 = vmatpush1.bf16.msra.mxu0 %v6725_v3  ;;  %4888 = vmatprep.subr.bf16.mxu1 %v6709_v8  ;;  %v2933_v3 = vpop.f32.mrf.mxu0  ;;  %v6835_v8 = vld [vmem:[#allocation6 + $0x604] ss:$16 sps:$4 sm:$0xff]  }
 0x238   :  { %4915 = vmatprep.subr.bf16.mxu0 %v6733_v6  ;;  %v6827_v6 = vld [vmem:[#allocation6 + $0x620] ss:$16 sps:$4 sm:$0xff]  }
 0x23a   :  { %4889 = vmatpush2.bf16.msra.mxu1 %v6707_v13  ;;  %v7542_v13 = vld [vmem:[#allocation4] sm:$0xff] }
 0x23b   :  { %4916 = vmatpush1.bf16.msra.mxu0 %v6731_v9  ;;  %4890 = vmatprep.subr.bf16.mxu1 %v6712_v15  ;;  %v6767_v15 = vld [vmem:[#allocation6 + $0x500] ss:$16 sps:$4 sm:$0xff]  }
 0x23c   :  { %4917 = vmatprep.subr.bf16.mxu0 %v6736_v14  ;;  %v572_v14 = vrot.slane %v7542_v13, %v571_v1 }
 0x23d   :  { %v2974_v46 = vpop.f32.mrf.mxu1 }
 0x23e   :  { %4891 = vmatpush2.bf16.msra.mxu1 %v6710_v17  ;;  %v2935_v17 = vpop.f32.mrf.mxu0 }
 0x23f   :  { %4918 = vmatpush1.bf16.msra.mxu0 %v6734_v16  ;;  %4892 = vmatprep.subr.bf16.mxu1 %v6718_v18  ;;  %v2976_v54 = vpop.f32.mrf.mxu1  ;;  %v568_v16 = vrot.slane %v7542_v13, %v567_v2  ;;  %v6833_v18 = vld [vmem:[#allocation6 + $0x600] ss:$16 sps:$4 sm:$0xff]  }
 0x240   :  { %4919 = vmatprep.subr.bf16.mxu0 %v6739_v52  ;;  %v6772_v52 = vld [vmem:[#allocation6 + $0xec] ss:$16 sps:$4 sm:$0xff]   ;;  %v6863_v2 = vld [vmem:[#allocation6 + $0x760] ss:$16 sps:$4 sm:$0xff]  }
 0x241   :  { %v2978_v62 = vpop.f32.mrf.mxu1 }
 0x242   :  { %4893 = vmatpush2.bf16.msra.mxu1 %v6716_v19 }
 0x243   :  { %4920 = vmatpush1.bf16.msra.mxu0 %v6737_v11  ;;  %4894 = vmatprep.subr.bf16.mxu1 %v6724_v21  ;;  %v2980_v9 = vpop.f32.mrf.mxu1  ;;  %v6841_v11 = vld [vmem:[#allocation6 + $0x7e4] ss:$16 sps:$4 sm:$0xff]   ;;  %v2932_v21 = vadd.f32 %v2931_v10, %v568_v16 }
 0x244   :  { %4921 = vmatprep.subr.bf16.mxu0 %v6742_v33  ;;  %v2934_v33 = vadd.f32 %v2933_v3, %v572_v14  ;;  %v6871_v3 = vld [vmem:[#allocation6 + $0x744] ss:$16 sps:$4 sm:$0xff]  }
 0x245   :  { %v3060_v19 = vpop.f32.mrf.mxu1 }
 0x246   :  { %4895 = vmatpush2.bf16.msra.mxu1 %v6722_v57  ;;  %v6839_v57 = vld [vmem:[#allocation6 + $0x7e0] ss:$16 sps:$4 sm:$0xff]  }
 0x247   :  { %4922 = vmatpush1.bf16.msra.mxu0 %v6740_v63  ;;  %4896 = vmatprep.subr.bf16.mxu1 %v6730_v24  ;;  %v2937_v63 = vpop.f32.mrf.mxu0  ;;  %v6847_v24 = vld [vmem:[#allocation6 + $0x7c4] ss:$16 sps:$4 sm:$0xff]  }
 0x248   :  { %4923 = vmatprep.subr.bf16.mxu0 %v6745_v22  ;;  %v2936_v22 = vadd.f32 %v2935_v17, %v568_v16  ;;  %v6875_v16 = vld [vmem:[#allocation6 + $0x720] ss:$16 sps:$4 sm:$0xff]   ;;  %v6883_v17 = vld [vmem:[#allocation6 + $0x704] ss:$16 sps:$4 sm:$0xff]  }
 0x24a   :  { %4897 = vmatpush2.bf16.msra.mxu1 %v6728_v25 }
 0x24b   :  { %4924 = vmatpush1.bf16.msra.mxu0 %v6743_v39  ;;  %4952 = vmatprep.subr.bf16.mxu1 %v6793_v26  ;;  %v3062_v39 = vpop.f32.mrf.mxu1  ;;  %v2938_v26 = vadd.f32 %v2937_v63, %v572_v14  ;;  %v6776_v14 = vld [vmem:[#allocation6 + $0xa8] ss:$16 sps:$4 sm:$0xff]   ;;  %v6790_v63 = vld [vmem:[#allocation6 + $0x2c] ss:$16 sps:$4 sm:$0xff]  }
 0x24c   :  { %4925 = vmatprep.subr.bf16.mxu0 %v6748_v29  ;;  %v2977_v29 = vadd.f32 %v2976_v54, %v2934_v33  ;;  %v6857_v54 = vld [vmem:[#allocation6 + $0x780] ss:$16 sps:$4 sm:$0xff]   ;;  %v6787_v33 = vld [vmem:[#allocation6 + $0x4c] ss:$16 sps:$4 sm:$0xff]  }
 0x24d   :  { %4899 = vmatmul.mubr.bf16.vlgmr.msra.gmra.mxu1 %v7530_v23 }
 0x24e   :  { %4953 = vmatpush1.bf16.msra.mxu1 %v6791_v28  ;;  %v6845_v28 = vld [vmem:[#allocation6 + $0x7c0] ss:$16 sps:$4 sm:$0xff]  }
 0x24f   :  { %4926 = vmatpush2.bf16.msra.mxu0 %v6746_v27  ;;  %4954 = vmatprep.subr.bf16.mxu1 %v6799_v43  ;;  %v2975_v27 = vadd.f32 %v2974_v46, %v2932_v21  ;;  %v2979_v43 = vadd.f32 %v2978_v62, %v2936_v22  ;;  %v6859_v46 = vld [vmem:[#allocation6 + $0x784] ss:$16 sps:$4 sm:$0xff]   ;;  %v6770_v62 = vld [vmem:[#allocation6 + $0xe8] ss:$16 sps:$4 sm:$0xff]   ;;  %v6796_v22 = vld [vmem:[#allocation6 + $0xc] ss:$16 sps:$4 sm:$0xff]  }
 0x250   :  { %4927 = vmatprep.subr.bf16.mxu0 %v6751_v20  ;;  %v6785_v21 = vld [vmem:[#allocation6 + $0x48] ss:$16 sps:$4 sm:$0xff]  }
 0x252   :  { %4955 = vmatpush1.bf16.msra.mxu1 %v6797_v35  ;;  %v3064_v35 = vpop.f32.mrf.mxu1 }
 0x253   :  { %4928 = vmatpush2.bf16.msra.mxu0 %v6749_v30  ;;  %4956 = vmatprep.subr.bf16.mxu1 %v6805_v36 }
 0x254   :  { %4929 = vmatprep.subr.bf16.mxu0 %v6754_v48  ;;  %v6853_v48 = vld [vmem:[#allocation6 + $0x7a4] ss:$16 sps:$4 sm:$0xff]  }
 0x256   :  { %4957 = vmatpush1.bf16.msra.mxu1 %v6803_v32 }
 0x257   :  { %4930 = vmatpush2.bf16.msra.mxu0 %v6752_v37  ;;  %4958 = vmatprep.subr.bf16.mxu1 %v6811_v49 }
 0x258   :  { %4931 = vmatprep.subr.bf16.mxu0 %v6757_v34  ;;  %v2981_v34 = vadd.f32 %v2980_v9, %v2938_v26  ;;  %v6877_v9 = vld [vmem:[#allocation6 + $0x724] ss:$16 sps:$4 sm:$0xff]   ;;  %v6806_v26 = vld [vmem:[#allocation6 + $0x1c8] ss:$16 sps:$4 sm:$0xff]  }
 0x25a   :  { %4959 = vmatpush1.bf16.msra.mxu1 %v6809_v45 }
 0x25b   :  { %4932 = vmatpush2.bf16.msra.mxu0 %v6755_v41  ;;  %4960 = vmatprep.subr.bf16.mxu1 %v6817_v12  ;;  %v6851_v41 = vld [vmem:[#allocation6 + $0x7a0] ss:$16 sps:$4 sm:$0xff]  }
 0x25c   :  { %4933 = vmatprep.subr.bf16.mxu0 %v6760_v44 }
 0x25e   :  { %4961 = vmatpush1.bf16.msra.mxu1 %v6815_v51 }
 0x25f   :  { %4934 = vmatpush2.bf16.msra.mxu0 %v6758_v47  ;;  %4962 = vmatprep.subr.bf16.mxu1 %v6823_v53  ;;  %v3066_v47 = vpop.f32.mrf.mxu1 }
 0x260   :  { %4935 = vmatprep.subr.bf16.mxu0 %v6763_v50 }
 0x262   :  { %4963 = vmatpush1.bf16.msra.mxu1 %v6821_v60 }
 0x263   :  { %4936 = vmatpush2.bf16.msra.mxu0 %v6761_v55  ;;  %4964 = vmatprep.subr.bf16.mxu1 %v6829_v61 }
 0x264   :  { %4937 = vmatprep.subr.bf16.mxu0 %v6766_v56  ;;  %v6865_v56 = vld [vmem:[#allocation6 + $0x764] ss:$16 sps:$4 sm:$0xff]  }
 0x266   :  { %4965 = vmatpush1.bf16.msra.mxu1 %v6827_v6  ;;  %v6778_v6 = vld [vmem:[#allocation6 + $0xac] ss:$16 sps:$4 sm:$0xff]  }
 0x267   :  { %4938 = vmatpush2.bf16.msra.mxu0 %v6764_v7  ;;  %4966 = vmatprep.subr.bf16.mxu1 %v6835_v8  ;;  %v6775_v7 = vld [vmem:[#allocation6 + $0xcc] ss:$16 sps:$4 sm:$0xff]   ;;  %v6869_v8 = vld [vmem:[#allocation6 + $0x740] ss:$16 sps:$4 sm:$0xff]  }
 0x268   :  { %4939 = vmatprep.subr.bf16.mxu0 %v6769_v4  ;;  %v6773_v4 = vld [vmem:[#allocation6 + $0xc8] ss:$16 sps:$4 sm:$0xff]  }
 0x26a   :  { %4967 = vmatpush1.bf16.msra.mxu1 %v6833_v18  ;;  %v6784_v18 = vld [vmem:[#allocation6 + $0x6c] ss:$16 sps:$4 sm:$0xff]  }
 0x26b   :  { %4940 = vmatpush2.bf16.msra.mxu0 %v6767_v15  ;;  %4968 = vmatprep.subr.bf16.mxu1 %v6841_v11  ;;  %v6781_v15 = vld [vmem:[#allocation6 + $0x8c] ss:$16 sps:$4 sm:$0xff]  }
 0x26c   :  { %4995 = vmatprep.subr.bf16.mxu0 %v6772_v52  ;;  %v6779_v52 = vld [vmem:[#allocation6 + $0x88] ss:$16 sps:$4 sm:$0xff]   ;;  %v6889_v11 = vld [vmem:[#allocation6 + $0x2ec] ss:$16 sps:$4 sm:$0xff]  }
 0x26e   :  { %v3017_v25 = vpop.f32.mrf.mxu0  ;;  %4969 = vmatpush2.bf16.msra.mxu1 %v6839_v57  ;;  %v6788_v57 = vld [vmem:[#allocation6 + $0x28] ss:$16 sps:$4 sm:$0xff]  }
 0x26f   :  { %4970 = vmatprep.subr.bf16.mxu1 %v6847_v24  ;;  %v3018_v36 = vadd.f32 %v3017_v25, %v2975_v27  ;;  %v6794_v24 = vld [vmem:[#allocation6 + $0x8] ss:$16 sps:$4 sm:$0xff]   ;;  %v6814_v27 = vld [vmem:[#allocation6 + $0x1ac] ss:$16 sps:$4 sm:$0xff]  }
 0x270   :  { %v3019_v20 = vpop.f32.mrf.mxu0  ;;  %v6800_v25 = vld [vmem:[#allocation6 + $0x1e8] ss:$16 sps:$4 sm:$0xff]  }
 0x271   :  { %v3020_v30 = vadd.f32 %v3019_v20, %v2977_v29  ;;  %v3061_v50 = vadd.f32 %v3060_v19, %v3018_v36  ;;  %v6782_v19 = vld [vmem:[#allocation6 + $0x68] ss:$16 sps:$4 sm:$0xff]   ;;  %v6808_v29 = vld [vmem:[#allocation6 + $0x1cc] ss:$16 sps:$4 sm:$0xff]  }
 0x272   :  { %v3021_v37 = vpop.f32.mrf.mxu0  ;;  %4971 = vmatpush2.bf16.msra.mxu1 %v6845_v28  ;;  %v6812_v20 = vld [vmem:[#allocation6 + $0x1a8] ss:$16 sps:$4 sm:$0xff]   ;;  %v6820_v28 = vld [vmem:[#allocation6 + $0x18c] ss:$16 sps:$4 sm:$0xff]  }
 0x273   :  { %v3022_v32 = vadd.f32 %v3021_v37, %v2979_v43  ;;  %v3063_v44 = vadd.f32 %v3062_v39, %v3020_v30  ;;  %4972 = vmatprep.subr.bf16.mxu1 %v6853_v48  ;;  %v3245_v60 = vmax.f32 %v3061_v50, 0.0  ;;  %v6802_v39 = vld [vmem:[#allocation6 + $0x1ec] ss:$16 sps:$4 sm:$0xff]   ;;  %v6818_v43 = vld [vmem:[#allocation6 + $0x188] ss:$16 sps:$4 sm:$0xff]  }
 0x274   :  { %v3023_v49 = vpop.f32.mrf.mxu0  ;;  %v6826_v30 = vld [vmem:[#allocation6 + $0x16c] ss:$16 sps:$4 sm:$0xff]   ;;  %v6824_v48 = vld [vmem:[#allocation6 + $0x168] ss:$16 sps:$4 sm:$0xff]  }
 0x275   :  { %v3065_v45 = vadd.f32 %v3064_v35, %v3022_v32  ;;  %v3024_v12 = vadd.f32 %v3023_v49, %v2981_v34  ;;  %v3246_v55 = vmax.f32 %v3063_v44, 0.0  ;;  %v6832_v35 = vld [vmem:[#allocation6 + $0x14c] ss:$16 sps:$4 sm:$0xff]   ;;  %v6830_v36 = vld [vmem:[#allocation6 + $0x148] ss:$16 sps:$4 sm:$0xff]  }
 0x276   :  { %4973 = vmatpush2.bf16.msra.mxu1 %v6851_v41  ;;  %v6838_v37 = vld [vmem:[#allocation6 + $0x12c] ss:$16 sps:$4 sm:$0xff]   ;;  %v6836_v34 = vld [vmem:[#allocation6 + $0x128] ss:$16 sps:$4 sm:$0xff]  }
 0x277   :  { %v3067_v51 = vadd.f32 %v3066_v47, %v3024_v12  ;;  %v3253_v53 = vmax.f32 %v3065_v45, 0.0  ;;  %4974 = vmatprep.subr.bf16.mxu1 %v6859_v46  ;;  %v6844_v32 = vld [vmem:[#allocation6 + $0x10c] ss:$16 sps:$4 sm:$0xff]   ;;  %v6842_v49 = vld [vmem:[#allocation6 + $0x108] ss:$16 sps:$4 sm:$0xff]  }
 0x278   :  { %v6850_v41 = vld [vmem:[#allocation6 + $0x4ec] ss:$16 sps:$4 sm:$0xff]   ;;  %v6848_v45 = vld [vmem:[#allocation6 + $0x4e8] ss:$16 sps:$4 sm:$0xff]  }
 0x279   :  { %v3254_v10 = vmax.f32 %v3067_v51, 0.0  ;;  %v7548_v1 = vpack.c.bf16 %v3253_v53, %v3245_v60  ;;  %v6856_v12 = vld [vmem:[#allocation6 + $0x4cc] ss:$16 sps:$4 sm:$0xff]   ;;  %v6854_v47 = vld [vmem:[#allocation6 + $0x4c8] ss:$16 sps:$4 sm:$0xff]   ;;  %v575_v60 = vsub.s32 6, %v7460_v59 }
 0x27a   :  { %4975 = vmatpush2.bf16.msra.mxu1 %v6857_v54  ;;  %v6862_v50 = vld [vmem:[#allocation6 + $0x4ac] ss:$16 sps:$4 sm:$0xff]   ;;  %v6860_v54 = vld [vmem:[#allocation6 + $0x4a8] ss:$16 sps:$4 sm:$0xff]  }
 0x27b   :  { %v7546_v61 = vpack.c.bf16 %v3254_v10, %v3246_v55  ;;  %4976 = vmatprep.subr.bf16.mxu1 %v6865_v56  ;;  %v6868_v55 = vld [vmem:[#allocation6 + $0x48c] ss:$16 sps:$4 sm:$0xff]   ;;  %v579_v56 = vsub.s32 7, %v7460_v59 }
 0x27d   :  { %4941 = vmatprep.mubr.bf16.mxu0 %v7546_v61 }
 0x27e   :  { %4942 = vmatmul.mubr.bf16.vlgmr.msra.gmra.mxu0 %v7548_v1  ;;  %4977 = vmatpush2.bf16.msra.mxu1 %v6863_v2 }
 0x27f   :  { %4996 = vmatpush1.bf16.msra.mxu0 %v6770_v62  ;;  %5027 = vmatprep.mubr.bf16.mxu0 %v7517_v0  ;;  %v6881_v0 = vld [vmem:[#allocation6 + $0x700] ss:$16 sps:$4 sm:$0xff]  }
 0x280   :  { %4997 = vmatprep.subr.bf16.mxu0 %v6775_v7  ;;  %4978 = vmatprep.subr.bf16.mxu1 %v6871_v3  ;;  %v580_v3 = vrot.slane %v7542_v13, %v579_v56  ;;  %v6907_v56 = vld [vmem:[#allocation6 + $0x28c] ss:$16 sps:$4 sm:$0xff]  }
 0x282   :  { %4979 = vmatpush2.bf16.msra.mxu1 %v6869_v8 }
 0x283   :  { %4998 = vmatpush1.bf16.msra.mxu0 %v6773_v4  ;;  %4980 = vmatprep.subr.bf16.mxu1 %v6877_v9  ;;  %v576_v4 = vrot.slane %v7542_v13, %v575_v60  ;;  %v6872_v9 = vld [vmem:[#allocation6 + $0x468] ss:$16 sps:$4 sm:$0xff]  }
 0x284   :  { %4999 = vmatprep.subr.bf16.mxu0 %v6778_v6  ;;  %v6908_v60 = vld [vmem:[#allocation6 + $0x5a8] ss:$16 sps:$4 sm:$0xff]  }
 0x285   :  { %v3103_v44 = vpop.f32.mrf.mxu1 }
 0x286   :  { %4981 = vmatpush2.bf16.msra.mxu1 %v6875_v16 }
 0x287   :  { %5000 = vmatpush1.bf16.msra.mxu0 %v6776_v14  ;;  %4982 = vmatprep.subr.bf16.mxu1 %v6883_v17  ;;  %v3105_v46 = vpop.f32.mrf.mxu1  ;;  %v6880_v14 = vld [vmem:[#allocation6 + $0x44c] ss:$16 sps:$4 sm:$0xff]  }
 0x288   :  { %5001 = vmatprep.subr.bf16.mxu0 %v6781_v15  ;;  %v3106_v16 = vadd.f32 %v3105_v46, %v580_v3  ;;  %v6895_v46 = vld [vmem:[#allocation6 + $0x2cc] ss:$16 sps:$4 sm:$0xff]  }
 0x289   :  { %v3107_v51 = vpop.f32.mrf.mxu1 }
 0x28a   :  { %4983 = vmatpush2.bf16.msra.mxu1 %v6881_v0  ;;  %v3108_v17 = vadd.f32 %v3107_v51, %v576_v4  ;;  %v6893_v51 = vld [vmem:[#allocation6 + $0x2c8] ss:$16 sps:$4 sm:$0xff]  }
 0x28b   :  { %5002 = vmatpush1.bf16.msra.mxu0 %v6779_v52  ;;  %5038 = vmatprep.subr.bf16.mxu1 %v6889_v11  ;;  %v3109_v10 = vpop.f32.mrf.mxu1  ;;  %v3104_v52 = vadd.f32 %v3103_v44, %v576_v4  ;;  %v6878_v11 = vld [vmem:[#allocation6 + $0x448] ss:$16 sps:$4 sm:$0xff]  }
 0x28c   :  { %5003 = vmatprep.subr.bf16.mxu0 %v6784_v18  ;;  %v6920_v4 = vld [vmem:[#allocation6 + $0x568] ss:$16 sps:$4 sm:$0xff]  }
 0x28f   :  { %5004 = vmatpush1.bf16.msra.mxu0 %v6782_v19  ;;  %v3110_v19 = vadd.f32 %v3109_v10, %v580_v3  ;;  %v6899_v10 = vld [vmem:[#allocation6 + $0x2a8] ss:$16 sps:$4 sm:$0xff]   ;;  %v6919_v3 = vld [vmem:[#allocation6 + $0x24c] ss:$16 sps:$4 sm:$0xff]  }
 0x290   :  { %5005 = vmatprep.subr.bf16.mxu0 %v6787_v33 }
 0x293   :  { %5006 = vmatpush1.bf16.msra.mxu0 %v6785_v21 }
 0x294   :  { %5007 = vmatprep.subr.bf16.mxu0 %v6790_v63  ;;  %v6886_v63 = vld [vmem:[#allocation6 + $0x42c] ss:$16 sps:$4 sm:$0xff]  }
 0x297   :  { %5008 = vmatpush1.bf16.msra.mxu0 %v6788_v57 }
 0x298   :  { %5009 = vmatprep.subr.bf16.mxu0 %v6796_v22 }
 0x29b   :  { %5010 = vmatpush1.bf16.msra.mxu0 %v6794_v24 }
 0x29c   :  { %5011 = vmatprep.subr.bf16.mxu0 %v6802_v39 }
 0x29f   :  { %5012 = vmatpush2.bf16.msra.mxu0 %v6800_v25 }
 0x2a0   :  { %5013 = vmatprep.subr.bf16.mxu0 %v6808_v29 }
 0x2a3   :  { %5014 = vmatpush2.bf16.msra.mxu0 %v6806_v26  ;;  %v6884_v26 = vld [vmem:[#allocation6 + $0x428] ss:$16 sps:$4 sm:$0xff]  }
 0x2a4   :  { %5015 = vmatprep.subr.bf16.mxu0 %v6814_v27 }
 0x2a7   :  { %5016 = vmatpush2.bf16.msra.mxu0 %v6812_v20 }
 0x2a8   :  { %5017 = vmatprep.subr.bf16.mxu0 %v6820_v28 }
 0x2ab   :  { %5018 = vmatpush2.bf16.msra.mxu0 %v6818_v43  ;;  %v6892_v43 = vld [vmem:[#allocation6 + $0x40c] ss:$16 sps:$4 sm:$0xff]  }
 0x2ac   :  { %5019 = vmatprep.subr.bf16.mxu0 %v6826_v30 }
 0x2ae   :  { %v3146_v53 = vpop.f32.mrf.mxu0 }
 0x2af   :  { %5020 = vmatpush2.bf16.msra.mxu0 %v6824_v48  ;;  %v3147_v13 = vadd.f32 %v3146_v53, %v3104_v52  ;;  %v6901_v53 = vld [vmem:[#allocation6 + $0x2ac] ss:$16 sps:$4 sm:$0xff]   ;;  %v6932_v52 = vld [vmem:[#allocation6 + $0x528] ss:$16 sps:$4 sm:$0xff]  }
 0x2b0   :  { %5021 = vmatprep.subr.bf16.mxu0 %v6832_v35  ;;  %v3148_v62 = vpop.f32.mrf.mxu0 }
 0x2b1   :  { %v3149_v33 = vadd.f32 %v3148_v62, %v3106_v16  ;;  %v6916_v62 = vld [vmem:[#allocation6 + $0x58c] ss:$16 sps:$4 sm:$0xff]   ;;  %v6923_v16 = vld [vmem:[#allocation6 + $0x228] ss:$16 sps:$4 sm:$0xff]  }
 0x2b2   :  { %v3150_v6 = vpop.f32.mrf.mxu0 }
 0x2b3   :  { %5022 = vmatpush2.bf16.msra.mxu0 %v6830_v36  ;;  %v3151_v21 = vadd.f32 %v3150_v6, %v3108_v17  ;;  %v6928_v6 = vld [vmem:[#allocation6 + $0x54c] ss:$16 sps:$4 sm:$0xff]  }
 0x2b4   :  { %5023 = vmatprep.subr.bf16.mxu0 %v6838_v37  ;;  %v3152_v18 = vpop.f32.mrf.mxu0  ;;  %v6890_v37 = vld [vmem:[#allocation6 + $0x408] ss:$16 sps:$4 sm:$0xff]   ;;  %v6931_v17 = vld [vmem:[#allocation6 + $0x20c] ss:$16 sps:$4 sm:$0xff]  }
 0x2b5   :  { %v3153_v22 = vadd.f32 %v3152_v18, %v3110_v19  ;;  %v6940_v18 = vld [vmem:[#allocation6 + $0x50c] ss:$16 sps:$4 sm:$0xff]   ;;  %v6938_v19 = vld [vmem:[#allocation6 + $0x508] ss:$16 sps:$4 sm:$0xff]  }
 0x2b7   :  { %5024 = vmatpush2.bf16.msra.mxu0 %v6836_v34 }
 0x2b8   :  { %5025 = vmatprep.subr.bf16.mxu0 %v6844_v32 }
 0x2bb   :  { %5026 = vmatpush2.bf16.msra.mxu0 %v6842_v49  ;;  %v6898_v49 = vld [vmem:[#allocation6 + $0x5ec] ss:$16 sps:$4 sm:$0xff]  }
 0x2bc   :  { %5081 = vmatprep.subr.bf16.mxu0 %v6850_v41 }
 0x2be   :  { %5028 = vmatmul.mubr.bf16.vlgmr.msra.gmra.mxu0 %v7496_v42  ;;  %v6866_v42 = vld [vmem:[#allocation6 + $0x488] ss:$16 sps:$4 sm:$0xff]  }
 0x2bf   :  { %5082 = vmatpush1.bf16.msra.mxu0 %v6848_v45  ;;  %5113 = vmatprep.mubr.bf16.mxu0 %v7546_v61  ;;  %v6874_v61 = vld [vmem:[#allocation6 + $0x46c] ss:$16 sps:$4 sm:$0xff]   ;;  %v6887_v45 = vld [vmem:[#allocation6 + $0x2e8] ss:$16 sps:$4 sm:$0xff]  }
 0x2c0   :  { %5083 = vmatprep.subr.bf16.mxu0 %v6856_v12 }
 0x2c3   :  { %5084 = vmatpush1.bf16.msra.mxu0 %v6854_v47  ;;  %v6896_v47 = vld [vmem:[#allocation6 + $0x5e8] ss:$16 sps:$4 sm:$0xff]  }
 0x2c4   :  { %5085 = vmatprep.subr.bf16.mxu0 %v6862_v50  ;;  %v6904_v50 = vld [vmem:[#allocation6 + $0x5cc] ss:$16 sps:$4 sm:$0xff]  }
 0x2c5   :  { %v3189_v7 = vpop.f32.mrf.mxu1 }
 0x2c6   :  { %v3190_v25 = vadd.f32 %v3189_v7, %v3147_v13  ;;  %v6905_v7 = vld [vmem:[#allocation6 + $0x288] ss:$16 sps:$4 sm:$0xff]   ;;  %v7010_v13 = vld [vmem:[#allocation9 + $0x70] ss:$8 sps:$4 sm:$0xff]  }
 0x2c7   :  { %5086 = vmatpush1.bf16.msra.mxu0 %v6860_v54  ;;  %v3191_v2 = vpop.f32.mrf.mxu1  ;;  %v6902_v54 = vld [vmem:[#allocation6 + $0x5c8] ss:$16 sps:$4 sm:$0xff]  }
 0x2c8   :  { %5087 = vmatprep.subr.bf16.mxu0 %v6868_v55  ;;  %v3192_v24 = vadd.f32 %v3191_v2, %v3149_v33  ;;  %v6910_v55 = vld [vmem:[#allocation6 + $0x5ac] ss:$16 sps:$4 sm:$0xff]   ;;  %v6911_v2 = vld [vmem:[#allocation6 + $0x268] ss:$16 sps:$4 sm:$0xff]  }
 0x2c9   :  { %v3193_v8 = vpop.f32.mrf.mxu1  ;;  %v7012_v33 = vld [vmem:[#allocation9 + $0x74] ss:$8 sps:$4 sm:$0xff]  }
 0x2ca   :  { %v3194_v39 = vadd.f32 %v3193_v8, %v3151_v21  ;;  %v6917_v8 = vld [vmem:[#allocation6 + $0x248] ss:$16 sps:$4 sm:$0xff]  }
 0x2cb   :  { %5088 = vmatpush1.bf16.msra.mxu0 %v6866_v42  ;;  %v3195_v15 = vpop.f32.mrf.mxu1  ;;  %v6914_v42 = vld [vmem:[#allocation6 + $0x588] ss:$16 sps:$4 sm:$0xff]  }
 0x2cc   :  { %5089 = vmatprep.subr.bf16.mxu0 %v6874_v61  ;;  %v3196_v27 = vadd.f32 %v3195_v15, %v3153_v22  ;;  %v6922_v61 = vld [vmem:[#allocation6 + $0x56c] ss:$16 sps:$4 sm:$0xff]   ;;  %v6935_v21 = vld [vmem:[#allocation6 + $0x3e8] ss:$16 sps:$4 sm:$0xff]  }
 0x2cd   :  { %v3232_v0 = vpop.f32.mrf.mxu1  ;;  %v6934_v15 = vld [vmem:[#allocation6 + $0x52c] ss:$16 sps:$4 sm:$0xff]   ;;  %v6941_v22 = vld [vmem:[#allocation6 + $0x3c8] ss:$16 sps:$4 sm:$0xff]  }
 0x2ce   :  { %v3233_v30 = vadd.f32 %v3232_v0, %v3190_v25  ;;  %v6929_v0 = vld [vmem:[#allocation6 + $0x208] ss:$16 sps:$4 sm:$0xff]  }
 0x2cf   :  { %5090 = vmatpush1.bf16.msra.mxu0 %v6872_v9  ;;  %v3234_v57 = vpop.f32.mrf.mxu1  ;;  %v6925_v9 = vld [vmem:[#allocation6 + $0x22c] ss:$16 sps:$4 sm:$0xff]   ;;  %v7018_v25 = vld [vmem:[#allocation9 + $0x54] ss:$8 sps:$4 sm:$0xff]  }
 0x2d0   :  { %5091 = vmatprep.subr.bf16.mxu0 %v6880_v14  ;;  %v3235_v20 = vadd.f32 %v3234_v57, %v3192_v24  ;;  %v3247_v41 = vmax.f32 %v3233_v30, 0.0  ;;  %v6926_v14 = vld [vmem:[#allocation6 + $0x548] ss:$16 sps:$4 sm:$0xff]   ;;  %v6946_v24 = vld [vmem:[#allocation6 + $0x3ac] ss:$16 sps:$4 sm:$0xff]  }
 0x2d1   :  { %v3236_v29 = vpop.f32.mrf.mxu1  ;;  %v7015_v57 = vld [vmem:[#allocation9 + $0x64] ss:$8 sps:$4 sm:$0xff]   ;;  %v7024_v30 = vld [vmem:[#allocation9 + $0x34] ss:$8 sps:$4 sm:$0xff]  }
 0x2d2   :  { %v3237_v28 = vadd.f32 %v3236_v29, %v3194_v39  ;;  %v3248_v34 = vmax.f32 %v3235_v20, 0.0  ;;  %v7013_v39 = vld [vmem:[#allocation9 + $0x60] ss:$8 sps:$4 sm:$0xff]   ;;  %v6944_v29 = vld [vmem:[#allocation6 + $0x3a8] ss:$16 sps:$4 sm:$0xff]  }
 0x2d3   :  { %5092 = vmatpush1.bf16.msra.mxu0 %v6878_v11  ;;  %v3238_v48 = vpop.f32.mrf.mxu1  ;;  %v6937_v11 = vld [vmem:[#allocation6 + $0x3ec] ss:$16 sps:$4 sm:$0xff]   ;;  %v7021_v20 = vld [vmem:[#allocation9 + $0x44] ss:$8 sps:$4 sm:$0xff]  }
 0x2d4   :  { %5093 = vmatprep.subr.bf16.mxu0 %v6886_v63  ;;  %v3239_v35 = vadd.f32 %v3238_v48, %v3196_v27  ;;  %v3255_v36 = vmax.f32 %v3237_v28, 0.0  ;;  %v6943_v63 = vld [vmem:[#allocation6 + $0x3cc] ss:$16 sps:$4 sm:$0xff]   ;;  %v6947_v28 = vld [vmem:[#allocation6 + $0x388] ss:$16 sps:$4 sm:$0xff]  }
 0x2d5   :  { %v7016_v27 = vld [vmem:[#allocation9 + $0x50] ss:$8 sps:$4 sm:$0xff]   ;;  %v6950_v48 = vld [vmem:[#allocation6 + $0x368] ss:$16 sps:$4 sm:$0xff]  }
 0x2d6   :  { %v3256_v32 = vmax.f32 %v3239_v35, 0.0  ;;  %v7561_v12 = vpack.c.bf16 %v3255_v36, %v3247_v41  ;;  %v6955_v35 = vld [vmem:[#allocation6 + $0x34c] ss:$16 sps:$4 sm:$0xff]   ;;  %v7030_v41 = vld [vmem:[#allocation9 + $0x14] ss:$8 sps:$4 sm:$0xff]  }
 0x2d7   :  { %5094 = vmatpush1.bf16.msra.mxu0 %v6884_v26  ;;  %v6949_v26 = vld [vmem:[#allocation6 + $0x38c] ss:$16 sps:$4 sm:$0xff]  }
 0x2d8   :  { %5095 = vmatprep.subr.bf16.mxu0 %v6892_v43  ;;  %v7559_v44 = vpack.c.bf16 %v3256_v32, %v3248_v34  ;;  %v6952_v43 = vld [vmem:[#allocation6 + $0x36c] ss:$16 sps:$4 sm:$0xff]   ;;  %v6953_v34 = vld [vmem:[#allocation6 + $0x348] ss:$16 sps:$4 sm:$0xff]  }
 0x2d9   :  { %v7022_v36 = vld [vmem:[#allocation9 + $0x30] ss:$8 sps:$4 sm:$0xff]  }
 0x2da   :  { %4984 = vmatprep.mubr.bf16.mxu1 %v7559_v44  ;;  %v6958_v32 = vld [vmem:[#allocation6 + $0x32c] ss:$16 sps:$4 sm:$0xff]  }
 0x2db   :  { %5096 = vmatpush1.bf16.msra.mxu0 %v6890_v37  ;;  %4985 = vmatmul.mubr.bf16.vlgmr.msra.gmra.mxu1 %v7561_v12  ;;  %v7027_v37 = vld [vmem:[#allocation9 + $0x24] ss:$8 sps:$4 sm:$0xff]  }
 0x2dc   :  { %5097 = vmatprep.subr.bf16.mxu0 %v6898_v49  ;;  %5039 = vmatpush1.bf16.msra.mxu1 %v6887_v45  ;;  %v7025_v49 = vld [vmem:[#allocation9 + $0x20] ss:$8 sps:$4 sm:$0xff]   ;;  %v6956_v45 = vld [vmem:[#allocation6 + $0x328] ss:$16 sps:$4 sm:$0xff]  }
 0x2dd   :  { %5070 = vmatprep.mubr.bf16.mxu1 %v7533_v40  ;;  %5040 = vmatprep.subr.bf16.mxu1 %v6895_v46  ;;  %v6913_v40 = vld [vmem:[#allocation6 + $0x26c] ss:$16 sps:$4 sm:$0xff]  }
 0x2de   :  { %v6961_v46 = vld [vmem:[#allocation6 + $0x30c] ss:$16 sps:$4 sm:$0xff]  }
 0x2df   :  { %5098 = vmatpush2.bf16.msra.mxu0 %v6896_v47  ;;  %v7028_v47 = vld [vmem:[#allocation9 + $0x10] ss:$8 sps:$4 sm:$0xff]  }
 0x2e0   :  { %5099 = vmatprep.subr.bf16.mxu0 %v6904_v50  ;;  %5041 = vmatpush1.bf16.msra.mxu1 %v6893_v51  ;;  %v7033_v50 = vld [vmem:[#allocation9 + $0x4] ss:$8 sps:$4 sm:$0xff]  }
 0x2e1   :  { %5042 = vmatprep.subr.bf16.mxu1 %v6901_v53  ;;  %v6959_v51 = vld [vmem:[#allocation6 + $0x308] ss:$16 sps:$4 sm:$0xff]   ;;  %v6964_v53 = vld [vmem:[#allocation6 + $0x6ec] ss:$16 sps:$4 sm:$0xff]  }
 0x2e3   :  { %5100 = vmatpush2.bf16.msra.mxu0 %v6902_v54  ;;  %v7031_v54 = vld [vmem:[#allocation9] ss:$8 sps:$4 sm:$0xff]  }
 0x2e4   :  { %5101 = vmatprep.subr.bf16.mxu0 %v6910_v55  ;;  %5043 = vmatpush1.bf16.msra.mxu1 %v6899_v10  ;;  %v7036_v55 = vld [vmem:[#allocation9 + $0xf4] ss:$8 sps:$4 sm:$0xff]  }
 0x2e5   :  { %5044 = vmatprep.subr.bf16.mxu1 %v6907_v56  ;;  %v6962_v10 = vld [vmem:[#allocation6 + $0x6e8] ss:$16 sps:$4 sm:$0xff]   ;;  %v6967_v56 = vld [vmem:[#allocation6 + $0x6cc] ss:$16 sps:$4 sm:$0xff]  }
 0x2e7   :  { %5102 = vmatpush2.bf16.msra.mxu0 %v6908_v60  ;;  %v7034_v60 = vld [vmem:[#allocation9 + $0xf0] ss:$8 sps:$4 sm:$0xff]  }
 0x2e8   :  { %5103 = vmatprep.subr.bf16.mxu0 %v6916_v62  ;;  %5045 = vmatpush1.bf16.msra.mxu1 %v6905_v7  ;;  %v7039_v62 = vld [vmem:[#allocation9 + $0xe4] ss:$8 sps:$4 sm:$0xff]  }
 0x2e9   :  { %5046 = vmatprep.subr.bf16.mxu1 %v6913_v40  ;;  %v6965_v7 = vld [vmem:[#allocation6 + $0x6c8] ss:$16 sps:$4 sm:$0xff]   ;;  %v6970_v40 = vld [vmem:[#allocation6 + $0x6ac] ss:$16 sps:$4 sm:$0xff]  }
 0x2eb   :  { %5104 = vmatpush2.bf16.msra.mxu0 %v6914_v42  ;;  %v7037_v42 = vld [vmem:[#allocation9 + $0xe0] ss:$8 sps:$4 sm:$0xff]  }
 0x2ec   :  { %5105 = vmatprep.subr.bf16.mxu0 %v6922_v61  ;;  %5047 = vmatpush1.bf16.msra.mxu1 %v6911_v2  ;;  %v7042_v61 = vld [vmem:[#allocation9 + $0xd4] ss:$8 sps:$4 sm:$0xff]  }
 0x2ed   :  { %5048 = vmatprep.subr.bf16.mxu1 %v6919_v3  ;;  %v6968_v2 = vld [vmem:[#allocation6 + $0x6a8] ss:$16 sps:$4 sm:$0xff]   ;;  %v6973_v3 = vld [vmem:[#allocation6 + $0x68c] ss:$16 sps:$4 sm:$0xff]  }
 0x2ef   :  { %5106 = vmatpush2.bf16.msra.mxu0 %v6920_v4  ;;  %v7040_v4 = vld [vmem:[#allocation9 + $0xd0] ss:$8 sps:$4 sm:$0xff]  }
 0x2f0   :  { %5107 = vmatprep.subr.bf16.mxu0 %v6928_v6  ;;  %5049 = vmatpush1.bf16.msra.mxu1 %v6917_v8  ;;  %v7045_v6 = vld [vmem:[#allocation9 + $0xc4] ss:$8 sps:$4 sm:$0xff]   ;;  %v6976_v8 = vld [vmem:[#allocation6 + $0x66c] ss:$16 sps:$4 sm:$0xff]  }
 0x2f1   :  { %5050 = vmatprep.subr.bf16.mxu1 %v6925_v9  ;;  %v7048_v9 = vld [vmem:[#allocation9 + $0xb4] ss:$8 sps:$4 sm:$0xff]  }
 0x2f3   :  { %5108 = vmatpush2.bf16.msra.mxu0 %v6926_v14  ;;  %v6974_v14 = vld [vmem:[#allocation6 + $0x668] ss:$16 sps:$4 sm:$0xff]  }
 0x2f4   :  { %5109 = vmatprep.subr.bf16.mxu0 %v6934_v15  ;;  %5051 = vmatpush1.bf16.msra.mxu1 %v6923_v16  ;;  %v6979_v15 = vld [vmem:[#allocation6 + $0x64c] ss:$16 sps:$4 sm:$0xff]  }
 0x2f5   :  { %5052 = vmatprep.subr.bf16.mxu1 %v6931_v17  ;;  %v7046_v16 = vld [vmem:[#allocation9 + $0xb0] ss:$8 sps:$4 sm:$0xff]   ;;  %v7051_v17 = vld [vmem:[#allocation9 + $0xa4] ss:$8 sps:$4 sm:$0xff]  }
 0x2f7   :  { %5110 = vmatpush2.bf16.msra.mxu0 %v6932_v52  ;;  %v6977_v52 = vld [vmem:[#allocation6 + $0x648] ss:$16 sps:$4 sm:$0xff]  }
 0x2f8   :  { %5111 = vmatprep.subr.bf16.mxu0 %v6940_v18  ;;  %5053 = vmatpush1.bf16.msra.mxu1 %v6929_v0  ;;  %v6982_v18 = vld [vmem:[#allocation6 + $0x62c] ss:$16 sps:$4 sm:$0xff]  }
 0x2f9   :  { %5054 = vmatprep.subr.bf16.mxu1 %v6937_v11  ;;  %v7049_v0 = vld [vmem:[#allocation9 + $0xa0] ss:$8 sps:$4 sm:$0xff]   ;;  %v7054_v11 = vld [vmem:[#allocation9 + $0x94] ss:$8 sps:$4 sm:$0xff]  }
 0x2fb   :  { %5112 = vmatpush2.bf16.msra.mxu0 %v6938_v19  ;;  %v6980_v19 = vld [vmem:[#allocation6 + $0x628] ss:$16 sps:$4 sm:$0xff]  }
 0x2fc   :  { %5575 = vmatprep.subr.bf16.mxu0 %v7012_v33  ;;  %5055 = vmatpush2.bf16.msra.mxu1 %v6935_v21  ;;  %v6985_v33 = vld [vmem:[#allocation6 + $0x60c] ss:$16 sps:$4 sm:$0xff]  }
 0x2fd   :  { %5056 = vmatprep.subr.bf16.mxu1 %v6943_v63  ;;  %v7052_v21 = vld [vmem:[#allocation9 + $0x90] ss:$8 sps:$4 sm:$0xff]   ;;  %v7057_v63 = vld [vmem:[#allocation9 + $0x84] ss:$8 sps:$4 sm:$0xff]  }
 0x2fe   :  { %5114 = vmatmul.mubr.bf16.vlgmr.msra.gmra.mxu0 %v7548_v1  ;;  %v7019_v1 = vld [vmem:[#allocation9 + $0x40] ss:$8 sps:$4 sm:$0xff]  }
 0x2ff   :  { %5576 = vmatpush1.bf16.msra.mxu0 %v7010_v13  ;;  %v6983_v13 = vld [vmem:[#allocation6 + $0x608] ss:$16 sps:$4 sm:$0xff]  }
 0x300   :  { %5577 = vmatprep.subr.bf16.mxu0 %v7015_v57  ;;  %5057 = vmatpush2.bf16.msra.mxu1 %v6941_v22  ;;  %v6988_v57 = vld [vmem:[#allocation6 + $0x7ec] ss:$16 sps:$4 sm:$0xff]  }
 0x301   :  { %5058 = vmatprep.subr.bf16.mxu1 %v6946_v24  ;;  %v7055_v22 = vld [vmem:[#allocation9 + $0x80] ss:$8 sps:$4 sm:$0xff]   ;;  %v6986_v24 = vld [vmem:[#allocation6 + $0x7e8] ss:$16 sps:$4 sm:$0xff]  }
 0x303   :  { %5578 = vmatpush1.bf16.msra.mxu0 %v7013_v39  ;;  %v6991_v39 = vld [vmem:[#allocation6 + $0x7cc] ss:$16 sps:$4 sm:$0xff]  }
 0x304   :  { %5579 = vmatprep.subr.bf16.mxu0 %v7018_v25  ;;  %5059 = vmatpush2.bf16.msra.mxu1 %v6944_v29  ;;  %v6989_v25 = vld [vmem:[#allocation6 + $0x7c8] ss:$16 sps:$4 sm:$0xff]   ;;  %v6994_v29 = vld [vmem:[#allocation6 + $0x7ac] ss:$16 sps:$4 sm:$0xff]  }
 0x305   :  { %5060 = vmatprep.subr.bf16.mxu1 %v6949_v26  ;;  %v6992_v26 = vld [vmem:[#allocation6 + $0x7a8] ss:$16 sps:$4 sm:$0xff]  }
 0x307   :  { %5580 = vmatpush1.bf16.msra.mxu0 %v7016_v27  ;;  %v6997_v27 = vld [vmem:[#allocation6 + $0x78c] ss:$16 sps:$4 sm:$0xff]  }
 0x308   :  { %5581 = vmatprep.subr.bf16.mxu0 %v7021_v20  ;;  %5061 = vmatpush2.bf16.msra.mxu1 %v6947_v28  ;;  %v6995_v20 = vld [vmem:[#allocation6 + $0x788] ss:$16 sps:$4 sm:$0xff]   ;;  %v7000_v28 = vld [vmem:[#allocation6 + $0x76c] ss:$16 sps:$4 sm:$0xff]  }
 0x309   :  { %5062 = vmatprep.subr.bf16.mxu1 %v6952_v43  ;;  %v6998_v43 = vld [vmem:[#allocation6 + $0x768] ss:$16 sps:$4 sm:$0xff]  }
 0x30b   :  { %5582 = vmatpush1.bf16.msra.mxu0 %v7019_v1  ;;  %v7003_v1 = vld [vmem:[#allocation6 + $0x74c] ss:$16 sps:$4 sm:$0xff]  }
 0x30c   :  { %5583 = vmatprep.subr.bf16.mxu0 %v7024_v30  ;;  %5063 = vmatpush2.bf16.msra.mxu1 %v6950_v48  ;;  %v7001_v30 = vld [vmem:[#allocation6 + $0x748] ss:$16 sps:$4 sm:$0xff]   ;;  %v7006_v48 = vld [vmem:[#allocation6 + $0x72c] ss:$16 sps:$4 sm:$0xff]  }
 0x30d   :  { %5064 = vmatprep.subr.bf16.mxu1 %v6955_v35  ;;  %v7004_v35 = vld [vmem:[#allocation6 + $0x728] ss:$16 sps:$4 sm:$0xff]  }
 0x30f   :  { %5584 = vmatpush1.bf16.msra.mxu0 %v7022_v36  ;;  %v7009_v36 = vld [vmem:[#allocation6 + $0x70c] ss:$16 sps:$4 sm:$0xff]  }
 0x310   :  { %5585 = vmatprep.subr.bf16.mxu0 %v7027_v37  ;;  %5065 = vmatpush2.bf16.msra.mxu1 %v6953_v34  ;;  %v7007_v37 = vld [vmem:[#allocation6 + $0x708] ss:$16 sps:$4 sm:$0xff]   ;;  %v7058_v34 = vld [vmem:[#allocation9 + $0x170] ss:$8 sps:$4 sm:$0xff]  }
 0x311   :  { %5066 = vmatprep.subr.bf16.mxu1 %v6958_v32  ;;  %v7060_v32 = vld [vmem:[#allocation9 + $0x174] ss:$8 sps:$4 sm:$0xff]  }
 0x313   :  { %5586 = vmatpush1.bf16.msra.mxu0 %v7025_v49  ;;  %v7063_v49 = vld [vmem:[#allocation9 + $0x164] ss:$8 sps:$4 sm:$0xff]  }
 0x314   :  { %5587 = vmatprep.subr.bf16.mxu0 %v7030_v41  ;;  %5067 = vmatpush2.bf16.msra.mxu1 %v6956_v45  ;;  %v7061_v41 = vld [vmem:[#allocation9 + $0x160] ss:$8 sps:$4 sm:$0xff]   ;;  %v7066_v45 = vld [vmem:[#allocation9 + $0x154] ss:$8 sps:$4 sm:$0xff]  }
 0x315   :  { %5068 = vmatprep.subr.bf16.mxu1 %v6961_v46  ;;  %v7064_v46 = vld [vmem:[#allocation9 + $0x150] ss:$8 sps:$4 sm:$0xff]  }
 0x317   :  { %5588 = vmatpush1.bf16.msra.mxu0 %v7028_v47  ;;  %v7069_v47 = vld [vmem:[#allocation9 + $0x144] ss:$8 sps:$4 sm:$0xff]  }
 0x318   :  { %5589 = vmatprep.subr.bf16.mxu0 %v7033_v50  ;;  %5069 = vmatpush2.bf16.msra.mxu1 %v6959_v51  ;;  %v7067_v50 = vld [vmem:[#allocation9 + $0x140] ss:$8 sps:$4 sm:$0xff]   ;;  %v7072_v51 = vld [vmem:[#allocation9 + $0x134] ss:$8 sps:$4 sm:$0xff]  }
 0x319   :  { %5124 = vmatprep.subr.bf16.mxu1 %v6964_v53  ;;  %v7070_v53 = vld [vmem:[#allocation9 + $0x130] ss:$8 sps:$4 sm:$0xff]  }
 0x31b   :  { %5590 = vmatpush1.bf16.msra.mxu0 %v7031_v54  ;;  %5071 = vmatmul.mubr.bf16.vlgmr.msra.gmra.mxu1 %v7530_v23  ;;  %v6971_v23 = vld [vmem:[#allocation6 + $0x688] ss:$16 sps:$4 sm:$0xff]   ;;  %v7073_v54 = vld [vmem:[#allocation9 + $0x120] ss:$8 sps:$4 sm:$0xff]  }
 0x31c   :  { %5591 = vmatprep.subr.bf16.mxu0 %v7036_v55  ;;  %5125 = vmatpush1.bf16.msra.mxu1 %v6962_v10  ;;  %v7078_v55 = vld [vmem:[#allocation9 + $0x114] ss:$8 sps:$4 sm:$0xff]   ;;  %v7076_v10 = vld [vmem:[#allocation9 + $0x110] ss:$8 sps:$4 sm:$0xff]  }
 0x31d   :  { %5156 = vmatprep.mubr.bf16.mxu1 %v7559_v44  ;;  %5126 = vmatprep.subr.bf16.mxu1 %v6967_v56  ;;  %v7043_v44 = vld [vmem:[#allocation9 + $0xc0] ss:$8 sps:$4 sm:$0xff]   ;;  %v7081_v56 = vld [vmem:[#allocation9 + $0x104] ss:$8 sps:$4 sm:$0xff]  }
 0x31f   :  { %5592 = vmatpush2.bf16.msra.mxu0 %v7034_v60  ;;  %v7079_v60 = vld [vmem:[#allocation9 + $0x100] ss:$8 sps:$4 sm:$0xff]  }
 0x320   :  { %5593 = vmatprep.subr.bf16.mxu0 %v7039_v62  ;;  %5127 = vmatpush1.bf16.msra.mxu1 %v6965_v7  ;;  %v7084_v62 = vld [vmem:[#allocation9 + $0x1f4] ss:$8 sps:$4 sm:$0xff]   ;;  %v7082_v7 = vld [vmem:[#allocation9 + $0x1f0] ss:$8 sps:$4 sm:$0xff]  }
 0x321   :  { %5128 = vmatprep.subr.bf16.mxu1 %v6970_v40  ;;  %v7087_v40 = vld [vmem:[#allocation9 + $0x1e4] ss:$8 sps:$4 sm:$0xff]  }
 0x323   :  { %5594 = vmatpush2.bf16.msra.mxu0 %v7037_v42  ;;  %v4857_v42 = vpop.f32.mrf.mxu0 }
 0x324   :  { %5595 = vmatprep.subr.bf16.mxu0 %v7042_v61  ;;  %5129 = vmatpush1.bf16.msra.mxu1 %v6968_v2  ;;  %v7085_v61 = vld [vmem:[#allocation9 + $0x1e0] ss:$8 sps:$4 sm:$0xff]   ;;  %v7090_v2 = vld [vmem:[#allocation9 + $0x1d4] ss:$8 sps:$4 sm:$0xff]  }
 0x325   :  { %5130 = vmatprep.subr.bf16.mxu1 %v6973_v3  ;;  %v4859_v3 = vpop.f32.mrf.mxu0 }
 0x327   :  { %5596 = vmatpush2.bf16.msra.mxu0 %v7040_v4  ;;  %v7088_v4 = vld [vmem:[#allocation9 + $0x1d0] ss:$8 sps:$4 sm:$0xff]  }
 0x328   :  { %5597 = vmatprep.subr.bf16.mxu0 %v7045_v6  ;;  %5131 = vmatpush1.bf16.msra.mxu1 %v6971_v23  ;;  %v7093_v6 = vld [vmem:[#allocation9 + $0x1c4] ss:$8 sps:$4 sm:$0xff]   ;;  %v4861_v23 = vpop.f32.mrf.mxu0 }
 0x329   :  { %5132 = vmatprep.subr.bf16.mxu1 %v6976_v8  ;;  %v4900_v8 = vpop.f32.mrf.mxu1 }
 0x32b   :  { %5598 = vmatpush2.bf16.msra.mxu0 %v7043_v44  ;;  %v7091_v44 = vld [vmem:[#allocation9 + $0x1c0] ss:$8 sps:$4 sm:$0xff]  }
 0x32c   :  { %5599 = vmatprep.subr.bf16.mxu0 %v7048_v9  ;;  %5133 = vmatpush1.bf16.msra.mxu1 %v6974_v14  ;;  %v7096_v9 = vld [vmem:[#allocation9 + $0x1b4] ss:$8 sps:$4 sm:$0xff]   ;;  %v4863_v14 = vpop.f32.mrf.mxu0 }
 0x32d   :  { %5134 = vmatprep.subr.bf16.mxu1 %v6979_v15  ;;  %v4902_v15 = vpop.f32.mrf.mxu1 }
 0x32f   :  { %5600 = vmatpush2.bf16.msra.mxu0 %v7046_v16 }
 0x330   :  { %5601 = vmatprep.subr.bf16.mxu0 %v7051_v17  ;;  %5135 = vmatpush1.bf16.msra.mxu1 %v6977_v52  ;;  %v7094_v17 = vld [vmem:[#allocation9 + $0x1b0] ss:$8 sps:$4 sm:$0xff]   ;;  %v7570_v52 = vld [vmem:[#allocation7] sm:$0xf] }
 0x331   :  { %5136 = vmatprep.subr.bf16.mxu1 %v6982_v18  ;;  %v4904_v18 = vpop.f32.mrf.mxu1 }
 0x333   :  { %5602 = vmatpush2.bf16.msra.mxu0 %v7049_v0 }
 0x334   :  { %5603 = vmatprep.subr.bf16.mxu0 %v7054_v11  ;;  %5137 = vmatpush1.bf16.msra.mxu1 %v6980_v19  ;;  %v3530_v11 = vrot.slane %v7570_v52, %v7501_v58  ;;  %v3526_v19 = vrot.slane %v7570_v52, %v7463_v5 }
 0x335   :  { %5138 = vmatprep.subr.bf16.mxu1 %v6985_v33  ;;  %v4906_v33 = vpop.f32.mrf.mxu1 }
 0x337   :  { %5604 = vmatpush2.bf16.msra.mxu0 %v7052_v21 }
 0x338   :  { %5605 = vmatprep.subr.bf16.mxu0 %v7057_v63  ;;  %5139 = vmatpush1.bf16.msra.mxu1 %v6983_v13  ;;  %v4860_v63 = vadd.f32 %v4859_v3, %v3530_v11  ;;  %v4862_v13 = vadd.f32 %v4861_v23, %v3526_v19  ;;  %v7114_v3 = vld [vmem:[#allocation12 + $0x58] sm:$0xff]  }
 0x339   :  { %5140 = vmatprep.subr.bf16.mxu1 %v6988_v57  ;;  %v4858_v57 = vadd.f32 %v4857_v42, %v3526_v19  ;;  %v7111_v42 = vld [vmem:[#allocation12 + $0x28] sm:$0xff]  }
 0x33b   :  { %5606 = vmatpush2.bf16.msra.mxu0 %v7055_v22 }
 0x33c   :  { %5141 = vmatpush2.bf16.msra.mxu1 %v6986_v24  ;;  %v7099_v24 = vld [vmem:[#allocation9 + $0x1a4] ss:$8 sps:$4 sm:$0xff]  }
 0x33d   :  { %5142 = vmatprep.subr.bf16.mxu1 %v6991_v39  ;;  %v4864_v39 = vadd.f32 %v4863_v14, %v3530_v11 }
 0x33e   :  { %v4943_v16 = vpop.f32.mrf.mxu0 }
 0x340   :  { %5143 = vmatpush2.bf16.msra.mxu1 %v6989_v25  ;;  %v4945_v0 = vpop.f32.mrf.mxu0  ;;  %v4903_v25 = vadd.f32 %v4902_v15, %v4860_v63 }
 0x341   :  { %5144 = vmatprep.subr.bf16.mxu1 %v6994_v29  ;;  %v4905_v29 = vadd.f32 %v4904_v18, %v4862_v13 }
 0x342   :  { %v4947_v21 = vpop.f32.mrf.mxu0 }
 0x344   :  { %5145 = vmatpush2.bf16.msra.mxu1 %v6992_v26  ;;  %v7097_v26 = vld [vmem:[#allocation9 + $0x1a0] ss:$8 sps:$4 sm:$0xff]  }
 0x345   :  { %5146 = vmatprep.subr.bf16.mxu1 %v6997_v27  ;;  %v4901_v27 = vadd.f32 %v4900_v8, %v4858_v57 }
 0x348   :  { %5147 = vmatpush2.bf16.msra.mxu1 %v6995_v20  ;;  %v4949_v20 = vpop.f32.mrf.mxu0 }
 0x349   :  { %5148 = vmatprep.subr.bf16.mxu1 %v7000_v28 }
 0x34c   :  { %5149 = vmatpush2.bf16.msra.mxu1 %v6998_v43  ;;  %v4907_v43 = vadd.f32 %v4906_v33, %v4864_v39 }
 0x34d   :  { %5150 = vmatprep.subr.bf16.mxu1 %v7003_v1  ;;  %v4946_v1 = vadd.f32 %v4945_v0, %v4903_v25 }
 0x350   :  { %5151 = vmatpush2.bf16.msra.mxu1 %v7001_v30  ;;  %v4948_v30 = vadd.f32 %v4947_v21, %v4905_v29 }
 0x351   :  { %5152 = vmatprep.subr.bf16.mxu1 %v7006_v48  ;;  %v4944_v48 = vadd.f32 %v4943_v16, %v4901_v27  ;;  %v3538_v16 = vrot.slane %v7570_v52, %v563_v31 }
 0x354   :  { %5153 = vmatpush2.bf16.msra.mxu1 %v7004_v35 }
 0x355   :  { %5154 = vmatprep.subr.bf16.mxu1 %v7009_v36  ;;  %v7102_v36 = vld [vmem:[#allocation9 + $0x194] ss:$8 sps:$4 sm:$0xff]  }
 0x358   :  { %5155 = vmatpush2.bf16.msra.mxu1 %v7007_v37  ;;  %v4950_v37 = vadd.f32 %v4949_v20, %v4907_v43 }
 0x359   :  { %5618 = vmatprep.subr.bf16.mxu1 %v7060_v32 }
 0x35b   :  { %5157 = vmatmul.mubr.bf16.vlgmr.msra.gmra.mxu1 %v7561_v12  ;;  %v7075_v12 = vld [vmem:[#allocation9 + $0x124] ss:$8 sps:$4 sm:$0xff]  }
 0x35c   :  { %5619 = vmatpush1.bf16.msra.mxu1 %v7058_v34 }
 0x35d   :  { %5620 = vmatprep.subr.bf16.mxu1 %v7063_v49  ;;  %v7100_v49 = vld [vmem:[#allocation9 + $0x190] ss:$8 sps:$4 sm:$0xff]  }
 0x360   :  { %5621 = vmatpush1.bf16.msra.mxu1 %v7061_v41 }
 0x361   :  { %5622 = vmatprep.subr.bf16.mxu1 %v7066_v45 }
 0x364   :  { %5623 = vmatpush1.bf16.msra.mxu1 %v7064_v46 }
 0x365   :  { %5624 = vmatprep.subr.bf16.mxu1 %v7069_v47 }
 0x368   :  { %5625 = vmatpush1.bf16.msra.mxu1 %v7067_v50  ;;  %v7105_v50 = vld [vmem:[#allocation9 + $0x184] ss:$8 sps:$4 sm:$0xff]  }
 0x369   :  { %5626 = vmatprep.subr.bf16.mxu1 %v7072_v51 }
 0x36c   :  { %5627 = vmatpush1.bf16.msra.mxu1 %v7070_v53 }
 0x36d   :  { %5628 = vmatprep.subr.bf16.mxu1 %v7075_v12  ;;  %v7103_v12 = vld [vmem:[#allocation9 + $0x180] ss:$8 sps:$4 sm:$0xff]  }
 0x370   :  { %5629 = vmatpush1.bf16.msra.mxu1 %v7073_v54 }
 0x371   :  { %5630 = vmatprep.subr.bf16.mxu1 %v7078_v55 }
 0x374   :  { %5631 = vmatpush1.bf16.msra.mxu1 %v7076_v10 }
 0x375   :  { %5632 = vmatprep.subr.bf16.mxu1 %v7081_v56  ;;  %v7106_v56 = vld [vmem:[#allocation12 + $0x78] sm:$0xff]  }
 0x376   :  { %6587 = vmatprep.subr.bf16.mxu0 %v7106_v56 }
 0x378   :  { %5633 = vmatpush1.bf16.msra.mxu1 %v7079_v60  ;;  %v7107_v60 = vld [vmem:[#allocation12 + $0x38] sm:$0xff]  }
 0x379   :  { %5634 = vmatprep.subr.bf16.mxu1 %v7084_v62  ;;  %v7108_v62 = vld [vmem:[#allocation12 + $0x70] sm:$0xff]  }
 0x37c   :  { %5635 = vmatpush2.bf16.msra.mxu1 %v7082_v7  ;;  %v7109_v7 = vld [vmem:[#allocation12 + $0x30] sm:$0xff]  }
 0x37d   :  { %5636 = vmatprep.subr.bf16.mxu1 %v7087_v40  ;;  %v7110_v40 = vld [vmem:[#allocation12 + $0x68] sm:$0xff]  }
 0x380   :  { %5637 = vmatpush2.bf16.msra.mxu1 %v7085_v61  ;;  %v7112_v61 = vld [vmem:[#allocation12 + $0x60] sm:$0xff]  }
 0x381   :  { %5638 = vmatprep.subr.bf16.mxu1 %v7090_v2  ;;  %v7113_v2 = vld [vmem:[#allocation12 + $0x20] sm:$0xff]  }
 0x384   :  { %5639 = vmatpush2.bf16.msra.mxu1 %v7088_v4  ;;  %v7115_v4 = vld [vmem:[#allocation12 + $0x18] sm:$0xff]  }
 0x385   :  { %5640 = vmatprep.subr.bf16.mxu1 %v7093_v6  ;;  %v5029_v6 = vpop.f32.mrf.mxu0 }
 0x387   :  { %v5031_v23 = vpop.f32.mrf.mxu0 }
 0x388   :  { %5641 = vmatpush2.bf16.msra.mxu1 %v7091_v44  ;;  %v5032_v11 = vadd.f32 %v5031_v23, %v3538_v16 }
 0x389   :  { %5642 = vmatprep.subr.bf16.mxu1 %v7096_v9  ;;  %v5033_v8 = vpop.f32.mrf.mxu0 }
 0x38b   :  { %v5035_v9 = vpop.f32.mrf.mxu0 }
 0x38c   :  { %5643 = vmatpush2.bf16.msra.mxu1 %v7094_v17  ;;  %v3534_v17 = vrot.slane %v7570_v52, %v559_v38  ;;  %v5036_v63 = vadd.f32 %v5035_v9, %v3538_v16 }
 0x38d   :  { %5644 = vmatprep.subr.bf16.mxu1 %v7099_v24 }
 0x38e   :  { %v5034_v19 = vadd.f32 %v5033_v8, %v3534_v17  ;;  %v5030_v33 = vadd.f32 %v5029_v6, %v3534_v17  ;;  %v6570_v17 = vld [vmem:[#allocation13] ss:$0 sm:$0xff] }
 0x390   :  { %5645 = vmatpush2.bf16.msra.mxu1 %v7097_v26 }
 0x391   :  { %5646 = vmatprep.subr.bf16.mxu1 %v7102_v36 }
 0x394   :  { %5647 = vmatpush2.bf16.msra.mxu1 %v7100_v49  ;;  %v7116_v49 = vld [vmem:[#allocation12 + $0x50] sm:$0xff]  }
 0x395   :  { %5648 = vmatprep.subr.bf16.mxu1 %v7105_v50  ;;  %v7121_v50 = vld [vmem:[#allocation12] sm:$0xff]  }
 0x398   :  { %5649 = vmatpush2.bf16.msra.mxu1 %v7103_v12  ;;  %v5243_v12 = vld [vmem:[#allocation10] sm:$0x3] }
 0x39b   :  { %v4986_v22 = vpop.f32.mrf.mxu1 }
 0x39c   :  { %v4987_v41 = vadd.f32 %v4986_v22, %v4944_v48 }
 0x39d   :  { %v4988_v28 = vpop.f32.mrf.mxu1 }
 0x39e   :  { %v4989_v34 = vadd.f32 %v4988_v28, %v4946_v1  ;;  %v5167_v54 = vmax.f32 %v4987_v41, 0.0  ;;  %v7117_v41 = vld [vmem:[#allocation12 + $0x10] sm:$0xff]  }
 0x39f   :  { %v4990_v35 = vpop.f32.mrf.mxu1 }
 0x3a0   :  { %v4991_v32 = vadd.f32 %v4990_v35, %v4948_v30  ;;  %v5168_v51 = vmax.f32 %v4989_v34, 0.0 }
 0x3a1   :  { %v4992_v45 = vpop.f32.mrf.mxu1 }
 0x3a2   :  { %v4993_v46 = vadd.f32 %v4992_v45, %v4950_v37  ;;  %v5171_v47 = vmax.f32 %v4991_v32, 0.0  ;;  %v7118_v45 = vld [vmem:[#allocation12 + $0x48] sm:$0xff]  }
 0x3a4   :  { %v5172_v53 = vmax.f32 %v4993_v46, 0.0  ;;  %v5175_v10 = vpack.c.bf16 %v5171_v47, %v5167_v54  ;;  %v7119_v46 = vld [vmem:[#allocation12 + $0x8] sm:$0xff]   ;;  %v7120_v47 = vld [vmem:[#allocation12 + $0x40] sm:$0xff]  }
 0x3a6   :  { %v5176_v55 = vpack.c.bf16 %v5172_v53, %v5168_v51 }
 0x3a8   :  { %5607 = vmatprep.mubr.bf16.mxu0 %v5176_v55  ;;  %v5252_v55 = vrot.slane %v5243_v12, %v7501_v58 }
 0x3a9   :  { %5608 = vmatmul.mubr.bf16.vlgmr.msra.gmra.mxu0 %v5175_v10  ;;  %v5248_v10 = vrot.slane %v5243_v12, %v7463_v5 }
 0x3aa   :  { %6588 = vmatpush3.bf16.msra.mxu0 %v7107_v60 }
 0x3ab   :  { %6589 = vmatprep.subr.bf16.mxu0 %v7108_v62 }
 0x3ae   :  { %6590 = vmatpush3.bf16.msra.mxu0 %v7109_v7 }
 0x3af   :  { %6591 = vmatprep.subr.bf16.mxu0 %v7110_v40 }
 0x3b2   :  { %6592 = vmatpush3.bf16.msra.mxu0 %v7111_v42 }
 0x3b3   :  { %6593 = vmatprep.subr.bf16.mxu0 %v7112_v61 }
 0x3b6   :  { %6594 = vmatpush3.bf16.msra.mxu0 %v7113_v2 }
 0x3b7   :  { %6595 = vmatprep.subr.bf16.mxu0 %v7114_v3 }
 0x3ba   :  { %6596 = vmatpush3.bf16.msra.mxu0 %v7115_v4 }
 0x3bb   :  { %6597 = vmatprep.subr.bf16.mxu0 %v7116_v49 }
 0x3be   :  { %v5115_v15 = vpop.f32.mrf.mxu0  ;;  %6598 = vmatpush3.bf16.msra.mxu0 %v7117_v41 }
 0x3bf   :  { %6599 = vmatprep.subr.bf16.mxu0 %v7118_v45 }
 0x3c0   :  { %v5117_v0 = vpop.f32.mrf.mxu0 }
 0x3c2   :  { %v5119_v22 = vpop.f32.mrf.mxu0  ;;  %6600 = vmatpush3.bf16.msra.mxu0 %v7119_v46 }
 0x3c3   :  { %6601 = vmatprep.subr.bf16.mxu0 %v7120_v47 }
 0x3c4   :  { %v5121_v27 = vpop.f32.mrf.mxu0 }
 0x3c6   :  { %6602 = vmatpush3.bf16.msra.mxu0 %v7121_v50 }
 0x3db   :  { %v5072_v44 = vpop.f32.mrf.mxu1 }
 0x3dc   :  { %v5073_v24 = vadd.f32 %v5072_v44, %v5030_v33 }
 0x3dd   :  { %v5074_v14 = vpop.f32.mrf.mxu1 }
 0x3de   :  { %v5075_v13 = vadd.f32 %v5074_v14, %v5032_v11  ;;  %v5116_v59 = vadd.f32 %v5115_v15, %v5073_v24 }
 0x3df   :  { %v5076_v18 = vpop.f32.mrf.mxu1 }
 0x3e0   :  { %v5077_v57 = vadd.f32 %v5076_v18, %v5034_v19  ;;  %v5118_v26 = vadd.f32 %v5117_v0, %v5075_v13 }
 0x3e1   :  { %v5078_v21 = vpop.f32.mrf.mxu1 }
 0x3e2   :  { %v5079_v25 = vadd.f32 %v5078_v21, %v5036_v63  ;;  %v5120_v31 = vadd.f32 %v5119_v22, %v5077_v57 }
 0x3e4   :  { %v5122_v28 = vadd.f32 %v5121_v27, %v5079_v25 }
 0x41b   :  { %v5158_v39 = vpop.f32.mrf.mxu1 }
 0x41c   :  { %v5159_v43 = vadd.f32 %v5158_v39, %v5116_v59 }
 0x41d   :  { %v5160_v29 = vpop.f32.mrf.mxu1 }
 0x41e   :  { %v5161_v38 = vadd.f32 %v5160_v29, %v5118_v26  ;;  %v5169_v37 = vmax.f32 %v5159_v43, 0.0 }
 0x41f   :  { %v5162_v20 = vpop.f32.mrf.mxu1 }
 0x420   :  { %v5163_v52 = vadd.f32 %v5162_v20, %v5120_v31  ;;  %v5170_v35 = vmax.f32 %v5161_v38, 0.0 }
 0x421   :  { %v5164_v1 = vpop.f32.mrf.mxu1 }
 0x422   :  { %v5165_v30 = vadd.f32 %v5164_v1, %v5122_v28  ;;  %v5173_v48 = vmax.f32 %v5163_v52, 0.0 }
 0x424   :  { %v5174_v36 = vmax.f32 %v5165_v30, 0.0  ;;  %v5177_v32 = vpack.c.bf16 %v5173_v48, %v5169_v37 }
 0x426   :  { %v5178_v34 = vpack.c.bf16 %v5174_v36, %v5170_v35 }
 0x428   :  { %5650 = vmatprep.mubr.bf16.mxu1 %v5178_v34 }
 0x429   :  { %5651 = vmatmul.mubr.bf16.vlgmr.msra.gmra.mxu1 %v5177_v32 }
 0x469   :  { %v5609_v51 = vpop.f32.mrf.mxu0 }
 0x46a   :  { %v5610_v42 = vadd.f32 %v5609_v51, %v5248_v10 }
 0x46b   :  { %v5611_v53 = vpop.f32.mrf.mxu0 }
 0x46c   :  { %v5612_v7 = vadd.f32 %v5611_v53, %v5252_v55 }
 0x46d   :  { %v5613_v54 = vpop.f32.mrf.mxu0 }
 0x46e   :  { %v5614_v40 = vadd.f32 %v5613_v54, %v5248_v10 }
 0x46f   :  { %v5615_v60 = vpop.f32.mrf.mxu0 }
 0x470   :  { %v5616_v2 = vadd.f32 %v5615_v60, %v5252_v55 }
 0x4e9   :  { %v5652_v56 = vpop.f32.mrf.mxu1 }
 0x4ea   :  { %v5653_v6 = vadd.f32 %v5652_v56, %v5610_v42 }
 0x4eb   :  { %v5654_v62 = vpop.f32.mrf.mxu1 }
 0x4ec   :  { %v5655_v3 = vadd.f32 %v5654_v62, %v5612_v7  ;;  %v5661_v15 = vmax.f32 %v5653_v6, 0.0 }
 0x4ed   :  { %v5656_v61 = vpop.f32.mrf.mxu1 }
 0x4ee   :  { %v5657_v4 = vadd.f32 %v5656_v61, %v5614_v40  ;;  %v5662_v9 = vmax.f32 %v5655_v3, 0.0 }
 0x4ef   :  { %v5658_v23 = vpop.f32.mrf.mxu1 }
 0x4f0   :  { %v5659_v8 = vadd.f32 %v5658_v23, %v5616_v2  ;;  %v5663_v44 = vmax.f32 %v5657_v4, 0.0 }
 0x4f2   :  { %v5664_v14 = vmax.f32 %v5659_v8, 0.0  ;;  %v5665_v16 = vpack.c.bf16 %v5663_v44, %v5661_v15 }
 0x4f4   :  { %v5666_v58 = vpack.c.bf16 %v5664_v14, %v5662_v9 }
 0x4f6   :  { %5834 = vmatprep.mubr.bf16.mxu0 %v5666_v58 }
 0x4f7   :  { %5835 = vmatmul.mubr.bf16.vlgmr.msra.gmra.mxu0 %v5665_v16 }
 0x5b7   :  { %v6603_v5 = vpop.f32.mrf.mxu0 }
 0x5b9   :  { %v6604_v18 = vpop.f32.mrf.mxu0 }
 0x5ba   :  { %v6605_v0 = vadd.f32 %v6604_v18, %v6603_v5 }
 0x5bb   :  { %v6606_v11 = vpop.f32.mrf.mxu0 }
 0x5bc   :  { %v5837_v19 = vadd.f32 %v6605_v0, %v6570_v17 }
 0x5bd   :  { %v6607_v33 = vpop.f32.mrf.mxu0 }
 0x5be   :  { %5843 = vst [vmem:[%s7599_s9] sm:$0xff] %v5837_v19  ;;  %v6608_v21 = vadd.f32 %v6607_v33, %v6606_v11 }
 0x5c0   :  { %v5840_v63 = vadd.f32 %v6608_v21, %v6570_v17 }
 0x5c2   :  { %5844 = vst [vmem:[%s7599_s9 + $0x8] sm:$0xff] %v5840_v63 }
 0x5c3   :  { %5849 = vsyncpa [#allocation3], 1 }
 0x5c4   :  { %5850 = vsyncpa [#allocation5], 1 }
 0x5c5   :  { %5851 = vsyncpa [#allocation8], 1 }
 0x5c6   :  { %5852 = vsyncpa [#allocation11], 1 }
 0x5c7   :  { %5853 = vsyncpa [#allocation14], 1 }

</bundles_post_ra>
